<compile_context>
chip_gen: v7x
topology: tpu7x:2x2x1
jax: 0.10.0
libtpu: 0.0.40
codegen_flags: <defaults>
</compile_context>

<pallas_src>
import math
from functools import partial

import jax
import jax.numpy as jnp
from jax.experimental import pallas as pl
from jax.experimental.pallas import tpu as pltpu

LN_EPS = 1e-6
NEG_INF = -1e9


# ---------------------------------------------------------------------------
# In-kernel helpers
# ---------------------------------------------------------------------------
def _custom_layernorm(res, ln_w, ln_b):
    # Matches the module's LayerNorm: *sample* std (ddof=1), divides by (std+eps).
    d = res.shape[-1]
    mean = jnp.mean(res, axis=-1, keepdims=True)
    diff = res - mean
    var = jnp.sum(diff * diff, axis=-1, keepdims=True) * (1.0 / (d - 1))
    inv = pl.reciprocal(jnp.sqrt(var) + LN_EPS, approx=True)   # EUP, off the VPU
    return ln_w * (diff * inv) + ln_b


# ---------------------------------------------------------------------------
# Fused whole-block kernel (one batch item per grid step, both streams inside)
# ---------------------------------------------------------------------------
def block_kernel(xt_ref, xo_ref, xs_ref, mask_ref,
                 swq_ref, sbq_ref, swk_ref, sbk_ref, swv_ref, sbv_ref,
                 slnw_ref, slnb_ref,
                 cwq_ref, cbq_ref, cwk_ref, cbk_ref, cwv_ref, cbv_ref,
                 clnw_ref, clnb_ref,
                 fw1_ref, fb1_ref, fw2_ref, fb2_ref, flnw_ref, flnb_ref,
                 out_t_ref, out_o_ref,
                 *, num_heads, head_size, dot_dtype):
    D = num_heads * head_size
    scale = 1.0 / math.sqrt(head_size)

    xt = xt_ref[...]                      # (S, D), dot_dtype
    xo = xo_ref[...]                      # (S, D), dot_dtype
    valid = mask_ref[...] != 0.0          # (S, S) combined padding+causal mask

    def mha(xq, xkv, wq, bq, wk, bk, wv, bv, lnw, lnb):
        """QKV projection + masked attention (heads batched) + residual + LN."""
        S = xq.shape[0]
        q = (jnp.dot(xq, wq, preferred_element_type=jnp.float32) + bq) * scale
        k = jnp.dot(xkv, wk, preferred_element_type=jnp.float32) + bk
        v = jnp.dot(xkv, wv, preferred_element_type=jnp.float32) + bv

        # (S, D) -> (H, S, hs): heads become the batch dim of one batched dot.
        qh = jnp.transpose(q.reshape(S, num_heads, head_size), (1, 0, 2)).astype(dot_dtype)
        kh = jnp.transpose(k.reshape(S, num_heads, head_size), (1, 0, 2)).astype(dot_dtype)
        vh = jnp.transpose(v.reshape(S, num_heads, head_size), (1, 0, 2)).astype(dot_dtype)

        s = jnp.einsum("hqd,hkd->hqk", qh, kh,
                       preferred_element_type=jnp.float32)        # (H, S, S)
        s = jnp.where(valid[None, :, :], s, NEG_INF)               # masked_fill(-1e9)

        m = jnp.max(s, axis=-1, keepdims=True)
        p = jnp.exp(s - m)
        p = p * pl.reciprocal(jnp.sum(p, axis=-1, keepdims=True), approx=True)

        o = jnp.einsum("hqk,hkd->hqd", p.astype(dot_dtype), vh,
                       preferred_element_type=jnp.float32)        # (H, S, hs)
        attn = jnp.transpose(o, (1, 0, 2)).reshape(S, D)           # (S, D)
        res = attn + xq.astype(jnp.float32)
        return _custom_layernorm(res, lnw, lnb)

    def ff(xin, w1, b1, w2, b2, lnw, lnb):
        """Conv1d(k=1) -> ReLU -> Conv1d(k=1) -> residual -> LN."""
        h = jnp.dot(xin.astype(dot_dtype), w1,
                    preferred_element_type=jnp.float32) + b1
        h = jnp.maximum(h, 0.0)
        y = jnp.dot(h.astype(dot_dtype), w2,
                    preferred_element_type=jnp.float32) + b2
        return _custom_layernorm(y + xin, lnw, lnb)

    # Stage 1: self-attention for both streams.
    xt_self = mha(xt, xt, swq_ref[0], sbq_ref[0], swk_ref[0], sbk_ref[0],
                  swv_ref[0], sbv_ref[0], slnw_ref[0], slnb_ref[0])
    xo_self = mha(xo, xo, swq_ref[1], sbq_ref[1], swk_ref[1], sbk_ref[1],
                  swv_ref[1], sbv_ref[1], slnw_ref[1], slnb_ref[1])

    # Stage 2: cross-attention t<-o and o<-t (queries are stage-1 outputs).
    xt_cross = mha(xt_self.astype(dot_dtype), xo,
                   cwq_ref[0], cbq_ref[0], cwk_ref[0], cbk_ref[0],
                   cwv_ref[0], cbv_ref[0], clnw_ref[0], clnb_ref[0])
    xo_cross = mha(xo_self.astype(dot_dtype), xt,
                   cwq_ref[1], cbq_ref[1], cwk_ref[1], cbk_ref[1],
                   cwv_ref[1], cbv_ref[1], clnw_ref[1], clnb_ref[1])

    # Stage 3: per-stream feed-forward on (cross_out + x_s).
    xs = xs_ref[...].astype(jnp.float32)
    out_t_ref[...] = ff(xt_cross + xs, fw1_ref[0], fb1_ref[0], fw2_ref[0],
                        fb2_ref[0], flnw_ref[0], flnb_ref[0])
    out_o_ref[...] = ff(xo_cross + xs, fw1_ref[1], fb1_ref[1], fw2_ref[1],
                        fb2_ref[1], flnw_ref[1], flnb_ref[1])


# ---------------------------------------------------------------------------
# Wrapper
# ---------------------------------------------------------------------------
def build_mask(active, S):
    """Combine the query-row padding mask and the causal mask into one
    lane-dense (B, S, S) float32 mask (1 = keep, 0 = fill with -1e9)."""
    pad_ok = active != 0.0                               # (B, S, 1) query-row mask
    causal = jnp.tril(jnp.ones((S, S), dtype=bool))      # one_direction=True
    return jnp.logical_and(pad_ok, causal[None]).astype(jnp.float32)


def _cast_weights(wp, keys, dot_dtype):
    out = dict(wp)
    for k in keys:
        out[k] = wp[k].astype(dot_dtype)
    return out


def transformer_multi_input_block(params, x_t, x_o, x_s, active, *,
                                  dot_dtype=jnp.float32):
    """Forward of TransformerMultiInputBlock (n_inputs=2, cross-attn enabled,
    isolate_subnetwork='') as one fused pallas_call over the batch."""
    H, hs = params["H"], params["hs"]
    B, S, D = x_t.shape
    d_ff = params["ff"]["w1"].shape[-1]
    mask = build_mask(active, S)

    w_self = _cast_weights(params["self"], ("wq", "wk", "wv"), dot_dtype)
    w_cross = _cast_weights(params["cross"], ("wq", "wk", "wv"), dot_dtype)
    w_ff = _cast_weights(params["ff"], ("w1", "w2"), dot_dtype)

    x_spec = pl.BlockSpec((pl.Squeezed(), S, D), lambda b: (b, 0, 0))
    mask_spec = pl.BlockSpec((pl.Squeezed(), S, S), lambda b: (b, 0, 0))

    def full(shape):
        # Full-extent block, constant index across the grid -> DMA'd once,
        # VMEM-resident for every batch step.
        return pl.BlockSpec(shape, lambda b: (0,) * len(shape))

    wmat = full((2, D, D))
    wvec = full((2, 1, D))
    w1s, b1s, w2s = full((2, D, d_ff)), full((2, 1, d_ff)), full((2, d_ff, D))

    isz = jnp.dtype(dot_dtype).itemsize
    flops = B * (4 * (6 * S * D * D + 4 * S * S * D) + 2 * 4 * S * D * d_ff)
    transcendentals = B * (4 * (H * S * S + 2 * S) + 2 * 2 * S)
    bytes_accessed = (B * (3 * S * D * isz + S * S * 4 + 2 * S * D * 4)
                      + 2 * (3 * D * D + 2 * D * d_ff) * isz
                      + 2 * (7 * D + d_ff) * 4
                      + 2 * (3 * D * D + 2 * D * d_ff) * isz)

    out_t, out_o = pl.pallas_call(
        partial(block_kernel, num_heads=H, head_size=hs, dot_dtype=dot_dtype),
        out_shape=(jax.ShapeDtypeStruct((B, S, D), jnp.float32),
                   jax.ShapeDtypeStruct((B, S, D), jnp.float32)),
        grid=(B,),
        in_specs=[x_spec, x_spec, x_spec, mask_spec,
                  wmat, wvec, wmat, wvec, wmat, wvec, wvec, wvec,      # self-attn
                  wmat, wvec, wmat, wvec, wmat, wvec, wvec, wvec,      # cross-attn
                  w1s, b1s, w2s, wvec, wvec, wvec],                    # feed-forward
        out_specs=(x_spec, x_spec),
        compiler_params=pltpu.CompilerParams(
            dimension_semantics=("parallel",)),
        cost_estimate=pl.CostEstimate(flops=int(flops),
                                      transcendentals=int(transcendentals),
                                      bytes_accessed=int(bytes_accessed)),
    )(x_t.astype(dot_dtype), x_o.astype(dot_dtype), x_s.astype(dot_dtype), mask,
      w_self["wq"], w_self["bq"], w_self["wk"], w_self["bk"],
      w_self["wv"], w_self["bv"], w_self["ln_w"], w_self["ln_b"],
      w_cross["wq"], w_cross["bq"], w_cross["wk"], w_cross["bk"],
      w_cross["wv"], w_cross["bv"], w_cross["ln_w"], w_cross["ln_b"],
      w_ff["w1"], w_ff["b1"], w_ff["w2"], w_ff["b2"],
      w_ff["ln_w"], w_ff["ln_b"])
    return out_t, out_o


# ---------------------------------------------------------------------------
# Pure-JAX reference (for correctness check)
# ---------------------------------------------------------------------------
def ref_layernorm(res, ln_w, ln_b):
    d = res.shape[-1]
    mean = jnp.mean(res, axis=-1, keepdims=True)
    diff = res - mean
    var = jnp.sum(diff * diff, axis=-1, keepdims=True) / (d - 1)
    return ln_w * diff / (jnp.sqrt(var) + LN_EPS) + ln_b


def ref_mha(p, xq, xkv, active, H, hs):
    B, S, D = xq.shape
    q = xq @ p["wq"] + p["bq"]
    k = xkv @ p["wk"] + p["bk"]
    v = xkv @ p["wv"] + p["bv"]
    q = q.reshape(B, S, H, hs).transpose(0, 2, 1, 3)
    k = k.reshape(B, S, H, hs).transpose(0, 2, 1, 3)
    v = v.reshape(B, S, H, hs).transpose(0, 2, 1, 3)
    scores = jnp.einsum("bhqd,bhkd->bhqk", q, k) / math.sqrt(hs)
    pad_ok = (active != 0.0)[:, None, :, :]           # query-row dependent only
    scores = jnp.where(pad_ok, scores, NEG_INF)
    causal = jnp.tril(jnp.ones((S, S), bool))
    scores = jnp.where(causal, scores, NEG_INF)
    p_attn = jax.nn.softmax(scores, axis=-1)
    out = jnp.einsum("bhqk,bhkd->bhqd", p_attn, v)
    out = out.transpose(0, 2, 1, 3).reshape(B, S, D)
    return ref_layernorm(out + xq, p["ln_w"], p["ln_b"])


def ref_ff(p, x, skip):
    xin = x + skip
    h = jnp.maximum(xin @ p["w1"] + p["b1"], 0.0)
    y = h @ p["w2"] + p["b2"]
    return ref_layernorm(y + xin, p["ln_w"], p["ln_b"])


def ref_block(streams, x_t, x_o, x_s, active):
    H, hs = streams["H"], streams["hs"]
    x_t_ = ref_mha(streams["self_t"], x_t, x_t, active, H, hs)
    x_o_ = ref_mha(streams["self_o"], x_o, x_o, active, H, hs)
    x_to_ = ref_mha(streams["cross_to"], x_t_, x_o, active, H, hs)
    x_ot_ = ref_mha(streams["cross_ot"], x_o_, x_t, active, H, hs)
    return (ref_ff(streams["ff_t"], x_to_, x_s),
            ref_ff(streams["ff_o"], x_ot_, x_s))


# ---------------------------------------------------------------------------
# Deterministic parameter init (synthetic; shapes follow the module __init__)
# ---------------------------------------------------------------------------
def init_mha_params(key, D):
    ks = jax.random.split(key, 6)
    s = 0.1
    return {
        # stored as (in, out) == PyTorch nn.Linear weight transposed
        "wq": s * jax.random.normal(ks[0], (D, D), jnp.float32),
        "bq": s * jax.random.normal(ks[1], (1, D), jnp.float32),
        "wk": s * jax.random.normal(ks[2], (D, D), jnp.float32),
        "bk": s * jax.random.normal(ks[3], (1, D), jnp.float32),
        "wv": s * jax.random.normal(ks[4], (D, D), jnp.float32),
        "bv": s * jax.random.normal(ks[5], (1, D), jnp.float32),
        "ln_w": jnp.ones((1, D), jnp.float32),
        "ln_b": jnp.zeros((1, D), jnp.float32),
    }


def init_ff_params(key, D, d_ff):
    ks = jax.random.split(key, 4)
    s = 0.1
    return {
        # Conv1d(k=1) weights, stored pre-transposed as (in, out)
        "w1": s * jax.random.normal(ks[0], (D, d_ff), jnp.float32),
        "b1": s * jax.random.normal(ks[1], (1, d_ff), jnp.float32),
        "w2": s * jax.random.normal(ks[2], (d_ff, D), jnp.float32),
        "b2": s * jax.random.normal(ks[3], (1, D), jnp.float32),
        "ln_w": jnp.ones((1, D), jnp.float32),
        "ln_b": jnp.zeros((1, D), jnp.float32),
    }


def stack_params(plist):
    return {k: jnp.stack([p[k] for p in plist]) for k in plist[0]}


if __name__ == "__main__":
    B, S, D = 2, 8, 32           # batch, seq, hidden
    H, HS = 4, 8                 # attn_heads, head_size (H*HS == D, final_layer=False)
    D_FF = 64                    # feed_forward_hidden

    pkey = jax.random.PRNGKey(42)
    pk = jax.random.split(pkey, 6)
    streams = {
        "H": H, "hs": HS,
        "self_t": init_mha_params(pk[0], D),
        "self_o": init_mha_params(pk[1], D),
        "cross_to": init_mha_params(pk[2], D),
        "cross_ot": init_mha_params(pk[3], D),
        "ff_t": init_ff_params(pk[4], D, D_FF),
        "ff_o": init_ff_params(pk[5], D, D_FF),
    }
    params = {
        "H": H, "hs": HS,
        "self": stack_params([streams["self_t"], streams["self_o"]]),
        "cross": stack_params([streams["cross_to"], streams["cross_ot"]]),
        "ff": stack_params([streams["ff_t"], streams["ff_o"]]),
    }

    dkey = jax.random.PRNGKey(0)
    k1, k2, k3 = jax.random.split(dkey, 3)
    x_t = jax.random.normal(k1, (B, S, D), jnp.float32)
    x_o = jax.random.normal(k2, (B, S, D), jnp.float32)
    x_s = jax.random.normal(k3, (B, S, D), jnp.float32)
    # active_entries_treat_outcomes: (B, S, 1); batch 1 has two padded steps
    active = jnp.ones((B, S, 1), jnp.float32)
    active = active.at[1, -2:, 0].set(0.0)

    ref_t, ref_o = ref_block(streams, x_t, x_o, x_s, active)

    # f32 path: tight check against the pure-JAX reference.
    out_t, out_o = transformer_multi_input_block(params, x_t, x_o, x_s, active,
                                                 dot_dtype=jnp.float32)
    out_t = jax.block_until_ready(out_t)
    out_o = jax.block_until_ready(out_o)
    err_t = float(jnp.max(jnp.abs(out_t - ref_t)))
    err_o = float(jnp.max(jnp.abs(out_o - ref_o)))
    assert err_t < 2e-2 and err_o < 2e-2, (err_t, err_o)
    assert bool(jnp.all(jnp.isfinite(out_t))) and bool(jnp.all(jnp.isfinite(out_o)))

    # bf16 matmul-operand path (v6e/v7x MXU); looser tolerance for bf16 rounding.
    bt, bo = transformer_multi_input_block(params, x_t, x_o, x_s, active,
                                           dot_dtype=jnp.bfloat16)
    bt = jax.block_until_ready(bt)
    bo = jax.block_until_ready(bo)
    berr_t = float(jnp.max(jnp.abs(bt - ref_t)))
    berr_o = float(jnp.max(jnp.abs(bo - ref_o)))
    assert berr_t < 2e-1 and berr_o < 2e-1, (berr_t, berr_o)
    assert bool(jnp.all(jnp.isfinite(bt))) and bool(jnp.all(jnp.isfinite(bo)))

    print("KERNEL_OK")
</pallas_src>

<mosaic_0001>
module attributes {stable_mosaic.version = 11 : i64} {
  func.func @block_kernel(%arg0: i32, %arg1: memref<1x8x32xf32, #tpu.memory_space<vmem>>, %arg2: memref<1x8x32xf32, #tpu.memory_space<vmem>>, %arg3: memref<1x8x32xf32, #tpu.memory_space<vmem>>, %arg4: memref<1x8x8xf32, #tpu.memory_space<vmem>>, %arg5: memref<2x32x32xf32, #tpu.memory_space<vmem>>, %arg6: memref<2x1x32xf32, #tpu.memory_space<vmem>>, %arg7: memref<2x32x32xf32, #tpu.memory_space<vmem>>, %arg8: memref<2x1x32xf32, #tpu.memory_space<vmem>>, %arg9: memref<2x32x32xf32, #tpu.memory_space<vmem>>, %arg10: memref<2x1x32xf32, #tpu.memory_space<vmem>>, %arg11: memref<2x1x32xf32, #tpu.memory_space<vmem>>, %arg12: memref<2x1x32xf32, #tpu.memory_space<vmem>>, %arg13: memref<2x32x32xf32, #tpu.memory_space<vmem>>, %arg14: memref<2x1x32xf32, #tpu.memory_space<vmem>>, %arg15: memref<2x32x32xf32, #tpu.memory_space<vmem>>, %arg16: memref<2x1x32xf32, #tpu.memory_space<vmem>>, %arg17: memref<2x32x32xf32, #tpu.memory_space<vmem>>, %arg18: memref<2x1x32xf32, #tpu.memory_space<vmem>>, %arg19: memref<2x1x32xf32, #tpu.memory_space<vmem>>, %arg20: memref<2x1x32xf32, #tpu.memory_space<vmem>>, %arg21: memref<2x32x64xf32, #tpu.memory_space<vmem>>, %arg22: memref<2x1x64xf32, #tpu.memory_space<vmem>>, %arg23: memref<2x64x32xf32, #tpu.memory_space<vmem>>, %arg24: memref<2x1x32xf32, #tpu.memory_space<vmem>>, %arg25: memref<2x1x32xf32, #tpu.memory_space<vmem>>, %arg26: memref<2x1x32xf32, #tpu.memory_space<vmem>>, %arg27: memref<1x8x32xf32, #tpu.memory_space<vmem>>, %arg28: memref<1x8x32xf32, #tpu.memory_space<vmem>>) attributes {dimension_semantics = [#tpu.dimension_semantics<parallel>], iteration_bounds = array<i64: 2>, scalar_prefetch = 0 : i64, scratch_operands = 0 : i64, tpu.core_type = #tpu.core_type<tc>, window_params = [{transform_indices = @transform_0, window_bounds = array<i64: 1, 8, 32>}, {transform_indices = @transform_1, window_bounds = array<i64: 1, 8, 32>}, {transform_indices = @transform_2, window_bounds = array<i64: 1, 8, 32>}, {transform_indices = @transform_3, window_bounds = array<i64: 1, 8, 8>}, {pipeline_mode = #tpu.pipeline_mode<synchronous>, transform_indices = @transform_4, window_bounds = array<i64: 2, 32, 32>}, {pipeline_mode = #tpu.pipeline_mode<synchronous>, transform_indices = @transform_5, window_bounds = array<i64: 2, 1, 32>}, {pipeline_mode = #tpu.pipeline_mode<synchronous>, transform_indices = @transform_6, window_bounds = array<i64: 2, 32, 32>}, {pipeline_mode = #tpu.pipeline_mode<synchronous>, transform_indices = @transform_7, window_bounds = array<i64: 2, 1, 32>}, {pipeline_mode = #tpu.pipeline_mode<synchronous>, transform_indices = @transform_8, window_bounds = array<i64: 2, 32, 32>}, {pipeline_mode = #tpu.pipeline_mode<synchronous>, transform_indices = @transform_9, window_bounds = array<i64: 2, 1, 32>}, {pipeline_mode = #tpu.pipeline_mode<synchronous>, transform_indices = @transform_10, window_bounds = array<i64: 2, 1, 32>}, {pipeline_mode = #tpu.pipeline_mode<synchronous>, transform_indices = @transform_11, window_bounds = array<i64: 2, 1, 32>}, {pipeline_mode = #tpu.pipeline_mode<synchronous>, transform_indices = @transform_12, window_bounds = array<i64: 2, 32, 32>}, {pipeline_mode = #tpu.pipeline_mode<synchronous>, transform_indices = @transform_13, window_bounds = array<i64: 2, 1, 32>}, {pipeline_mode = #tpu.pipeline_mode<synchronous>, transform_indices = @transform_14, window_bounds = array<i64: 2, 32, 32>}, {pipeline_mode = #tpu.pipeline_mode<synchronous>, transform_indices = @transform_15, window_bounds = array<i64: 2, 1, 32>}, {pipeline_mode = #tpu.pipeline_mode<synchronous>, transform_indices = @transform_16, window_bounds = array<i64: 2, 32, 32>}, {pipeline_mode = #tpu.pipeline_mode<synchronous>, transform_indices = @transform_17, window_bounds = array<i64: 2, 1, 32>}, {pipeline_mode = #tpu.pipeline_mode<synchronous>, transform_indices = @transform_18, window_bounds = array<i64: 2, 1, 32>}, {pipeline_mode = #tpu.pipeline_mode<synchronous>, transform_indices = @transform_19, window_bounds = array<i64: 2, 1, 32>}, {pipeline_mode = #tpu.pipeline_mode<synchronous>, transform_indices = @transform_20, window_bounds = array<i64: 2, 32, 64>}, {pipeline_mode = #tpu.pipeline_mode<synchronous>, transform_indices = @transform_21, window_bounds = array<i64: 2, 1, 64>}, {pipeline_mode = #tpu.pipeline_mode<synchronous>, transform_indices = @transform_22, window_bounds = array<i64: 2, 64, 32>}, {pipeline_mode = #tpu.pipeline_mode<synchronous>, transform_indices = @transform_23, window_bounds = array<i64: 2, 1, 32>}, {pipeline_mode = #tpu.pipeline_mode<synchronous>, transform_indices = @transform_24, window_bounds = array<i64: 2, 1, 32>}, {pipeline_mode = #tpu.pipeline_mode<synchronous>, transform_indices = @transform_25, window_bounds = array<i64: 2, 1, 32>}, {transform_indices = @transform_26, window_bounds = array<i64: 1, 8, 32>}, {transform_indices = @transform_27, window_bounds = array<i64: 1, 8, 32>}]} {
    %c0 = arith.constant 0 : index
    %c0_0 = arith.constant 0 : index
    %c0_1 = arith.constant 0 : index
    %0 = vector.load %arg1[%c0, %c0_0, %c0_1] : memref<1x8x32xf32, #tpu.memory_space<vmem>>, vector<1x8x32xf32>
    %1 = vector.shape_cast %0 : vector<1x8x32xf32> to vector<8x32xf32>
    %c0_2 = arith.constant 0 : index
    %c0_3 = arith.constant 0 : index
    %c0_4 = arith.constant 0 : index
    %2 = vector.load %arg2[%c0_2, %c0_3, %c0_4] : memref<1x8x32xf32, #tpu.memory_space<vmem>>, vector<1x8x32xf32>
    %3 = vector.shape_cast %2 : vector<1x8x32xf32> to vector<8x32xf32>
    %c0_5 = arith.constant 0 : index
    %c0_6 = arith.constant 0 : index
    %c0_7 = arith.constant 0 : index
    %4 = vector.load %arg4[%c0_5, %c0_6, %c0_7] : memref<1x8x8xf32, #tpu.memory_space<vmem>>, vector<1x8x8xf32>
    %5 = vector.shape_cast %4 : vector<1x8x8xf32> to vector<8x8xf32>
    %cst = arith.constant 0.000000e+00 : f32
    %6 = vector.broadcast %cst : f32 to vector<8x8xf32>
    %7 = arith.cmpf one, %5, %6 : vector<8x8xf32>
    %c0_8 = arith.constant 0 : index
    %c0_9 = arith.constant 0 : index
    %c0_10 = arith.constant 0 : index
    %8 = vector.load %arg5[%c0_8, %c0_9, %c0_10] : memref<2x32x32xf32, #tpu.memory_space<vmem>>, vector<1x32x32xf32>
    %9 = vector.shape_cast %8 : vector<1x32x32xf32> to vector<32x32xf32>
    %c0_11 = arith.constant 0 : index
    %c0_12 = arith.constant 0 : index
    %c0_13 = arith.constant 0 : index
    %10 = vector.load %arg6[%c0_11, %c0_12, %c0_13] : memref<2x1x32xf32, #tpu.memory_space<vmem>>, vector<1x1x32xf32>
    %11 = vector.shape_cast %10 : vector<1x1x32xf32> to vector<1x32xf32>
    %c0_14 = arith.constant 0 : index
    %c0_15 = arith.constant 0 : index
    %c0_16 = arith.constant 0 : index
    %12 = vector.load %arg7[%c0_14, %c0_15, %c0_16] : memref<2x32x32xf32, #tpu.memory_space<vmem>>, vector<1x32x32xf32>
    %13 = vector.shape_cast %12 : vector<1x32x32xf32> to vector<32x32xf32>
    %c0_17 = arith.constant 0 : index
    %c0_18 = arith.constant 0 : index
    %c0_19 = arith.constant 0 : index
    %14 = vector.load %arg8[%c0_17, %c0_18, %c0_19] : memref<2x1x32xf32, #tpu.memory_space<vmem>>, vector<1x1x32xf32>
    %15 = vector.shape_cast %14 : vector<1x1x32xf32> to vector<1x32xf32>
    %c0_20 = arith.constant 0 : index
    %c0_21 = arith.constant 0 : index
    %c0_22 = arith.constant 0 : index
    %16 = vector.load %arg9[%c0_20, %c0_21, %c0_22] : memref<2x32x32xf32, #tpu.memory_space<vmem>>, vector<1x32x32xf32>
    %17 = vector.shape_cast %16 : vector<1x32x32xf32> to vector<32x32xf32>
    %c0_23 = arith.constant 0 : index
    %c0_24 = arith.constant 0 : index
    %c0_25 = arith.constant 0 : index
    %18 = vector.load %arg10[%c0_23, %c0_24, %c0_25] : memref<2x1x32xf32, #tpu.memory_space<vmem>>, vector<1x1x32xf32>
    %19 = vector.shape_cast %18 : vector<1x1x32xf32> to vector<1x32xf32>
    %c0_26 = arith.constant 0 : index
    %c0_27 = arith.constant 0 : index
    %c0_28 = arith.constant 0 : index
    %20 = vector.load %arg11[%c0_26, %c0_27, %c0_28] : memref<2x1x32xf32, #tpu.memory_space<vmem>>, vector<1x1x32xf32>
    %21 = vector.shape_cast %20 : vector<1x1x32xf32> to vector<1x32xf32>
    %c0_29 = arith.constant 0 : index
    %c0_30 = arith.constant 0 : index
    %c0_31 = arith.constant 0 : index
    %22 = vector.load %arg12[%c0_29, %c0_30, %c0_31] : memref<2x1x32xf32, #tpu.memory_space<vmem>>, vector<1x1x32xf32>
    %23 = vector.shape_cast %22 : vector<1x1x32xf32> to vector<1x32xf32>
    %cst_32 = arith.constant dense<0.000000e+00> : vector<8x32xf32>
    %24 = tpu.matmul %1, %9, %cst_32 {dimension_numbers = #tpu.dot_dimension_numbers<[1], [0], [0], [1], [0, 0, 1, 1], [], []>} : vector<8x32xf32>, vector<32x32xf32>, vector<8x32xf32> -> vector<8x32xf32>
    %25 = vector.broadcast %11 : vector<1x32xf32> to vector<8x32xf32>
    %26 = arith.addf %24, %25 : vector<8x32xf32>
    %cst_33 = arith.constant 0.353553385 : f32
    %27 = vector.broadcast %cst_33 : f32 to vector<8x32xf32>
    %28 = arith.mulf %26, %27 : vector<8x32xf32>
    %cst_34 = arith.constant dense<0.000000e+00> : vector<8x32xf32>
    %29 = tpu.matmul %1, %13, %cst_34 {dimension_numbers = #tpu.dot_dimension_numbers<[1], [0], [0], [1], [0, 0, 1, 1], [], []>} : vector<8x32xf32>, vector<32x32xf32>, vector<8x32xf32> -> vector<8x32xf32>
    %30 = vector.broadcast %15 : vector<1x32xf32> to vector<8x32xf32>
    %31 = arith.addf %29, %30 : vector<8x32xf32>
    %cst_35 = arith.constant dense<0.000000e+00> : vector<8x32xf32>
    %32 = tpu.matmul %1, %17, %cst_35 {dimension_numbers = #tpu.dot_dimension_numbers<[1], [0], [0], [1], [0, 0, 1, 1], [], []>} : vector<8x32xf32>, vector<32x32xf32>, vector<8x32xf32> -> vector<8x32xf32>
    %33 = vector.broadcast %19 : vector<1x32xf32> to vector<8x32xf32>
    %34 = arith.addf %32, %33 : vector<8x32xf32>
    %35 = vector.shape_cast %28 : vector<8x32xf32> to vector<8x4x8xf32>
    %36 = tpu.transpose %35, [1, 0, 2] : vector<8x4x8xf32> -> vector<4x8x8xf32>
    %37 = vector.shape_cast %31 : vector<8x32xf32> to vector<8x4x8xf32>
    %38 = tpu.transpose %37, [1, 0, 2] : vector<8x4x8xf32> -> vector<4x8x8xf32>
    %39 = vector.shape_cast %34 : vector<8x32xf32> to vector<8x4x8xf32>
    %40 = tpu.transpose %39, [1, 0, 2] : vector<8x4x8xf32> -> vector<4x8x8xf32>
    "tpu.trace_start"() <{level = 10 : i32, message = "hqd,hkd->hqk"}> : () -> ()
    %cst_36 = arith.constant dense<0.000000e+00> : vector<4x8x8xf32>
    %41 = tpu.matmul %36, %38, %cst_36 {dimension_numbers = #tpu.dot_dimension_numbers<[2], [2], [1], [1], [0, 0, 0, 1, 1, 1], [0], [0]>} : vector<4x8x8xf32>, vector<4x8x8xf32>, vector<4x8x8xf32> -> vector<4x8x8xf32>
    "tpu.trace_stop"() : () -> ()
    %42 = vector.shape_cast %7 : vector<8x8xi1> to vector<1x8x8xi1>
    %cst_37 = arith.constant -1.000000e+09 : f32
    %43 = vector.shape_cast %42 : vector<1x8x8xi1> to vector<1x8x8xi1>
    %44 = vector.broadcast %43 : vector<1x8x8xi1> to vector<4x8x8xi1>
    %45 = vector.broadcast %cst_37 : f32 to vector<4x8x8xf32>
    %46 = arith.select %44, %41, %45 : vector<4x8x8xi1>, vector<4x8x8xf32>
    %cst_38 = arith.constant dense<0xFF800000> : vector<4x8xf32>
    %47 = vector.multi_reduction <maximumf>, %46, %cst_38 [2] : vector<4x8x8xf32> to vector<4x8xf32>
    %48 = vector.shape_cast %47 : vector<4x8xf32> to vector<4x8x1xf32>
    %49 = vector.broadcast %48 : vector<4x8x1xf32> to vector<4x8x8xf32>
    %50 = arith.subf %46, %49 : vector<4x8x8xf32>
    %51 = math.exp %50 : vector<4x8x8xf32>
    %cst_39 = arith.constant dense<0.000000e+00> : vector<4x8xf32>
    %52 = vector.multi_reduction <add>, %51, %cst_39 [2] : vector<4x8x8xf32> to vector<4x8xf32>
    %53 = vector.shape_cast %52 : vector<4x8xf32> to vector<4x8x1xf32>
    %54 = tpu.reciprocal %53 {approx = true} : vector<4x8x1xf32> -> vector<4x8x1xf32>
    %55 = vector.broadcast %54 : vector<4x8x1xf32> to vector<4x8x8xf32>
    %56 = arith.mulf %51, %55 : vector<4x8x8xf32>
    "tpu.trace_start"() <{level = 10 : i32, message = "hqk,hkd->hqd"}> : () -> ()
    %cst_40 = arith.constant dense<0.000000e+00> : vector<4x8x8xf32>
    %57 = tpu.matmul %56, %40, %cst_40 {dimension_numbers = #tpu.dot_dimension_numbers<[2], [1], [1], [2], [0, 0, 0, 1, 1, 2], [0], [0]>} : vector<4x8x8xf32>, vector<4x8x8xf32>, vector<4x8x8xf32> -> vector<4x8x8xf32>
    "tpu.trace_stop"() : () -> ()
    %58 = tpu.transpose %57, [1, 0, 2] : vector<4x8x8xf32> -> vector<8x4x8xf32>
    %59 = vector.shape_cast %58 : vector<8x4x8xf32> to vector<8x32xf32>
    %60 = arith.addf %59, %1 : vector<8x32xf32>
    %cst_41 = arith.constant dense<0.000000e+00> : vector<8xf32>
    %61 = vector.multi_reduction <add>, %60, %cst_41 [1] : vector<8x32xf32> to vector<8xf32>
    %62 = vector.shape_cast %61 : vector<8xf32> to vector<8x1xf32>
    %cst_42 = arith.constant 3.200000e+01 : f32
    %63 = vector.broadcast %cst_42 : f32 to vector<8x1xf32>
    %64 = arith.divf %62, %63 : vector<8x1xf32>
    %65 = vector.broadcast %64 : vector<8x1xf32> to vector<8x32xf32>
    %66 = arith.subf %60, %65 : vector<8x32xf32>
    %67 = arith.mulf %66, %66 : vector<8x32xf32>
    %cst_43 = arith.constant dense<0.000000e+00> : vector<8xf32>
    %68 = vector.multi_reduction <add>, %67, %cst_43 [1] : vector<8x32xf32> to vector<8xf32>
    %69 = vector.shape_cast %68 : vector<8xf32> to vector<8x1xf32>
    %cst_44 = arith.constant 0.0322580636 : f32
    %70 = vector.broadcast %cst_44 : f32 to vector<8x1xf32>
    %71 = arith.mulf %69, %70 : vector<8x1xf32>
    %72 = math.sqrt %71 : vector<8x1xf32>
    %cst_45 = arith.constant 9.99999997E-7 : f32
    %73 = vector.broadcast %cst_45 : f32 to vector<8x1xf32>
    %74 = arith.addf %72, %73 : vector<8x1xf32>
    %75 = tpu.reciprocal %74 {approx = true} : vector<8x1xf32> -> vector<8x1xf32>
    %76 = vector.broadcast %75 : vector<8x1xf32> to vector<8x32xf32>
    %77 = arith.mulf %66, %76 : vector<8x32xf32>
    %78 = vector.broadcast %21 : vector<1x32xf32> to vector<8x32xf32>
    %79 = arith.mulf %78, %77 : vector<8x32xf32>
    %80 = vector.broadcast %23 : vector<1x32xf32> to vector<8x32xf32>
    %81 = arith.addf %79, %80 : vector<8x32xf32>
    %c1 = arith.constant 1 : index
    %c0_46 = arith.constant 0 : index
    %c0_47 = arith.constant 0 : index
    %82 = vector.load %arg5[%c1, %c0_46, %c0_47] : memref<2x32x32xf32, #tpu.memory_space<vmem>>, vector<1x32x32xf32>
    %83 = vector.shape_cast %82 : vector<1x32x32xf32> to vector<32x32xf32>
    %c1_48 = arith.constant 1 : index
    %c0_49 = arith.constant 0 : index
    %c0_50 = arith.constant 0 : index
    %84 = vector.load %arg6[%c1_48, %c0_49, %c0_50] : memref<2x1x32xf32, #tpu.memory_space<vmem>>, vector<1x1x32xf32>
    %85 = vector.shape_cast %84 : vector<1x1x32xf32> to vector<1x32xf32>
    %c1_51 = arith.constant 1 : index
    %c0_52 = arith.constant 0 : index
    %c0_53 = arith.constant 0 : index
    %86 = vector.load %arg7[%c1_51, %c0_52, %c0_53] : memref<2x32x32xf32, #tpu.memory_space<vmem>>, vector<1x32x32xf32>
    %87 = vector.shape_cast %86 : vector<1x32x32xf32> to vector<32x32xf32>
    %c1_54 = arith.constant 1 : index
    %c0_55 = arith.constant 0 : index
    %c0_56 = arith.constant 0 : index
    %88 = vector.load %arg8[%c1_54, %c0_55, %c0_56] : memref<2x1x32xf32, #tpu.memory_space<vmem>>, vector<1x1x32xf32>
    %89 = vector.shape_cast %88 : vector<1x1x32xf32> to vector<1x32xf32>
    %c1_57 = arith.constant 1 : index
    %c0_58 = arith.constant 0 : index
    %c0_59 = arith.constant 0 : index
    %90 = vector.load %arg9[%c1_57, %c0_58, %c0_59] : memref<2x32x32xf32, #tpu.memory_space<vmem>>, vector<1x32x32xf32>
    %91 = vector.shape_cast %90 : vector<1x32x32xf32> to vector<32x32xf32>
    %c1_60 = arith.constant 1 : index
    %c0_61 = arith.constant 0 : index
    %c0_62 = arith.constant 0 : index
    %92 = vector.load %arg10[%c1_60, %c0_61, %c0_62] : memref<2x1x32xf32, #tpu.memory_space<vmem>>, vector<1x1x32xf32>
    %93 = vector.shape_cast %92 : vector<1x1x32xf32> to vector<1x32xf32>
    %c1_63 = arith.constant 1 : index
    %c0_64 = arith.constant 0 : index
    %c0_65 = arith.constant 0 : index
    %94 = vector.load %arg11[%c1_63, %c0_64, %c0_65] : memref<2x1x32xf32, #tpu.memory_space<vmem>>, vector<1x1x32xf32>
    %95 = vector.shape_cast %94 : vector<1x1x32xf32> to vector<1x32xf32>
    %c1_66 = arith.constant 1 : index
    %c0_67 = arith.constant 0 : index
    %c0_68 = arith.constant 0 : index
    %96 = vector.load %arg12[%c1_66, %c0_67, %c0_68] : memref<2x1x32xf32, #tpu.memory_space<vmem>>, vector<1x1x32xf32>
    %97 = vector.shape_cast %96 : vector<1x1x32xf32> to vector<1x32xf32>
    %cst_69 = arith.constant dense<0.000000e+00> : vector<8x32xf32>
    %98 = tpu.matmul %3, %83, %cst_69 {dimension_numbers = #tpu.dot_dimension_numbers<[1], [0], [0], [1], [0, 0, 1, 1], [], []>} : vector<8x32xf32>, vector<32x32xf32>, vector<8x32xf32> -> vector<8x32xf32>
    %99 = vector.broadcast %85 : vector<1x32xf32> to vector<8x32xf32>
    %100 = arith.addf %98, %99 : vector<8x32xf32>
    %cst_70 = arith.constant 0.353553385 : f32
    %101 = vector.broadcast %cst_70 : f32 to vector<8x32xf32>
    %102 = arith.mulf %100, %101 : vector<8x32xf32>
    %cst_71 = arith.constant dense<0.000000e+00> : vector<8x32xf32>
    %103 = tpu.matmul %3, %87, %cst_71 {dimension_numbers = #tpu.dot_dimension_numbers<[1], [0], [0], [1], [0, 0, 1, 1], [], []>} : vector<8x32xf32>, vector<32x32xf32>, vector<8x32xf32> -> vector<8x32xf32>
    %104 = vector.broadcast %89 : vector<1x32xf32> to vector<8x32xf32>
    %105 = arith.addf %103, %104 : vector<8x32xf32>
    %cst_72 = arith.constant dense<0.000000e+00> : vector<8x32xf32>
    %106 = tpu.matmul %3, %91, %cst_72 {dimension_numbers = #tpu.dot_dimension_numbers<[1], [0], [0], [1], [0, 0, 1, 1], [], []>} : vector<8x32xf32>, vector<32x32xf32>, vector<8x32xf32> -> vector<8x32xf32>
    %107 = vector.broadcast %93 : vector<1x32xf32> to vector<8x32xf32>
    %108 = arith.addf %106, %107 : vector<8x32xf32>
    %109 = vector.shape_cast %102 : vector<8x32xf32> to vector<8x4x8xf32>
    %110 = tpu.transpose %109, [1, 0, 2] : vector<8x4x8xf32> -> vector<4x8x8xf32>
    %111 = vector.shape_cast %105 : vector<8x32xf32> to vector<8x4x8xf32>
    %112 = tpu.transpose %111, [1, 0, 2] : vector<8x4x8xf32> -> vector<4x8x8xf32>
    %113 = vector.shape_cast %108 : vector<8x32xf32> to vector<8x4x8xf32>
    %114 = tpu.transpose %113, [1, 0, 2] : vector<8x4x8xf32> -> vector<4x8x8xf32>
    "tpu.trace_start"() <{level = 10 : i32, message = "hqd,hkd->hqk"}> : () -> ()
    %cst_73 = arith.constant dense<0.000000e+00> : vector<4x8x8xf32>
    %115 = tpu.matmul %110, %112, %cst_73 {dimension_numbers = #tpu.dot_dimension_numbers<[2], [2], [1], [1], [0, 0, 0, 1, 1, 1], [0], [0]>} : vector<4x8x8xf32>, vector<4x8x8xf32>, vector<4x8x8xf32> -> vector<4x8x8xf32>
    "tpu.trace_stop"() : () -> ()
    %116 = vector.shape_cast %7 : vector<8x8xi1> to vector<1x8x8xi1>
    %cst_74 = arith.constant -1.000000e+09 : f32
    %117 = vector.shape_cast %116 : vector<1x8x8xi1> to vector<1x8x8xi1>
    %118 = vector.broadcast %117 : vector<1x8x8xi1> to vector<4x8x8xi1>
    %119 = vector.broadcast %cst_74 : f32 to vector<4x8x8xf32>
    %120 = arith.select %118, %115, %119 : vector<4x8x8xi1>, vector<4x8x8xf32>
    %cst_75 = arith.constant dense<0xFF800000> : vector<4x8xf32>
    %121 = vector.multi_reduction <maximumf>, %120, %cst_75 [2] : vector<4x8x8xf32> to vector<4x8xf32>
    %122 = vector.shape_cast %121 : vector<4x8xf32> to vector<4x8x1xf32>
    %123 = vector.broadcast %122 : vector<4x8x1xf32> to vector<4x8x8xf32>
    %124 = arith.subf %120, %123 : vector<4x8x8xf32>
    %125 = math.exp %124 : vector<4x8x8xf32>
    %cst_76 = arith.constant dense<0.000000e+00> : vector<4x8xf32>
    %126 = vector.multi_reduction <add>, %125, %cst_76 [2] : vector<4x8x8xf32> to vector<4x8xf32>
    %127 = vector.shape_cast %126 : vector<4x8xf32> to vector<4x8x1xf32>
    %128 = tpu.reciprocal %127 {approx = true} : vector<4x8x1xf32> -> vector<4x8x1xf32>
    %129 = vector.broadcast %128 : vector<4x8x1xf32> to vector<4x8x8xf32>
    %130 = arith.mulf %125, %129 : vector<4x8x8xf32>
    "tpu.trace_start"() <{level = 10 : i32, message = "hqk,hkd->hqd"}> : () -> ()
    %cst_77 = arith.constant dense<0.000000e+00> : vector<4x8x8xf32>
    %131 = tpu.matmul %130, %114, %cst_77 {dimension_numbers = #tpu.dot_dimension_numbers<[2], [1], [1], [2], [0, 0, 0, 1, 1, 2], [0], [0]>} : vector<4x8x8xf32>, vector<4x8x8xf32>, vector<4x8x8xf32> -> vector<4x8x8xf32>
    "tpu.trace_stop"() : () -> ()
    %132 = tpu.transpose %131, [1, 0, 2] : vector<4x8x8xf32> -> vector<8x4x8xf32>
    %133 = vector.shape_cast %132 : vector<8x4x8xf32> to vector<8x32xf32>
    %134 = arith.addf %133, %3 : vector<8x32xf32>
    %cst_78 = arith.constant dense<0.000000e+00> : vector<8xf32>
    %135 = vector.multi_reduction <add>, %134, %cst_78 [1] : vector<8x32xf32> to vector<8xf32>
    %136 = vector.shape_cast %135 : vector<8xf32> to vector<8x1xf32>
    %cst_79 = arith.constant 3.200000e+01 : f32
    %137 = vector.broadcast %cst_79 : f32 to vector<8x1xf32>
    %138 = arith.divf %136, %137 : vector<8x1xf32>
    %139 = vector.broadcast %138 : vector<8x1xf32> to vector<8x32xf32>
    %140 = arith.subf %134, %139 : vector<8x32xf32>
    %141 = arith.mulf %140, %140 : vector<8x32xf32>
    %cst_80 = arith.constant dense<0.000000e+00> : vector<8xf32>
    %142 = vector.multi_reduction <add>, %141, %cst_80 [1] : vector<8x32xf32> to vector<8xf32>
    %143 = vector.shape_cast %142 : vector<8xf32> to vector<8x1xf32>
    %cst_81 = arith.constant 0.0322580636 : f32
    %144 = vector.broadcast %cst_81 : f32 to vector<8x1xf32>
    %145 = arith.mulf %143, %144 : vector<8x1xf32>
    %146 = math.sqrt %145 : vector<8x1xf32>
    %cst_82 = arith.constant 9.99999997E-7 : f32
    %147 = vector.broadcast %cst_82 : f32 to vector<8x1xf32>
    %148 = arith.addf %146, %147 : vector<8x1xf32>
    %149 = tpu.reciprocal %148 {approx = true} : vector<8x1xf32> -> vector<8x1xf32>
    %150 = vector.broadcast %149 : vector<8x1xf32> to vector<8x32xf32>
    %151 = arith.mulf %140, %150 : vector<8x32xf32>
    %152 = vector.broadcast %95 : vector<1x32xf32> to vector<8x32xf32>
    %153 = arith.mulf %152, %151 : vector<8x32xf32>
    %154 = vector.broadcast %97 : vector<1x32xf32> to vector<8x32xf32>
    %155 = arith.addf %153, %154 : vector<8x32xf32>
    %c0_83 = arith.constant 0 : index
    %c0_84 = arith.constant 0 : index
    %c0_85 = arith.constant 0 : index
    %156 = vector.load %arg13[%c0_83, %c0_84, %c0_85] : memref<2x32x32xf32, #tpu.memory_space<vmem>>, vector<1x32x32xf32>
    %157 = vector.shape_cast %156 : vector<1x32x32xf32> to vector<32x32xf32>
    %c0_86 = arith.constant 0 : index
    %c0_87 = arith.constant 0 : index
    %c0_88 = arith.constant 0 : index
    %158 = vector.load %arg14[%c0_86, %c0_87, %c0_88] : memref<2x1x32xf32, #tpu.memory_space<vmem>>, vector<1x1x32xf32>
    %159 = vector.shape_cast %158 : vector<1x1x32xf32> to vector<1x32xf32>
    %c0_89 = arith.constant 0 : index
    %c0_90 = arith.constant 0 : index
    %c0_91 = arith.constant 0 : index
    %160 = vector.load %arg15[%c0_89, %c0_90, %c0_91] : memref<2x32x32xf32, #tpu.memory_space<vmem>>, vector<1x32x32xf32>
    %161 = vector.shape_cast %160 : vector<1x32x32xf32> to vector<32x32xf32>
    %c0_92 = arith.constant 0 : index
    %c0_93 = arith.constant 0 : index
    %c0_94 = arith.constant 0 : index
    %162 = vector.load %arg16[%c0_92, %c0_93, %c0_94] : memref<2x1x32xf32, #tpu.memory_space<vmem>>, vector<1x1x32xf32>
    %163 = vector.shape_cast %162 : vector<1x1x32xf32> to vector<1x32xf32>
    %c0_95 = arith.constant 0 : index
    %c0_96 = arith.constant 0 : index
    %c0_97 = arith.constant 0 : index
    %164 = vector.load %arg17[%c0_95, %c0_96, %c0_97] : memref<2x32x32xf32, #tpu.memory_space<vmem>>, vector<1x32x32xf32>
    %165 = vector.shape_cast %164 : vector<1x32x32xf32> to vector<32x32xf32>
    %c0_98 = arith.constant 0 : index
    %c0_99 = arith.constant 0 : index
    %c0_100 = arith.constant 0 : index
    %166 = vector.load %arg18[%c0_98, %c0_99, %c0_100] : memref<2x1x32xf32, #tpu.memory_space<vmem>>, vector<1x1x32xf32>
    %167 = vector.shape_cast %166 : vector<1x1x32xf32> to vector<1x32xf32>
    %c0_101 = arith.constant 0 : index
    %c0_102 = arith.constant 0 : index
    %c0_103 = arith.constant 0 : index
    %168 = vector.load %arg19[%c0_101, %c0_102, %c0_103] : memref<2x1x32xf32, #tpu.memory_space<vmem>>, vector<1x1x32xf32>
    %169 = vector.shape_cast %168 : vector<1x1x32xf32> to vector<1x32xf32>
    %c0_104 = arith.constant 0 : index
    %c0_105 = arith.constant 0 : index
    %c0_106 = arith.constant 0 : index
    %170 = vector.load %arg20[%c0_104, %c0_105, %c0_106] : memref<2x1x32xf32, #tpu.memory_space<vmem>>, vector<1x1x32xf32>
    %171 = vector.shape_cast %170 : vector<1x1x32xf32> to vector<1x32xf32>
    %cst_107 = arith.constant dense<0.000000e+00> : vector<8x32xf32>
    %172 = tpu.matmul %81, %157, %cst_107 {dimension_numbers = #tpu.dot_dimension_numbers<[1], [0], [0], [1], [0, 0, 1, 1], [], []>} : vector<8x32xf32>, vector<32x32xf32>, vector<8x32xf32> -> vector<8x32xf32>
    %173 = vector.broadcast %159 : vector<1x32xf32> to vector<8x32xf32>
    %174 = arith.addf %172, %173 : vector<8x32xf32>
    %cst_108 = arith.constant 0.353553385 : f32
    %175 = vector.broadcast %cst_108 : f32 to vector<8x32xf32>
    %176 = arith.mulf %174, %175 : vector<8x32xf32>
    %cst_109 = arith.constant dense<0.000000e+00> : vector<8x32xf32>
    %177 = tpu.matmul %3, %161, %cst_109 {dimension_numbers = #tpu.dot_dimension_numbers<[1], [0], [0], [1], [0, 0, 1, 1], [], []>} : vector<8x32xf32>, vector<32x32xf32>, vector<8x32xf32> -> vector<8x32xf32>
    %178 = vector.broadcast %163 : vector<1x32xf32> to vector<8x32xf32>
    %179 = arith.addf %177, %178 : vector<8x32xf32>
    %cst_110 = arith.constant dense<0.000000e+00> : vector<8x32xf32>
    %180 = tpu.matmul %3, %165, %cst_110 {dimension_numbers = #tpu.dot_dimension_numbers<[1], [0], [0], [1], [0, 0, 1, 1], [], []>} : vector<8x32xf32>, vector<32x32xf32>, vector<8x32xf32> -> vector<8x32xf32>
    %181 = vector.broadcast %167 : vector<1x32xf32> to vector<8x32xf32>
    %182 = arith.addf %180, %181 : vector<8x32xf32>
    %183 = vector.shape_cast %176 : vector<8x32xf32> to vector<8x4x8xf32>
    %184 = tpu.transpose %183, [1, 0, 2] : vector<8x4x8xf32> -> vector<4x8x8xf32>
    %185 = vector.shape_cast %179 : vector<8x32xf32> to vector<8x4x8xf32>
    %186 = tpu.transpose %185, [1, 0, 2] : vector<8x4x8xf32> -> vector<4x8x8xf32>
    %187 = vector.shape_cast %182 : vector<8x32xf32> to vector<8x4x8xf32>
    %188 = tpu.transpose %187, [1, 0, 2] : vector<8x4x8xf32> -> vector<4x8x8xf32>
    "tpu.trace_start"() <{level = 10 : i32, message = "hqd,hkd->hqk"}> : () -> ()
    %cst_111 = arith.constant dense<0.000000e+00> : vector<4x8x8xf32>
    %189 = tpu.matmul %184, %186, %cst_111 {dimension_numbers = #tpu.dot_dimension_numbers<[2], [2], [1], [1], [0, 0, 0, 1, 1, 1], [0], [0]>} : vector<4x8x8xf32>, vector<4x8x8xf32>, vector<4x8x8xf32> -> vector<4x8x8xf32>
    "tpu.trace_stop"() : () -> ()
    %190 = vector.shape_cast %7 : vector<8x8xi1> to vector<1x8x8xi1>
    %cst_112 = arith.constant -1.000000e+09 : f32
    %191 = vector.shape_cast %190 : vector<1x8x8xi1> to vector<1x8x8xi1>
    %192 = vector.broadcast %191 : vector<1x8x8xi1> to vector<4x8x8xi1>
    %193 = vector.broadcast %cst_112 : f32 to vector<4x8x8xf32>
    %194 = arith.select %192, %189, %193 : vector<4x8x8xi1>, vector<4x8x8xf32>
    %cst_113 = arith.constant dense<0xFF800000> : vector<4x8xf32>
    %195 = vector.multi_reduction <maximumf>, %194, %cst_113 [2] : vector<4x8x8xf32> to vector<4x8xf32>
    %196 = vector.shape_cast %195 : vector<4x8xf32> to vector<4x8x1xf32>
    %197 = vector.broadcast %196 : vector<4x8x1xf32> to vector<4x8x8xf32>
    %198 = arith.subf %194, %197 : vector<4x8x8xf32>
    %199 = math.exp %198 : vector<4x8x8xf32>
    %cst_114 = arith.constant dense<0.000000e+00> : vector<4x8xf32>
    %200 = vector.multi_reduction <add>, %199, %cst_114 [2] : vector<4x8x8xf32> to vector<4x8xf32>
    %201 = vector.shape_cast %200 : vector<4x8xf32> to vector<4x8x1xf32>
    %202 = tpu.reciprocal %201 {approx = true} : vector<4x8x1xf32> -> vector<4x8x1xf32>
    %203 = vector.broadcast %202 : vector<4x8x1xf32> to vector<4x8x8xf32>
    %204 = arith.mulf %199, %203 : vector<4x8x8xf32>
    "tpu.trace_start"() <{level = 10 : i32, message = "hqk,hkd->hqd"}> : () -> ()
    %cst_115 = arith.constant dense<0.000000e+00> : vector<4x8x8xf32>
    %205 = tpu.matmul %204, %188, %cst_115 {dimension_numbers = #tpu.dot_dimension_numbers<[2], [1], [1], [2], [0, 0, 0, 1, 1, 2], [0], [0]>} : vector<4x8x8xf32>, vector<4x8x8xf32>, vector<4x8x8xf32> -> vector<4x8x8xf32>
    "tpu.trace_stop"() : () -> ()
    %206 = tpu.transpose %205, [1, 0, 2] : vector<4x8x8xf32> -> vector<8x4x8xf32>
    %207 = vector.shape_cast %206 : vector<8x4x8xf32> to vector<8x32xf32>
    %208 = arith.addf %207, %81 : vector<8x32xf32>
    %cst_116 = arith.constant dense<0.000000e+00> : vector<8xf32>
    %209 = vector.multi_reduction <add>, %208, %cst_116 [1] : vector<8x32xf32> to vector<8xf32>
    %210 = vector.shape_cast %209 : vector<8xf32> to vector<8x1xf32>
    %cst_117 = arith.constant 3.200000e+01 : f32
    %211 = vector.broadcast %cst_117 : f32 to vector<8x1xf32>
    %212 = arith.divf %210, %211 : vector<8x1xf32>
    %213 = vector.broadcast %212 : vector<8x1xf32> to vector<8x32xf32>
    %214 = arith.subf %208, %213 : vector<8x32xf32>
    %215 = arith.mulf %214, %214 : vector<8x32xf32>
    %cst_118 = arith.constant dense<0.000000e+00> : vector<8xf32>
    %216 = vector.multi_reduction <add>, %215, %cst_118 [1] : vector<8x32xf32> to vector<8xf32>
    %217 = vector.shape_cast %216 : vector<8xf32> to vector<8x1xf32>
    %cst_119 = arith.constant 0.0322580636 : f32
    %218 = vector.broadcast %cst_119 : f32 to vector<8x1xf32>
    %219 = arith.mulf %217, %218 : vector<8x1xf32>
    %220 = math.sqrt %219 : vector<8x1xf32>
    %cst_120 = arith.constant 9.99999997E-7 : f32
    %221 = vector.broadcast %cst_120 : f32 to vector<8x1xf32>
    %222 = arith.addf %220, %221 : vector<8x1xf32>
    %223 = tpu.reciprocal %222 {approx = true} : vector<8x1xf32> -> vector<8x1xf32>
    %224 = vector.broadcast %223 : vector<8x1xf32> to vector<8x32xf32>
    %225 = arith.mulf %214, %224 : vector<8x32xf32>
    %226 = vector.broadcast %169 : vector<1x32xf32> to vector<8x32xf32>
    %227 = arith.mulf %226, %225 : vector<8x32xf32>
    %228 = vector.broadcast %171 : vector<1x32xf32> to vector<8x32xf32>
    %229 = arith.addf %227, %228 : vector<8x32xf32>
    %c1_121 = arith.constant 1 : index
    %c0_122 = arith.constant 0 : index
    %c0_123 = arith.constant 0 : index
    %230 = vector.load %arg13[%c1_121, %c0_122, %c0_123] : memref<2x32x32xf32, #tpu.memory_space<vmem>>, vector<1x32x32xf32>
    %231 = vector.shape_cast %230 : vector<1x32x32xf32> to vector<32x32xf32>
    %c1_124 = arith.constant 1 : index
    %c0_125 = arith.constant 0 : index
    %c0_126 = arith.constant 0 : index
    %232 = vector.load %arg14[%c1_124, %c0_125, %c0_126] : memref<2x1x32xf32, #tpu.memory_space<vmem>>, vector<1x1x32xf32>
    %233 = vector.shape_cast %232 : vector<1x1x32xf32> to vector<1x32xf32>
    %c1_127 = arith.constant 1 : index
    %c0_128 = arith.constant 0 : index
    %c0_129 = arith.constant 0 : index
    %234 = vector.load %arg15[%c1_127, %c0_128, %c0_129] : memref<2x32x32xf32, #tpu.memory_space<vmem>>, vector<1x32x32xf32>
    %235 = vector.shape_cast %234 : vector<1x32x32xf32> to vector<32x32xf32>
    %c1_130 = arith.constant 1 : index
    %c0_131 = arith.constant 0 : index
    %c0_132 = arith.constant 0 : index
    %236 = vector.load %arg16[%c1_130, %c0_131, %c0_132] : memref<2x1x32xf32, #tpu.memory_space<vmem>>, vector<1x1x32xf32>
    %237 = vector.shape_cast %236 : vector<1x1x32xf32> to vector<1x32xf32>
    %c1_133 = arith.constant 1 : index
    %c0_134 = arith.constant 0 : index
    %c0_135 = arith.constant 0 : index
    %238 = vector.load %arg17[%c1_133, %c0_134, %c0_135] : memref<2x32x32xf32, #tpu.memory_space<vmem>>, vector<1x32x32xf32>
    %239 = vector.shape_cast %238 : vector<1x32x32xf32> to vector<32x32xf32>
    %c1_136 = arith.constant 1 : index
    %c0_137 = arith.constant 0 : index
    %c0_138 = arith.constant 0 : index
    %240 = vector.load %arg18[%c1_136, %c0_137, %c0_138] : memref<2x1x32xf32, #tpu.memory_space<vmem>>, vector<1x1x32xf32>
    %241 = vector.shape_cast %240 : vector<1x1x32xf32> to vector<1x32xf32>
    %c1_139 = arith.constant 1 : index
    %c0_140 = arith.constant 0 : index
    %c0_141 = arith.constant 0 : index
    %242 = vector.load %arg19[%c1_139, %c0_140, %c0_141] : memref<2x1x32xf32, #tpu.memory_space<vmem>>, vector<1x1x32xf32>
    %243 = vector.shape_cast %242 : vector<1x1x32xf32> to vector<1x32xf32>
    %c1_142 = arith.constant 1 : index
    %c0_143 = arith.constant 0 : index
    %c0_144 = arith.constant 0 : index
    %244 = vector.load %arg20[%c1_142, %c0_143, %c0_144] : memref<2x1x32xf32, #tpu.memory_space<vmem>>, vector<1x1x32xf32>
    %245 = vector.shape_cast %244 : vector<1x1x32xf32> to vector<1x32xf32>
    %cst_145 = arith.constant dense<0.000000e+00> : vector<8x32xf32>
    %246 = tpu.matmul %155, %231, %cst_145 {dimension_numbers = #tpu.dot_dimension_numbers<[1], [0], [0], [1], [0, 0, 1, 1], [], []>} : vector<8x32xf32>, vector<32x32xf32>, vector<8x32xf32> -> vector<8x32xf32>
    %247 = vector.broadcast %233 : vector<1x32xf32> to vector<8x32xf32>
    %248 = arith.addf %246, %247 : vector<8x32xf32>
    %cst_146 = arith.constant 0.353553385 : f32
    %249 = vector.broadcast %cst_146 : f32 to vector<8x32xf32>
    %250 = arith.mulf %248, %249 : vector<8x32xf32>
    %cst_147 = arith.constant dense<0.000000e+00> : vector<8x32xf32>
    %251 = tpu.matmul %1, %235, %cst_147 {dimension_numbers = #tpu.dot_dimension_numbers<[1], [0], [0], [1], [0, 0, 1, 1], [], []>} : vector<8x32xf32>, vector<32x32xf32>, vector<8x32xf32> -> vector<8x32xf32>
    %252 = vector.broadcast %237 : vector<1x32xf32> to vector<8x32xf32>
    %253 = arith.addf %251, %252 : vector<8x32xf32>
    %cst_148 = arith.constant dense<0.000000e+00> : vector<8x32xf32>
    %254 = tpu.matmul %1, %239, %cst_148 {dimension_numbers = #tpu.dot_dimension_numbers<[1], [0], [0], [1], [0, 0, 1, 1], [], []>} : vector<8x32xf32>, vector<32x32xf32>, vector<8x32xf32> -> vector<8x32xf32>
    %255 = vector.broadcast %241 : vector<1x32xf32> to vector<8x32xf32>
    %256 = arith.addf %254, %255 : vector<8x32xf32>
    %257 = vector.shape_cast %250 : vector<8x32xf32> to vector<8x4x8xf32>
    %258 = tpu.transpose %257, [1, 0, 2] : vector<8x4x8xf32> -> vector<4x8x8xf32>
    %259 = vector.shape_cast %253 : vector<8x32xf32> to vector<8x4x8xf32>
    %260 = tpu.transpose %259, [1, 0, 2] : vector<8x4x8xf32> -> vector<4x8x8xf32>
    %261 = vector.shape_cast %256 : vector<8x32xf32> to vector<8x4x8xf32>
    %262 = tpu.transpose %261, [1, 0, 2] : vector<8x4x8xf32> -> vector<4x8x8xf32>
    "tpu.trace_start"() <{level = 10 : i32, message = "hqd,hkd->hqk"}> : () -> ()
    %cst_149 = arith.constant dense<0.000000e+00> : vector<4x8x8xf32>
    %263 = tpu.matmul %258, %260, %cst_149 {dimension_numbers = #tpu.dot_dimension_numbers<[2], [2], [1], [1], [0, 0, 0, 1, 1, 1], [0], [0]>} : vector<4x8x8xf32>, vector<4x8x8xf32>, vector<4x8x8xf32> -> vector<4x8x8xf32>
    "tpu.trace_stop"() : () -> ()
    %264 = vector.shape_cast %7 : vector<8x8xi1> to vector<1x8x8xi1>
    %cst_150 = arith.constant -1.000000e+09 : f32
    %265 = vector.shape_cast %264 : vector<1x8x8xi1> to vector<1x8x8xi1>
    %266 = vector.broadcast %265 : vector<1x8x8xi1> to vector<4x8x8xi1>
    %267 = vector.broadcast %cst_150 : f32 to vector<4x8x8xf32>
    %268 = arith.select %266, %263, %267 : vector<4x8x8xi1>, vector<4x8x8xf32>
    %cst_151 = arith.constant dense<0xFF800000> : vector<4x8xf32>
    %269 = vector.multi_reduction <maximumf>, %268, %cst_151 [2] : vector<4x8x8xf32> to vector<4x8xf32>
    %270 = vector.shape_cast %269 : vector<4x8xf32> to vector<4x8x1xf32>
    %271 = vector.broadcast %270 : vector<4x8x1xf32> to vector<4x8x8xf32>
    %272 = arith.subf %268, %271 : vector<4x8x8xf32>
    %273 = math.exp %272 : vector<4x8x8xf32>
    %cst_152 = arith.constant dense<0.000000e+00> : vector<4x8xf32>
    %274 = vector.multi_reduction <add>, %273, %cst_152 [2] : vector<4x8x8xf32> to vector<4x8xf32>
    %275 = vector.shape_cast %274 : vector<4x8xf32> to vector<4x8x1xf32>
    %276 = tpu.reciprocal %275 {approx = true} : vector<4x8x1xf32> -> vector<4x8x1xf32>
    %277 = vector.broadcast %276 : vector<4x8x1xf32> to vector<4x8x8xf32>
    %278 = arith.mulf %273, %277 : vector<4x8x8xf32>
    "tpu.trace_start"() <{level = 10 : i32, message = "hqk,hkd->hqd"}> : () -> ()
    %cst_153 = arith.constant dense<0.000000e+00> : vector<4x8x8xf32>
    %279 = tpu.matmul %278, %262, %cst_153 {dimension_numbers = #tpu.dot_dimension_numbers<[2], [1], [1], [2], [0, 0, 0, 1, 1, 2], [0], [0]>} : vector<4x8x8xf32>, vector<4x8x8xf32>, vector<4x8x8xf32> -> vector<4x8x8xf32>
    "tpu.trace_stop"() : () -> ()
    %280 = tpu.transpose %279, [1, 0, 2] : vector<4x8x8xf32> -> vector<8x4x8xf32>
    %281 = vector.shape_cast %280 : vector<8x4x8xf32> to vector<8x32xf32>
    %282 = arith.addf %281, %155 : vector<8x32xf32>
    %cst_154 = arith.constant dense<0.000000e+00> : vector<8xf32>
    %283 = vector.multi_reduction <add>, %282, %cst_154 [1] : vector<8x32xf32> to vector<8xf32>
    %284 = vector.shape_cast %283 : vector<8xf32> to vector<8x1xf32>
    %cst_155 = arith.constant 3.200000e+01 : f32
    %285 = vector.broadcast %cst_155 : f32 to vector<8x1xf32>
    %286 = arith.divf %284, %285 : vector<8x1xf32>
    %287 = vector.broadcast %286 : vector<8x1xf32> to vector<8x32xf32>
    %288 = arith.subf %282, %287 : vector<8x32xf32>
    %289 = arith.mulf %288, %288 : vector<8x32xf32>
    %cst_156 = arith.constant dense<0.000000e+00> : vector<8xf32>
    %290 = vector.multi_reduction <add>, %289, %cst_156 [1] : vector<8x32xf32> to vector<8xf32>
    %291 = vector.shape_cast %290 : vector<8xf32> to vector<8x1xf32>
    %cst_157 = arith.constant 0.0322580636 : f32
    %292 = vector.broadcast %cst_157 : f32 to vector<8x1xf32>
    %293 = arith.mulf %291, %292 : vector<8x1xf32>
    %294 = math.sqrt %293 : vector<8x1xf32>
    %cst_158 = arith.constant 9.99999997E-7 : f32
    %295 = vector.broadcast %cst_158 : f32 to vector<8x1xf32>
    %296 = arith.addf %294, %295 : vector<8x1xf32>
    %297 = tpu.reciprocal %296 {approx = true} : vector<8x1xf32> -> vector<8x1xf32>
    %298 = vector.broadcast %297 : vector<8x1xf32> to vector<8x32xf32>
    %299 = arith.mulf %288, %298 : vector<8x32xf32>
    %300 = vector.broadcast %243 : vector<1x32xf32> to vector<8x32xf32>
    %301 = arith.mulf %300, %299 : vector<8x32xf32>
    %302 = vector.broadcast %245 : vector<1x32xf32> to vector<8x32xf32>
    %303 = arith.addf %301, %302 : vector<8x32xf32>
    %c0_159 = arith.constant 0 : index
    %c0_160 = arith.constant 0 : index
    %c0_161 = arith.constant 0 : index
    %304 = vector.load %arg3[%c0_159, %c0_160, %c0_161] : memref<1x8x32xf32, #tpu.memory_space<vmem>>, vector<1x8x32xf32>
    %305 = vector.shape_cast %304 : vector<1x8x32xf32> to vector<8x32xf32>
    %306 = arith.addf %229, %305 : vector<8x32xf32>
    %c0_162 = arith.constant 0 : index
    %c0_163 = arith.constant 0 : index
    %c0_164 = arith.constant 0 : index
    %307 = vector.load %arg21[%c0_162, %c0_163, %c0_164] : memref<2x32x64xf32, #tpu.memory_space<vmem>>, vector<1x32x64xf32>
    %308 = vector.shape_cast %307 : vector<1x32x64xf32> to vector<32x64xf32>
    %c0_165 = arith.constant 0 : index
    %c0_166 = arith.constant 0 : index
    %c0_167 = arith.constant 0 : index
    %309 = vector.load %arg22[%c0_165, %c0_166, %c0_167] : memref<2x1x64xf32, #tpu.memory_space<vmem>>, vector<1x1x64xf32>
    %310 = vector.shape_cast %309 : vector<1x1x64xf32> to vector<1x64xf32>
    %c0_168 = arith.constant 0 : index
    %c0_169 = arith.constant 0 : index
    %c0_170 = arith.constant 0 : index
    %311 = vector.load %arg23[%c0_168, %c0_169, %c0_170] : memref<2x64x32xf32, #tpu.memory_space<vmem>>, vector<1x64x32xf32>
    %312 = vector.shape_cast %311 : vector<1x64x32xf32> to vector<64x32xf32>
    %c0_171 = arith.constant 0 : index
    %c0_172 = arith.constant 0 : index
    %c0_173 = arith.constant 0 : index
    %313 = vector.load %arg24[%c0_171, %c0_172, %c0_173] : memref<2x1x32xf32, #tpu.memory_space<vmem>>, vector<1x1x32xf32>
    %314 = vector.shape_cast %313 : vector<1x1x32xf32> to vector<1x32xf32>
    %c0_174 = arith.constant 0 : index
    %c0_175 = arith.constant 0 : index
    %c0_176 = arith.constant 0 : index
    %315 = vector.load %arg25[%c0_174, %c0_175, %c0_176] : memref<2x1x32xf32, #tpu.memory_space<vmem>>, vector<1x1x32xf32>
    %316 = vector.shape_cast %315 : vector<1x1x32xf32> to vector<1x32xf32>
    %c0_177 = arith.constant 0 : index
    %c0_178 = arith.constant 0 : index
    %c0_179 = arith.constant 0 : index
    %317 = vector.load %arg26[%c0_177, %c0_178, %c0_179] : memref<2x1x32xf32, #tpu.memory_space<vmem>>, vector<1x1x32xf32>
    %318 = vector.shape_cast %317 : vector<1x1x32xf32> to vector<1x32xf32>
    %cst_180 = arith.constant dense<0.000000e+00> : vector<8x64xf32>
    %319 = tpu.matmul %306, %308, %cst_180 {dimension_numbers = #tpu.dot_dimension_numbers<[1], [0], [0], [1], [0, 0, 1, 1], [], []>} : vector<8x32xf32>, vector<32x64xf32>, vector<8x64xf32> -> vector<8x64xf32>
    %320 = vector.broadcast %310 : vector<1x64xf32> to vector<8x64xf32>
    %321 = arith.addf %319, %320 : vector<8x64xf32>
    %cst_181 = arith.constant 0.000000e+00 : f32
    %322 = vector.broadcast %cst_181 : f32 to vector<8x64xf32>
    %323 = arith.maximumf %321, %322 : vector<8x64xf32>
    %cst_182 = arith.constant dense<0.000000e+00> : vector<8x32xf32>
    %324 = tpu.matmul %323, %312, %cst_182 {dimension_numbers = #tpu.dot_dimension_numbers<[1], [0], [0], [1], [0, 0, 1, 1], [], []>} : vector<8x64xf32>, vector<64x32xf32>, vector<8x32xf32> -> vector<8x32xf32>
    %325 = vector.broadcast %314 : vector<1x32xf32> to vector<8x32xf32>
    %326 = arith.addf %324, %325 : vector<8x32xf32>
    %327 = arith.addf %326, %306 : vector<8x32xf32>
    %cst_183 = arith.constant dense<0.000000e+00> : vector<8xf32>
    %328 = vector.multi_reduction <add>, %327, %cst_183 [1] : vector<8x32xf32> to vector<8xf32>
    %329 = vector.shape_cast %328 : vector<8xf32> to vector<8x1xf32>
    %cst_184 = arith.constant 3.200000e+01 : f32
    %330 = vector.broadcast %cst_184 : f32 to vector<8x1xf32>
    %331 = arith.divf %329, %330 : vector<8x1xf32>
    %332 = vector.broadcast %331 : vector<8x1xf32> to vector<8x32xf32>
    %333 = arith.subf %327, %332 : vector<8x32xf32>
    %334 = arith.mulf %333, %333 : vector<8x32xf32>
    %cst_185 = arith.constant dense<0.000000e+00> : vector<8xf32>
    %335 = vector.multi_reduction <add>, %334, %cst_185 [1] : vector<8x32xf32> to vector<8xf32>
    %336 = vector.shape_cast %335 : vector<8xf32> to vector<8x1xf32>
    %cst_186 = arith.constant 0.0322580636 : f32
    %337 = vector.broadcast %cst_186 : f32 to vector<8x1xf32>
    %338 = arith.mulf %336, %337 : vector<8x1xf32>
    %339 = math.sqrt %338 : vector<8x1xf32>
    %cst_187 = arith.constant 9.99999997E-7 : f32
    %340 = vector.broadcast %cst_187 : f32 to vector<8x1xf32>
    %341 = arith.addf %339, %340 : vector<8x1xf32>
    %342 = tpu.reciprocal %341 {approx = true} : vector<8x1xf32> -> vector<8x1xf32>
    %343 = vector.broadcast %342 : vector<8x1xf32> to vector<8x32xf32>
    %344 = arith.mulf %333, %343 : vector<8x32xf32>
    %345 = vector.broadcast %316 : vector<1x32xf32> to vector<8x32xf32>
    %346 = arith.mulf %345, %344 : vector<8x32xf32>
    %347 = vector.broadcast %318 : vector<1x32xf32> to vector<8x32xf32>
    %348 = arith.addf %346, %347 : vector<8x32xf32>
    %c0_188 = arith.constant 0 : index
    %c0_189 = arith.constant 0 : index
    %c0_190 = arith.constant 0 : index
    %349 = vector.load %arg27[%c0_188, %c0_189, %c0_190] : memref<1x8x32xf32, #tpu.memory_space<vmem>>, vector<1x8x32xf32>
    %350 = vector.shape_cast %349 : vector<1x8x32xf32> to vector<8x32xf32>
    %351 = vector.shape_cast %348 : vector<8x32xf32> to vector<1x8x32xf32>
    tpu.vector_store %arg27[%c0_188, %c0_189, %c0_190], %351 {strides = array<i32>} : memref<1x8x32xf32, #tpu.memory_space<vmem>>, vector<1x8x32xf32>,
    %352 = arith.addf %303, %305 : vector<8x32xf32>
    %c1_191 = arith.constant 1 : index
    %c0_192 = arith.constant 0 : index
    %c0_193 = arith.constant 0 : index
    %353 = vector.load %arg21[%c1_191, %c0_192, %c0_193] : memref<2x32x64xf32, #tpu.memory_space<vmem>>, vector<1x32x64xf32>
    %354 = vector.shape_cast %353 : vector<1x32x64xf32> to vector<32x64xf32>
    %c1_194 = arith.constant 1 : index
    %c0_195 = arith.constant 0 : index
    %c0_196 = arith.constant 0 : index
    %355 = vector.load %arg22[%c1_194, %c0_195, %c0_196] : memref<2x1x64xf32, #tpu.memory_space<vmem>>, vector<1x1x64xf32>
    %356 = vector.shape_cast %355 : vector<1x1x64xf32> to vector<1x64xf32>
    %c1_197 = arith.constant 1 : index
    %c0_198 = arith.constant 0 : index
    %c0_199 = arith.constant 0 : index
    %357 = vector.load %arg23[%c1_197, %c0_198, %c0_199] : memref<2x64x32xf32, #tpu.memory_space<vmem>>, vector<1x64x32xf32>
    %358 = vector.shape_cast %357 : vector<1x64x32xf32> to vector<64x32xf32>
    %c1_200 = arith.constant 1 : index
    %c0_201 = arith.constant 0 : index
    %c0_202 = arith.constant 0 : index
    %359 = vector.load %arg24[%c1_200, %c0_201, %c0_202] : memref<2x1x32xf32, #tpu.memory_space<vmem>>, vector<1x1x32xf32>
    %360 = vector.shape_cast %359 : vector<1x1x32xf32> to vector<1x32xf32>
    %c1_203 = arith.constant 1 : index
    %c0_204 = arith.constant 0 : index
    %c0_205 = arith.constant 0 : index
    %361 = vector.load %arg25[%c1_203, %c0_204, %c0_205] : memref<2x1x32xf32, #tpu.memory_space<vmem>>, vector<1x1x32xf32>
    %362 = vector.shape_cast %361 : vector<1x1x32xf32> to vector<1x32xf32>
    %c1_206 = arith.constant 1 : index
    %c0_207 = arith.constant 0 : index
    %c0_208 = arith.constant 0 : index
    %363 = vector.load %arg26[%c1_206, %c0_207, %c0_208] : memref<2x1x32xf32, #tpu.memory_space<vmem>>, vector<1x1x32xf32>
    %364 = vector.shape_cast %363 : vector<1x1x32xf32> to vector<1x32xf32>
    %cst_209 = arith.constant dense<0.000000e+00> : vector<8x64xf32>
    %365 = tpu.matmul %352, %354, %cst_209 {dimension_numbers = #tpu.dot_dimension_numbers<[1], [0], [0], [1], [0, 0, 1, 1], [], []>} : vector<8x32xf32>, vector<32x64xf32>, vector<8x64xf32> -> vector<8x64xf32>
    %366 = vector.broadcast %356 : vector<1x64xf32> to vector<8x64xf32>
    %367 = arith.addf %365, %366 : vector<8x64xf32>
    %cst_210 = arith.constant 0.000000e+00 : f32
    %368 = vector.broadcast %cst_210 : f32 to vector<8x64xf32>
    %369 = arith.maximumf %367, %368 : vector<8x64xf32>
    %cst_211 = arith.constant dense<0.000000e+00> : vector<8x32xf32>
    %370 = tpu.matmul %369, %358, %cst_211 {dimension_numbers = #tpu.dot_dimension_numbers<[1], [0], [0], [1], [0, 0, 1, 1], [], []>} : vector<8x64xf32>, vector<64x32xf32>, vector<8x32xf32> -> vector<8x32xf32>
    %371 = vector.broadcast %360 : vector<1x32xf32> to vector<8x32xf32>
    %372 = arith.addf %370, %371 : vector<8x32xf32>
    %373 = arith.addf %372, %352 : vector<8x32xf32>
    %cst_212 = arith.constant dense<0.000000e+00> : vector<8xf32>
    %374 = vector.multi_reduction <add>, %373, %cst_212 [1] : vector<8x32xf32> to vector<8xf32>
    %375 = vector.shape_cast %374 : vector<8xf32> to vector<8x1xf32>
    %cst_213 = arith.constant 3.200000e+01 : f32
    %376 = vector.broadcast %cst_213 : f32 to vector<8x1xf32>
    %377 = arith.divf %375, %376 : vector<8x1xf32>
    %378 = vector.broadcast %377 : vector<8x1xf32> to vector<8x32xf32>
    %379 = arith.subf %373, %378 : vector<8x32xf32>
    %380 = arith.mulf %379, %379 : vector<8x32xf32>
    %cst_214 = arith.constant dense<0.000000e+00> : vector<8xf32>
    %381 = vector.multi_reduction <add>, %380, %cst_214 [1] : vector<8x32xf32> to vector<8xf32>
    %382 = vector.shape_cast %381 : vector<8xf32> to vector<8x1xf32>
    %cst_215 = arith.constant 0.0322580636 : f32
    %383 = vector.broadcast %cst_215 : f32 to vector<8x1xf32>
    %384 = arith.mulf %382, %383 : vector<8x1xf32>
    %385 = math.sqrt %384 : vector<8x1xf32>
    %cst_216 = arith.constant 9.99999997E-7 : f32
    %386 = vector.broadcast %cst_216 : f32 to vector<8x1xf32>
    %387 = arith.addf %385, %386 : vector<8x1xf32>
    %388 = tpu.reciprocal %387 {approx = true} : vector<8x1xf32> -> vector<8x1xf32>
    %389 = vector.broadcast %388 : vector<8x1xf32> to vector<8x32xf32>
    %390 = arith.mulf %379, %389 : vector<8x32xf32>
    %391 = vector.broadcast %362 : vector<1x32xf32> to vector<8x32xf32>
    %392 = arith.mulf %391, %390 : vector<8x32xf32>
    %393 = vector.broadcast %364 : vector<1x32xf32> to vector<8x32xf32>
    %394 = arith.addf %392, %393 : vector<8x32xf32>
    %c0_217 = arith.constant 0 : index
    %c0_218 = arith.constant 0 : index
    %c0_219 = arith.constant 0 : index
    %395 = vector.load %arg28[%c0_217, %c0_218, %c0_219] : memref<1x8x32xf32, #tpu.memory_space<vmem>>, vector<1x8x32xf32>
    %396 = vector.shape_cast %395 : vector<1x8x32xf32> to vector<8x32xf32>
    %397 = vector.shape_cast %394 : vector<8x32xf32> to vector<1x8x32xf32>
    tpu.vector_store %arg28[%c0_217, %c0_218, %c0_219], %397 {strides = array<i32>} : memref<1x8x32xf32, #tpu.memory_space<vmem>>, vector<1x8x32xf32>,
    return
  }
  func.func @transform_0(%arg0: i32) -> (i32, i32, i32) {
    %c0_i32 = arith.constant 0 : i32
    %c0_i32_0 = arith.constant 0 : i32
    %c0_i32_1 = arith.constant 0 : i32
    return %arg0, %c0_i32, %c0_i32_0 : i32, i32, i32
  }
  func.func @transform_1(%arg0: i32) -> (i32, i32, i32) {
    %c0_i32 = arith.constant 0 : i32
    %c0_i32_0 = arith.constant 0 : i32
    %c0_i32_1 = arith.constant 0 : i32
    return %arg0, %c0_i32, %c0_i32_0 : i32, i32, i32
  }
  func.func @transform_2(%arg0: i32) -> (i32, i32, i32) {
    %c0_i32 = arith.constant 0 : i32
    %c0_i32_0 = arith.constant 0 : i32
    %c0_i32_1 = arith.constant 0 : i32
    return %arg0, %c0_i32, %c0_i32_0 : i32, i32, i32
  }
  func.func @transform_3(%arg0: i32) -> (i32, i32, i32) {
    %c0_i32 = arith.constant 0 : i32
    %c0_i32_0 = arith.constant 0 : i32
    %c0_i32_1 = arith.constant 0 : i32
    return %arg0, %c0_i32, %c0_i32_0 : i32, i32, i32
  }
  func.func @transform_4(%arg0: i32) -> (i32, i32, i32) {
    %c0_i32 = arith.constant 0 : i32
    %c0_i32_0 = arith.constant 0 : i32
    %c0_i32_1 = arith.constant 0 : i32
    %c0_i32_2 = arith.constant 0 : i32
    return %c0_i32, %c0_i32_0, %c0_i32_1 : i32, i32, i32
  }
  func.func @transform_5(%arg0: i32) -> (i32, i32, i32) {
    %c0_i32 = arith.constant 0 : i32
    %c0_i32_0 = arith.constant 0 : i32
    %c0_i32_1 = arith.constant 0 : i32
    %c0_i32_2 = arith.constant 0 : i32
    return %c0_i32, %c0_i32_0, %c0_i32_1 : i32, i32, i32
  }
  func.func @transform_6(%arg0: i32) -> (i32, i32, i32) {
    %c0_i32 = arith.constant 0 : i32
    %c0_i32_0 = arith.constant 0 : i32
    %c0_i32_1 = arith.constant 0 : i32
    %c0_i32_2 = arith.constant 0 : i32
    return %c0_i32, %c0_i32_0, %c0_i32_1 : i32, i32, i32
  }
  func.func @transform_7(%arg0: i32) -> (i32, i32, i32) {
    %c0_i32 = arith.constant 0 : i32
    %c0_i32_0 = arith.constant 0 : i32
    %c0_i32_1 = arith.constant 0 : i32
    %c0_i32_2 = arith.constant 0 : i32
    return %c0_i32, %c0_i32_0, %c0_i32_1 : i32, i32, i32
  }
  func.func @transform_8(%arg0: i32) -> (i32, i32, i32) {
    %c0_i32 = arith.constant 0 : i32
    %c0_i32_0 = arith.constant 0 : i32
    %c0_i32_1 = arith.constant 0 : i32
    %c0_i32_2 = arith.constant 0 : i32
    return %c0_i32, %c0_i32_0, %c0_i32_1 : i32, i32, i32
  }
  func.func @transform_9(%arg0: i32) -> (i32, i32, i32) {
    %c0_i32 = arith.constant 0 : i32
    %c0_i32_0 = arith.constant 0 : i32
    %c0_i32_1 = arith.constant 0 : i32
    %c0_i32_2 = arith.constant 0 : i32
    return %c0_i32, %c0_i32_0, %c0_i32_1 : i32, i32, i32
  }
  func.func @transform_10(%arg0: i32) -> (i32, i32, i32) {
    %c0_i32 = arith.constant 0 : i32
    %c0_i32_0 = arith.constant 0 : i32
    %c0_i32_1 = arith.constant 0 : i32
    %c0_i32_2 = arith.constant 0 : i32
    return %c0_i32, %c0_i32_0, %c0_i32_1 : i32, i32, i32
  }
  func.func @transform_11(%arg0: i32) -> (i32, i32, i32) {
    %c0_i32 = arith.constant 0 : i32
    %c0_i32_0 = arith.constant 0 : i32
    %c0_i32_1 = arith.constant 0 : i32
    %c0_i32_2 = arith.constant 0 : i32
    return %c0_i32, %c0_i32_0, %c0_i32_1 : i32, i32, i32
  }
  func.func @transform_12(%arg0: i32) -> (i32, i32, i32) {
    %c0_i32 = arith.constant 0 : i32
    %c0_i32_0 = arith.constant 0 : i32
    %c0_i32_1 = arith.constant 0 : i32
    %c0_i32_2 = arith.constant 0 : i32
    return %c0_i32, %c0_i32_0, %c0_i32_1 : i32, i32, i32
  }
  func.func @transform_13(%arg0: i32) -> (i32, i32, i32) {
    %c0_i32 = arith.constant 0 : i32
    %c0_i32_0 = arith.constant 0 : i32
    %c0_i32_1 = arith.constant 0 : i32
    %c0_i32_2 = arith.constant 0 : i32
    return %c0_i32, %c0_i32_0, %c0_i32_1 : i32, i32, i32
  }
  func.func @transform_14(%arg0: i32) -> (i32, i32, i32) {
    %c0_i32 = arith.constant 0 : i32
    %c0_i32_0 = arith.constant 0 : i32
    %c0_i32_1 = arith.constant 0 : i32
    %c0_i32_2 = arith.constant 0 : i32
    return %c0_i32, %c0_i32_0, %c0_i32_1 : i32, i32, i32
  }
  func.func @transform_15(%arg0: i32) -> (i32, i32, i32) {
    %c0_i32 = arith.constant 0 : i32
    %c0_i32_0 = arith.constant 0 : i32
    %c0_i32_1 = arith.constant 0 : i32
    %c0_i32_2 = arith.constant 0 : i32
    return %c0_i32, %c0_i32_0, %c0_i32_1 : i32, i32, i32
  }
  func.func @transform_16(%arg0: i32) -> (i32, i32, i32) {
    %c0_i32 = arith.constant 0 : i32
    %c0_i32_0 = arith.constant 0 : i32
    %c0_i32_1 = arith.constant 0 : i32
    %c0_i32_2 = arith.constant 0 : i32
    return %c0_i32, %c0_i32_0, %c0_i32_1 : i32, i32, i32
  }
  func.func @transform_17(%arg0: i32) -> (i32, i32, i32) {
    %c0_i32 = arith.constant 0 : i32
    %c0_i32_0 = arith.constant 0 : i32
    %c0_i32_1 = arith.constant 0 : i32
    %c0_i32_2 = arith.constant 0 : i32
    return %c0_i32, %c0_i32_0, %c0_i32_1 : i32, i32, i32
  }
  func.func @transform_18(%arg0: i32) -> (i32, i32, i32) {
    %c0_i32 = arith.constant 0 : i32
    %c0_i32_0 = arith.constant 0 : i32
    %c0_i32_1 = arith.constant 0 : i32
    %c0_i32_2 = arith.constant 0 : i32
    return %c0_i32, %c0_i32_0, %c0_i32_1 : i32, i32, i32
  }
  func.func @transform_19(%arg0: i32) -> (i32, i32, i32) {
    %c0_i32 = arith.constant 0 : i32
    %c0_i32_0 = arith.constant 0 : i32
    %c0_i32_1 = arith.constant 0 : i32
    %c0_i32_2 = arith.constant 0 : i32
    return %c0_i32, %c0_i32_0, %c0_i32_1 : i32, i32, i32
  }
  func.func @transform_20(%arg0: i32) -> (i32, i32, i32) {
    %c0_i32 = arith.constant 0 : i32
    %c0_i32_0 = arith.constant 0 : i32
    %c0_i32_1 = arith.constant 0 : i32
    %c0_i32_2 = arith.constant 0 : i32
    return %c0_i32, %c0_i32_0, %c0_i32_1 : i32, i32, i32
  }
  func.func @transform_21(%arg0: i32) -> (i32, i32, i32) {
    %c0_i32 = arith.constant 0 : i32
    %c0_i32_0 = arith.constant 0 : i32
    %c0_i32_1 = arith.constant 0 : i32
    %c0_i32_2 = arith.constant 0 : i32
    return %c0_i32, %c0_i32_0, %c0_i32_1 : i32, i32, i32
  }
  func.func @transform_22(%arg0: i32) -> (i32, i32, i32) {
    %c0_i32 = arith.constant 0 : i32
    %c0_i32_0 = arith.constant 0 : i32
    %c0_i32_1 = arith.constant 0 : i32
    %c0_i32_2 = arith.constant 0 : i32
    return %c0_i32, %c0_i32_0, %c0_i32_1 : i32, i32, i32
  }
  func.func @transform_23(%arg0: i32) -> (i32, i32, i32) {
    %c0_i32 = arith.constant 0 : i32
    %c0_i32_0 = arith.constant 0 : i32
    %c0_i32_1 = arith.constant 0 : i32
    %c0_i32_2 = arith.constant 0 : i32
    return %c0_i32, %c0_i32_0, %c0_i32_1 : i32, i32, i32
  }
  func.func @transform_24(%arg0: i32) -> (i32, i32, i32) {
    %c0_i32 = arith.constant 0 : i32
    %c0_i32_0 = arith.constant 0 : i32
    %c0_i32_1 = arith.constant 0 : i32
    %c0_i32_2 = arith.constant 0 : i32
    return %c0_i32, %c0_i32_0, %c0_i32_1 : i32, i32, i32
  }
  func.func @transform_25(%arg0: i32) -> (i32, i32, i32) {
    %c0_i32 = arith.constant 0 : i32
    %c0_i32_0 = arith.constant 0 : i32
    %c0_i32_1 = arith.constant 0 : i32
    %c0_i32_2 = arith.constant 0 : i32
    return %c0_i32, %c0_i32_0, %c0_i32_1 : i32, i32, i32
  }
  func.func @transform_26(%arg0: i32) -> (i32, i32, i32) {
    %c0_i32 = arith.constant 0 : i32
    %c0_i32_0 = arith.constant 0 : i32
    %c0_i32_1 = arith.constant 0 : i32
    return %arg0, %c0_i32, %c0_i32_0 : i32, i32, i32
  }
  func.func @transform_27(%arg0: i32) -> (i32, i32, i32) {
    %c0_i32 = arith.constant 0 : i32
    %c0_i32_0 = arith.constant 0 : i32
    %c0_i32_1 = arith.constant 0 : i32
    return %arg0, %c0_i32, %c0_i32_0 : i32, i32, i32
  }
}

</mosaic_0001>

<bundles_post_ra>
// kernel: tpu_custom_call.1
= control target key start
LH: loop header
LB: loop body
LE: loop exit
PB: predicated region body
PF: predicated region fallthrough
CT: control target
= control target key end

     0   :  { %s10911_s0 = inlined_call_operand.hbm [shape: f32[2,8,32], index: 0, kind: input, shape index: {}]   ;;  %s10912_s1 = inlined_call_operand.hbm [shape: f32[2,8,32], index: 1, kind: input, shape index: {}]   ;;  %s10913_s2 = inlined_call_operand.hbm [shape: f32[2,8,32], index: 2, kind: input, shape index: {}]   ;;  %s10914_s3 = inlined_call_operand.hbm [shape: f32[2,8,8], index: 3, kind: input, shape index: {}]   ;;  %s10915_s4 = inlined_call_operand.vmem [shape: f32[2,32,32], index: 4, kind: input, shape index: {}]   ;;  %s10916_s5 = inlined_call_operand.vmem [shape: f32[2,1,32], index: 5, kind: input, shape index: {}]   ;;  %s10917_s6 = inlined_call_operand.vmem [shape: f32[2,32,32], index: 6, kind: input, shape index: {}]   ;;  %s10918_s7 = inlined_call_operand.vmem [shape: f32[2,1,32], index: 7, kind: input, shape index: {}]   ;;  %s10919_s8 = inlined_call_operand.vmem [shape: f32[2,32,32], index: 8, kind: input, shape index: {}]   ;;  %s10920_s9 = inlined_call_operand.vmem [shape: f32[2,1,32], index: 9, kind: input, shape index: {}]   ;;  %s10921_s10 = inlined_call_operand.vmem [shape: f32[2,1,32], index: 10, kind: input, shape index: {}]   ;;  %s10922_s11 = inlined_call_operand.vmem [shape: f32[2,1,32], index: 11, kind: input, shape index: {}]   ;;  %s10923_s12 = inlined_call_operand.hbm [shape: f32[2,32,32], index: 12, kind: input, shape index: {}]   ;;  %s10924_s13 = inlined_call_operand.vmem [shape: f32[2,1,32], index: 13, kind: input, shape index: {}]   ;;  %s10925_s14 = inlined_call_operand.hbm [shape: f32[2,32,32], index: 14, kind: input, shape index: {}]   ;;  %s10926_s15 = inlined_call_operand.vmem [shape: f32[2,1,32], index: 15, kind: input, shape index: {}]   ;;  %s10927_s16 = inlined_call_operand.hbm [shape: f32[2,32,32], index: 16, kind: input, shape index: {}]   ;;  %s10928_s17 = inlined_call_operand.vmem [shape: f32[2,1,32], index: 17, kind: input, shape index: {}]   ;;  %s10929_s18 = inlined_call_operand.vmem [shape: f32[2,1,32], index: 18, kind: input, shape index: {}]   ;;  %s10930_s19 = inlined_call_operand.hbm [shape: f32[2,1,32], index: 19, kind: input, shape index: {}]   ;;  %s10931_s20 = inlined_call_operand.hbm [shape: f32[2,32,64], index: 20, kind: input, shape index: {}]   ;;  %s10932_s21 = inlined_call_operand.hbm [shape: f32[2,1,64], index: 21, kind: input, shape index: {}]   ;;  %s10933_s22 = inlined_call_operand.vmem [shape: f32[2,64,32], index: 22, kind: input, shape index: {}]   ;;  %s10934_s23 = inlined_call_operand.vmem [shape: f32[2,1,32], index: 23, kind: input, shape index: {}]   ;;  %s10935_s24 = inlined_call_operand.vmem [shape: f32[2,1,32], index: 24, kind: input, shape index: {}]   ;;  %s10936_s25 = inlined_call_operand.vmem [shape: f32[2,1,32], index: 25, kind: input, shape index: {}]   ;;  %s10937_s26 = inlined_call_operand.hbm [shape: f32[2,8,32], index: 26, kind: output, shape index: {0}]   ;;  %s10938_s27 = inlined_call_operand.hbm [shape: f32[2,8,32], index: 27, kind: output, shape index: {1}]  }
   0x1   :  { %11002 = sst [smem:[#allocation36_spill]] %s10911_s0 }
   0x2   :  { %11003 = sst [smem:[#allocation37_spill]] %s10912_s1 }
   0x3   :  { %11004 = sst [smem:[#allocation38_spill]] %s10913_s2 }
   0x4   :  { %11005 = sst [smem:[#allocation39_spill]] %s10914_s3 }
   0x5   :  { %11006 = sst [smem:[#allocation40_spill]] %s10915_s4 }
   0x6   :  { %11007 = sst [smem:[#allocation41_spill]] %s10916_s5 }
   0x7   :  { %11008 = sst [smem:[#allocation42_spill]] %s10917_s6 }
   0x8   :  { %11009 = sst [smem:[#allocation43_spill]] %s10918_s7 }
   0x9   :  { %11010 = sst [smem:[#allocation44_spill]] %s10919_s8 }
   0xa   :  { %11011 = sst [smem:[#allocation45_spill]] %s10920_s9 }
   0xb   :  { %11012 = sst [smem:[#allocation46_spill]] %s10921_s10 }
   0xc   :  { %11013 = sst [smem:[#allocation47_spill]] %s10922_s11 }
   0xd   :  { %11014 = sst [smem:[#allocation48_spill]] %s10923_s12 }
   0xe   :  { %11015 = sst [smem:[#allocation49_spill]] %s10924_s13 }
   0xf   :  { %11016 = sst [smem:[#allocation50_spill]] %s10925_s14 }
  0x10   :  { %11017 = sst [smem:[#allocation51_spill]] %s10926_s15 }
  0x11   :  { %11018 = sst [smem:[#allocation52_spill]] %s10927_s16 }
  0x12   :  { %11019 = sst [smem:[#allocation53_spill]] %s10928_s17 }
  0x13   :  { %11020 = sst [smem:[#allocation54_spill]] %s10929_s18 }
  0x14   :  { %11021 = sst [smem:[#allocation55_spill]] %s10930_s19 }
  0x15   :  { %11022 = sst [smem:[#allocation56_spill]] %s10933_s22 }
  0x16   :  { %11023 = sst [smem:[#allocation57_spill]] %s10934_s23 }
  0x17   :  { %11024 = sst [smem:[#allocation58_spill]] %s10935_s24 }
  0x18   :  { %11025 = sst [smem:[#allocation59_spill]] %s10936_s25 }
  0x19   :  { %11026 = sst [smem:[#allocation60_spill]] %s10937_s26 }
  0x1a   :  { %11027 = sst [smem:[#allocation61_spill]] %s10938_s27 }
  0x1b   :  { %33 = vsyncpa [#allocation3], 0 }
  0x1c   :  { %35 = vsyncpa [#allocation3 + $0x1], 0 }
  0x1d   :  { %36 = vsyncpa [#allocation6], 0 }
  0x1e   :  { %38 = vsyncpa [#allocation6 + $0x1], 0 }
  0x1f   :  { %39 = vsyncpa [#allocation9], 0 }
  0x20   :  { %41 = vsyncpa [#allocation9 + $0x1], 0 }
  0x21   :  { %42 = vsyncpa [#allocation12], 0 }
  0x22   :  { %43 = vsyncpa [#allocation15], 0 }
  0x23   :  { %44 = vsyncpa [#allocation18], 0 }
  0x24   :  { %45 = vsyncpa [#allocation4], 0 }
  0x25   :  { %47 = vsyncpa [#allocation4 + $0x1], 0 }
  0x26   :  { %48 = vsyncpa [#allocation21], 0 }
  0x27   :  { %50 = vsyncpa [#allocation21 + $0x1], 0  ;;  %s9438_s7 = smov 0   ;;  %s9440_s4 = smov 0  }
  0x28   :  { %s9442_s8 = smov 0   ;;  %s9444_s30 = smov 0  }
  0x29 LB: > { %11028 = sst [smem:[#allocation31_spill]] %s9257_s7  ;;  %s9271_s9 = smov [#allocation10]   ;;  %s9269_s30 = sphi %s9444_s30, %s11102_s30   ;;  %s9265_s8 = sphi %s9442_s8, %s11106_s8   ;;  %s9261_s4 = sphi %s9440_s4, %s11105_s4   ;;  %s9257_s7 = sphi %s9438_s7, %s11104_s7  }
  0x2a   : > { %s715_s5 = sshll.u32 %s9271_s9, 4  ;;  %s9459_s28 = sadd.s32 4294967295, %s9269_s30   ;;  %s9464_s5 = int_to_ptr.vmem [resolvable:$true] %s715_s5 }
  0x2b   : > { %p7825_p0 = scmp.ge.s32.totalorder %s9269_s30, 1  ;;  %p10969_p1 = scmp.eq.s32.totalorder %s9459_s28, 0 }
  0x2c   : > { %p679_p2 = scmp.lt.s32.totalorder %s9269_s30, 3  ;;  %s9272_s10 = smov [#allocation11]  }
  0x2d   : > { %s731_s29 = sshll.u32 %s9272_s10, 4  ;;  %s9273_s6 = smov [#allocation14]   ;;  %s9479_s29 = int_to_ptr.vmem [resolvable:$true] %s731_s29 }
  0x2e   : > { %p9466_p3 = pnand %p7825_p0, %p679_p2  ;;  %s766_s11 = sshll.u32 %s9273_s6, 4  ;;  %s9481_s11 = int_to_ptr.vmem [resolvable:$true] %s766_s11 }
  0x2f   : > { %s11031_s12 = sld [smem:[#allocation48_spill]] }
  0x30   : > { %s11029_s0 = scalar_select %p9466_p3, 1, 0 }
  0x31   : > { %p8664_p5 = pneg %p9466_p3 }
  0x33   : > { %p9475_p6 = pnand %p8664_p5, %p10969_p1 }
  0x35   : > { %s11030_s1 = scalar_select %p9475_p6, 1, 0 }
  0x36   : > { %s8859_s9 = scalar_lea.hbm %s11031_s12, 1024  ;;  %p9491_p8 = pneg %p9475_p6 }
  0x37   : > { %p8860_p7 = scmp.ne.s32.totalorder %s11031_s12, %s8859_s9  ;;  %p8866_p11 = scmp.lt.u32.totalorder %s8859_s9, %s11031_s12 }
  0x38   : > { %s11032_s10 = scalar_select %p9491_p8, 1, 0 }
  0x39   : > { %p8862_p9 = pnand %p9491_p8, %p8860_p7 }
  0x3b   : > { %p8863_p10 = pneg %p8862_p9 }
  0x3d   : > { %p8868_p12 = pnand %p8866_p11, %p8863_p10 }
  0x3f   : > { %8871 = shalt.err (!%p8868_p12)
}
  0x40   : > { %s8872_s26 = scalar_lea.vmem %s9464_s5, 1024  ;;  %p8880_p5 = scmp.lt.s32.totalorder %s9464_s5, %s9464_s5 }
  0x41   : > { %p8873_p13 = scmp.ne.s32.totalorder %s9464_s5, %s8872_s26  ;;  %p8881_p4 = scmp.lt.s32.totalorder %s8872_s26, %s8872_s26 }
  0x43   : > { %p8875_p0 = pnand %p8873_p13, %p9491_p8  ;;  %p8882_p7 = por %p8881_p4, %p8880_p5 }
  0x45   : > { %p8876_p2 = pneg %p8875_p0 }
  0x47   : > { %p8883_p9 = pnand %p8882_p7, %p8876_p2 }
  0x49   : > { %8886 = shalt.err (!%p8883_p9)
}
  0x4a   : > { %s10961_s27 = smov 128   ;;  %s10963_s25 = smov 8  }
  0x4b   : > { %8667 = dma.hbm_to_vmem [thread:$0]  (!%p9475_p6), %s11031_s12, 1024, %s9464_s5, [#allocation9], %s10961_s27, %s10961_s27, %s10963_s25  }
  0x4c   : > { %s11033_s14 = sld [smem:[#allocation50_spill]] }
  0x52   : > { %s8887_s26 = scalar_lea.hbm %s11033_s14, 1024 }
  0x53   : > { %p8888_p4 = scmp.ne.s32.totalorder %s11033_s14, %s8887_s26  ;;  %p8894_p12 = scmp.lt.u32.totalorder %s8887_s26, %s11033_s14 }
  0x55   : > { %p8890_p10 = pnand %p8888_p4, %p9491_p8 }
  0x57   : > { %p8891_p11 = pneg %p8890_p10 }
  0x59   : > { %p8896_p13 = pnand %p8894_p12, %p8891_p11 }
  0x5b   : > { %8899 = shalt.err (!%p8896_p13)
}
  0x5c   : > { %s8900_s5 = scalar_lea.vmem %s9479_s29, 1024  ;;  %p8908_p7 = scmp.lt.s32.totalorder %s9479_s29, %s9479_s29 }
  0x5d   : > { %p8901_p0 = scmp.ne.s32.totalorder %s9479_s29, %s8900_s5  ;;  %p8909_p9 = scmp.lt.s32.totalorder %s8900_s5, %s8900_s5 }
  0x5f   : > { %p8903_p2 = pnand %p8901_p0, %p9491_p8  ;;  %p8910_p4 = por %p8909_p9, %p8908_p7 }
  0x61   : > { %p8904_p5 = pneg %p8903_p2 }
  0x63   : > { %p8911_p10 = pnand %p8910_p4, %p8904_p5 }
  0x65   : > { %8914 = shalt.err (!%p8911_p10)
}
  0x66   : > { %8670 = dma.hbm_to_vmem [thread:$0]  (!%p9475_p6), %s11033_s14, 1024, %s9479_s29, [#allocation12], %s10961_s27, %s10961_s27, %s10963_s25  }
  0x67   : > { %s11034_s19 = sld [smem:[#allocation55_spill]] }
  0x6d   : > { %s8915_s2 = scalar_lea.hbm %s11034_s19, 32 }
  0x6e   : > { %p8916_p11 = scmp.ne.s32.totalorder %s11034_s19, %s8915_s2  ;;  %p8922_p0 = scmp.lt.u32.totalorder %s8915_s2, %s11034_s19 }
  0x70   : > { %p8918_p12 = pnand %p8916_p11, %p9491_p8 }
  0x72   : > { %p8919_p13 = pneg %p8918_p12 }
  0x74   : > { %p8924_p2 = pnand %p8922_p0, %p8919_p13 }
  0x76   : > { %8927 = shalt.err (!%p8924_p2)
}
  0x77   : > { %s8928_s29 = scalar_lea.vmem %s9481_s11, 32  ;;  %p8936_p4 = scmp.lt.s32.totalorder %s9481_s11, %s9481_s11 }
  0x78   : > { %p8929_p5 = scmp.ne.s32.totalorder %s9481_s11, %s8928_s29  ;;  %p8937_p10 = scmp.lt.s32.totalorder %s8928_s29, %s8928_s29 }
  0x7a   : > { %p8931_p7 = pnand %p8929_p5, %p9491_p8  ;;  %p8938_p11 = por %p8937_p10, %p8936_p4 }
  0x7c   : > { %p8932_p9 = pneg %p8931_p7 }
  0x7e   : > { %p8939_p12 = pnand %p8938_p11, %p8932_p9 }
  0x80   : > { %8942 = shalt.err (!%p8939_p12)
}
  0x81   : > { %s10959_s5 = smov 16   ;;  %s10960_s18 = smov 1  }
  0x82   : > { %8676 = dma.hbm_to_vmem [thread:$0]  (!%p9475_p6), %s11034_s19, 32, %s9481_s11, [#allocation15], %s10959_s5, %s10959_s5, %s10960_s18  }
  0x83   : > { %s7824_s24 = sadd.s32 4294967294, %s9269_s30   ;;  %s9569_s2 = sadd.s32 1, %s9269_s30  }
  0x84   : > { %11035 = sst [smem:[#allocation32_spill]] %s9569_s2  ;;  %s63_s3 = sadd.s32 1, %s9265_s8 }
  0x85   : > { %s60_s9 = ssub.s32 %s9269_s30, %s9569_s2  ;;  %p70_p13 = scmp.ne.s32.totalorder %s9265_s8, %s9261_s4 }
  0x86   : > { %p61_p0 = scmp.eq.s32.totalorder %s60_s9, 0  ;;  %p71_p2 = scmp.eq.s32.totalorder %s9269_s30, 0 }
  0x87   : > { %p76_p5 = scmp.ne.s32.totalorder %s9261_s4, %s9257_s7  ;;  %p640_p7 = scmp.eq.s32.totalorder %s9459_s28, 1 }
  0x88   : > { %s9581_s6 = scalar_select %p61_p0, %s9265_s8, %s63_s3  }
  0x89   : > { %p72_p9 = por %p71_p2, %p70_p13  ;;  %p9585_p4 = por %p10969_p1, %p76_p5 }
  0x8a   : > { %11036 = sst [smem:[#allocation33_spill]] %s9581_s6  ;;  %p9589_p10 = por %p640_p7, %p70_p13 }
  0x8b   : > { %s11037_s11 = scalar_select %p9585_p4, 1, 0 }
  0x8c   : > { %s11038_s26 = scalar_select %p9589_p10, 1, 0 }
  0x8d   : > { %p646_p11 = scmp.eq.s32.totalorder %s7824_s24, 1  ;;  %p8709_p12 = scmp.lt.s32.totalorder %s9269_s30, 2 }
  0x8e   : > { %11039 = sst [smem:[#allocation34_spill]] %s11038_s26  ;;  %s10965_s29 = sand.u32 1, %s9265_s8  }
  0x8f   : > { %p9595_p3 = por %p646_p11, %p76_p5  ;;  %s9601_s23 = sshll.u32 %s10965_s29, 3 }
  0x90   : > { %s9604_s3 = sshll.u32 %s9269_s30, 7  ;;  %p9606_p0 = pnand %p8709_p12, %p72_p9 }
  0x91   : > { %s11040_s22 = scalar_select %p9595_p3, 1, 0 }
  0x92   : > { %s11042_s9 = scalar_select %p9606_p0, 1, 0 }
  0x93   : > { %11041 = sst [smem:[#allocation35_spill]] %s11040_s22  ;;  %s10971_s5 = sand.u32 1, %s9269_s30  }
  0x94   : > { %s11043_s27 = sld [smem:[#allocation37_spill]]  ;;  %s840_s29 = scalar_lea.vmem [#allocation5], %s9601_s23 }
  0x95   : > { %s847_s12 = sshll.u32 %s840_s29, 4  ;;  %s9622_s14 = scalar_lea.sflag [#allocation6], %s10971_s5  ;;  %s9618_s12 = int_to_ptr.vmem [resolvable:$true] %s847_s12 }
  0x96   : > { %p9628_p2 = pneg %p9606_p0 }
  0x98   : > { %s11044_s6 = scalar_select %p9628_p2, 1, 0 }
  0x9a   : > { %s9615_s25 = scalar_lea.hbm %s11043_s27, %s9604_s3  ;;  %s8948_s29 = scalar_lea.hbm %s11043_s27, 256 }
  0x9b   : > { %s8943_s19 = scalar_lea.hbm %s9615_s25, 128  ;;  %p8949_p9 = scmp.lt.u32.totalorder %s9615_s25, %s11043_s27 }
  0x9c   : > { %p8944_p13 = scmp.ne.s32.totalorder %s9615_s25, %s8943_s19  ;;  %p8950_p11 = scmp.lt.u32.totalorder %s8948_s29, %s8943_s19 }
  0x9d   : > { %p8952_p1 = scmp.lt.u32.totalorder %s8943_s19, %s9615_s25 }
  0x9e   : > { %p8946_p5 = pnand %p9628_p2, %p8944_p13  ;;  %p8951_p12 = por %p8950_p11, %p8949_p9 }
  0xa0   : > { %p8947_p7 = pneg %p8946_p5  ;;  %p8953_p3 = por %p8952_p1, %p8951_p12 }
  0xa2   : > { %p8954_p10 = pnand %p8953_p3, %p8947_p7 }
  0xa4   : > { %8957 = shalt.err (!%p8954_p10)
}
  0xa5   : > { %s8958_s5 = scalar_lea.vmem %s9618_s12, 128  ;;  %s9278_s18 = smov [#allocation5]  }
  0xa6   : > { %p8959_p13 = scmp.ne.s32.totalorder %s9618_s12, %s8958_s5  ;;  %s8963_s24 = sshll.u32 %s9278_s18, 4  ;;  %s8964_s24 = int_to_ptr.vmem [resolvable:$false] %s8963_s24 }
  0xa7   : > { %s8965_s2 = scalar_lea.vmem %s8964_s24, 256  ;;  %p8966_p6 = scmp.lt.s32.totalorder %s9618_s12, %s8964_s24 }
  0xa8   : > { %p8961_p5 = pnand %p8959_p13, %p9628_p2  ;;  %p8967_p8 = scmp.lt.s32.totalorder %s8965_s2, %s8958_s5 }
  0xaa   : > { %p8962_p4 = pneg %p8961_p5  ;;  %p8968_p9 = por %p8967_p8, %p8966_p6 }
  0xac   : > { %p8969_p11 = pnand %p8968_p9, %p8962_p4 }
  0xae   : > { %8972 = shalt.err (!%p8969_p11)
}
  0xaf   : > { %8689 = dma.hbm_to_vmem [thread:$0]  (!%p9606_p0), %s9615_s25, 128, %s9618_s12, %s9622_s14  }
  0xb0   : > { %s9279_s19 = smov [#allocation13]   ;;  %s9280_s29 = smov [#allocation16]  }
  0xb1   : > { %s747_s22 = sshll.u32 %s9279_s19, 4  ;;  %s779_s27 = sshll.u32 %s9280_s29, 4  ;;  %s748_s22 = int_to_ptr.vmem [resolvable:$true] %s747_s22  ;;  %s9652_s27 = int_to_ptr.vmem [resolvable:$true] %s779_s27 }
  0xb2   : > { %s11045_s16 = sld [smem:[#allocation52_spill]]  ;;  %p11046_p3 = scmp.ne.s32.totalorder %s11032_s10, 0 }
  0xb8   : > { %s8973_s5 = scalar_lea.hbm %s11045_s16, 1024 }
  0xb9   : > { %p8974_p1 = scmp.ne.s32.totalorder %s11045_s16, %s8973_s5  ;;  %p8980_p4 = scmp.lt.u32.totalorder %s8973_s5, %s11045_s16 }
  0xbb   : > { %p8976_p6 = pnand %p8974_p1, %p11046_p3 }
  0xbd   : > { %p8977_p8 = pneg %p8976_p6 }
  0xbf   : > { %p8982_p10 = pnand %p8980_p4, %p8977_p8 }
  0xc1   : > { %8985 = shalt.err (!%p8982_p10)
}
  0xc2   : > { %s8986_s25 = scalar_lea.vmem %s748_s22, 1024  ;;  %p8994_p5 = scmp.lt.s32.totalorder %s748_s22, %s748_s22 }
  0xc3   : > { %p8987_p7 = scmp.ne.s32.totalorder %s748_s22, %s8986_s25  ;;  %p8995_p9 = scmp.lt.s32.totalorder %s8986_s25, %s8986_s25 }
  0xc5   : > { %p8989_p12 = pnand %p8987_p7, %p11046_p3  ;;  %p8996_p11 = por %p8995_p9, %p8994_p5 }
  0xc7   : > { %p8990_p13 = pneg %p8989_p12 }
  0xc9   : > { %p8997_p0 = pnand %p8996_p11, %p8990_p13 }
  0xcb   : > { %9000 = shalt.err (!%p8997_p0)
}
  0xcc   : > { %p11047_p1 = scmp.ne.s32.totalorder %s11030_s1, 0  ;;  %s11048_s7 = smov 8  }
  0xcd   : > { %s11049_s19 = smov 128   ;;  %s9001_s5 = scalar_lea.hbm %s10931_s20, 1024 }
  0xce   : > { %8673 = dma.hbm_to_vmem [thread:$0]  (!%p11047_p1), %s11045_s16, 1024, %s748_s22, [#allocation12], %s11049_s19, %s11049_s19, %s11048_s7  }
  0xcf   : > { %p9002_p6 = scmp.ne.s32.totalorder %s10931_s20, %s9001_s5  ;;  %p9008_p4 = scmp.lt.u32.totalorder %s9001_s5, %s10931_s20 }
  0xd1   : > { %p9004_p0 = pnand %p9002_p6, %p11046_p3 }
  0xd3   : > { %p9005_p8 = pneg %p9004_p0 }
  0xd5   : > { %p9010_p10 = pnand %p9008_p4, %p9005_p8 }
  0xd7   : > { %9013 = shalt.err (!%p9010_p10)
}
  0xd8   : > { %s9014_s22 = scalar_lea.vmem %s9652_s27, 1024  ;;  %p9022_p5 = scmp.lt.s32.totalorder %s9652_s27, %s9652_s27 }
  0xd9   : > { %p9015_p7 = scmp.ne.s32.totalorder %s9652_s27, %s9014_s22  ;;  %p9023_p9 = scmp.lt.s32.totalorder %s9014_s22, %s9014_s22 }
  0xdb   : > { %p9017_p12 = pnand %p9015_p7, %p11046_p3  ;;  %p9024_p11 = por %p9023_p9, %p9022_p5 }
  0xdd   : > { %p9018_p13 = pneg %p9017_p12 }
  0xdf   : > { %p9025_p6 = pnand %p9024_p11, %p9018_p13 }
  0xe1   : > { %9028 = shalt.err (!%p9025_p6)
}
  0xe2   : > { %8679 = dma.hbm_to_vmem [thread:$0]  (!%p11047_p1), %s10931_s20, 1024, %s9652_s27, [#allocation15], %s11049_s19, %s11049_s19, %s11048_s7  }
  0xe3   : > { %s9281_s29 = smov [#allocation17]   ;;  %s11050_s2 = sld [smem:[#allocation36_spill]] }
  0xe4   : > { %s792_s18 = sshll.u32 %s9281_s29, 4  ;;  %s9029_s16 = scalar_lea.hbm %s10932_s21, 32  ;;  %s793_s18 = int_to_ptr.vmem [resolvable:$true] %s792_s18 }
  0xe5   : > { %p9030_p0 = scmp.ne.s32.totalorder %s10932_s21, %s9029_s16  ;;  %p9036_p10 = scmp.lt.u32.totalorder %s9029_s16, %s10932_s21 }
  0xe7   : > { %p9032_p8 = pnand %p9030_p0, %p11046_p3 }
  0xe9   : > { %s9705_s12 = scalar_lea.hbm %s11050_s2, %s9604_s3  ;;  %p9033_p4 = pneg %p9032_p8 }
  0xeb   : > { %p9038_p7 = pnand %p9036_p10, %p9033_p4 }
  0xed   : > { %9041 = shalt.err (!%p9038_p7)
}
  0xee   : > { %s9042_s19 = scalar_lea.vmem %s793_s18, 32  ;;  %p9050_p9 = scmp.lt.s32.totalorder %s793_s18, %s793_s18 }
  0xef   : > { %p9043_p12 = scmp.ne.s32.totalorder %s793_s18, %s9042_s19  ;;  %p9051_p11 = scmp.lt.s32.totalorder %s9042_s19, %s9042_s19 }
  0xf1   : > { %p9045_p13 = pnand %p9043_p12, %p11046_p3  ;;  %p9052_p6 = por %p9051_p11, %p9050_p9 }
  0xf3   : > { %p9046_p5 = pneg %p9045_p13 }
  0xf5   : > { %p9053_p2 = pnand %p9052_p6, %p9046_p5 }
  0xf7   : > { %9056 = shalt.err (!%p9053_p2)
}
  0xf8   : > { %s11051_s13 = smov 1   ;;  %s11052_s15 = smov 16  }
  0xf9   : > { %8682 = dma.hbm_to_vmem [thread:$0]  (!%p11047_p1), %s10932_s21, 32, %s793_s18, [#allocation18], %s11052_s15, %s11052_s15, %s11051_s13  }
  0xfa   : > { %s822_s10 = scalar_lea.vmem [#allocation2], %s9601_s23  ;;  %s11053_s24 = sld [smem:[#allocation38_spill]] }
  0xfb   : > { %s829_s26 = sshll.u32 %s822_s10, 4  ;;  %s11054_s25 = sand.u32 1, %s9265_s8   ;;  %s9729_s26 = int_to_ptr.vmem [resolvable:$true] %s829_s26 }
  0xfc   : > { %s819_s22 = scalar_lea.sflag [#allocation3], %s11054_s25  ;;  %s9057_s27 = scalar_lea.hbm %s9705_s12, 128 }
  0xfd   : > { %p9058_p2 = scmp.ne.s32.totalorder %s9705_s12, %s9057_s27  ;;  %p11055_p3 = scmp.ne.s32.totalorder %s11044_s6, 0 }
  0xfe   : > { %s9062_s18 = scalar_lea.hbm %s11050_s2, 256  ;;  %p9063_p1 = scmp.lt.u32.totalorder %s9705_s12, %s11050_s2 }
  0xff   : > { %p9060_p0 = pnand %p9058_p2, %p11055_p3  ;;  %p9064_p4 = scmp.lt.u32.totalorder %s9062_s18, %s9057_s27 }
 0x100   : > { %s9735_s5 = scalar_lea.hbm %s11053_s24, %s9604_s3  ;;  %p9066_p7 = scmp.lt.u32.totalorder %s9057_s27, %s9705_s12 }
 0x101   : > { %p9061_p8 = pneg %p9060_p0  ;;  %p9065_p10 = por %p9064_p4, %p9063_p1 }
 0x103   : > { %p9067_p12 = por %p9066_p7, %p9065_p10 }
 0x105   : > { %p9068_p13 = pnand %p9067_p12, %p9061_p8 }
 0x107   : > { %9071 = shalt.err (!%p9068_p13)
}
 0x108   : > { %s9072_s17 = scalar_lea.vmem %s9729_s26, 128  ;;  %s9282_s16 = smov [#allocation2]  }
 0x109   : > { %p9073_p5 = scmp.ne.s32.totalorder %s9729_s26, %s9072_s17  ;;  %s9077_s10 = sshll.u32 %s9282_s16, 4  ;;  %s9078_s10 = int_to_ptr.vmem [resolvable:$false] %s9077_s10 }
 0x10a   : > { %s9079_s1 = scalar_lea.vmem %s9078_s10, 256  ;;  %p9080_p6 = scmp.lt.s32.totalorder %s9729_s26, %s9078_s10 }
 0x10b   : > { %p9075_p9 = pnand %p9073_p5, %p11055_p3  ;;  %p9081_p2 = scmp.lt.s32.totalorder %s9079_s1, %s9072_s17 }
 0x10d   : > { %p9076_p11 = pneg %p9075_p9  ;;  %p9082_p0 = por %p9081_p2, %p9080_p6 }
 0x10f   : > { %p9083_p1 = pnand %p9082_p0, %p9076_p11 }
 0x111   : > { %9086 = shalt.err (!%p9083_p1)
}
 0x112   : > { %p11056_p8 = scmp.ne.s32.totalorder %s11042_s9, 0  ;;  %s858_s29 = scalar_lea.vmem [#allocation7], %s9601_s23 }
 0x113   : > { %s865_s25 = sshll.u32 %s858_s29, 4  ;;  %s11057_s19 = sld [smem:[#allocation39_spill]]  ;;  %s866_s25 = int_to_ptr.vmem [resolvable:$true] %s865_s25 }
 0x114   : > { %8686 = dma.hbm_to_vmem [thread:$0]  (!%p11056_p8), %s9705_s12, 128, %s9729_s26, %s819_s22  }
 0x115   : > { %s9087_s13 = scalar_lea.hbm %s9735_s5, 128  ;;  %s9092_s16 = scalar_lea.hbm %s11053_s24, 256 }
 0x116   : > { %p9088_p4 = scmp.ne.s32.totalorder %s9735_s5, %s9087_s13  ;;  %p9093_p12 = scmp.lt.u32.totalorder %s9735_s5, %s11053_s24 }
 0x117   : > { %p9094_p13 = scmp.lt.u32.totalorder %s9092_s16, %s9087_s13  ;;  %p9096_p9 = scmp.lt.u32.totalorder %s9087_s13, %s9735_s5 }
 0x118   : > { %p9090_p10 = pnand %p9088_p4, %p11055_p3 }
 0x119   : > { %s9765_s18 = scalar_lea.hbm %s11057_s19, %s9604_s3  ;;  %p9095_p5 = por %p9094_p13, %p9093_p12 }
 0x11a   : > { %p9091_p7 = pneg %p9090_p10 }
 0x11b   : > { %p9097_p11 = por %p9096_p9, %p9095_p5 }
 0x11d   : > { %p9098_p6 = pnand %p9097_p11, %p9091_p7 }
 0x11f   : > { %9101 = shalt.err (!%p9098_p6)
}
 0x120   : > { %s9102_s3 = scalar_lea.vmem %s866_s25, 128  ;;  %s9283_s12 = smov [#allocation7]  }
 0x121   : > { %p9103_p2 = scmp.ne.s32.totalorder %s866_s25, %s9102_s3  ;;  %s9107_s26 = sshll.u32 %s9283_s12, 4  ;;  %s9108_s26 = int_to_ptr.vmem [resolvable:$false] %s9107_s26 }
 0x122   : > { %s9109_s22 = scalar_lea.vmem %s9108_s26, 256  ;;  %p9110_p4 = scmp.lt.s32.totalorder %s866_s25, %s9108_s26 }
 0x123   : > { %p9105_p0 = pnand %p9103_p2, %p11055_p3  ;;  %p9111_p10 = scmp.lt.s32.totalorder %s9109_s22, %s9102_s3 }
 0x125   : > { %p9106_p1 = pneg %p9105_p0  ;;  %p9112_p8 = por %p9111_p10, %p9110_p4 }
 0x127   : > { %p9113_p12 = pnand %p9112_p8, %p9106_p1 }
 0x129   : > { %9116 = shalt.err (!%p9113_p12)
}
 0x12a   : > { %p11058_p13 = scmp.ne.s32.totalorder %s11042_s9, 0  ;;  %s876_s29 = scalar_lea.vmem [#allocation8], %s9601_s23 }
 0x12b   : > { %s883_s27 = sshll.u32 %s876_s29, 4  ;;  %s11059_s7 = sand.u32 1, %s9269_s30   ;;  %s884_s27 = int_to_ptr.vmem [resolvable:$true] %s883_s27 }
 0x12c   : > { %8692 = dma.hbm_to_vmem [thread:$0]  (!%p11058_p13), %s9735_s5, 128, %s866_s25, %s9622_s14  }
 0x12d   : > { %s873_s13 = scalar_lea.sflag [#allocation9], %s11059_s7  ;;  %s9117_s15 = scalar_lea.hbm %s9765_s18, 128 }
 0x12e   : > { %p9118_p8 = scmp.ne.s32.totalorder %s9765_s18, %s9117_s15  ;;  %s9122_s10 = scalar_lea.hbm %s11057_s19, 256 }
 0x12f   : > { %p9123_p9 = scmp.lt.u32.totalorder %s9765_s18, %s11057_s19  ;;  %p9124_p11 = scmp.lt.u32.totalorder %s9122_s10, %s9117_s15 }
 0x130   : > { %p9120_p7 = pnand %p9118_p8, %p11055_p3  ;;  %p9126_p2 = scmp.lt.u32.totalorder %s9117_s15, %s9765_s18 }
 0x131   : > { %p9125_p6 = por %p9124_p11, %p9123_p9 }
 0x132   : > { %p9121_p5 = pneg %p9120_p7 }
 0x133   : > { %p9127_p0 = por %p9126_p2, %p9125_p6 }
 0x135   : > { %p9128_p1 = pnand %p9127_p0, %p9121_p5 }
 0x137   : > { %9131 = shalt.err (!%p9128_p1)
}
 0x138   : > { %s9132_s14 = scalar_lea.vmem %s884_s27, 128  ;;  %s9284_s23 = smov [#allocation8]  }
 0x139   : > { %p9133_p4 = scmp.ne.s32.totalorder %s884_s27, %s9132_s14  ;;  %s9137_s5 = sshll.u32 %s9284_s23, 4  ;;  %s9138_s5 = int_to_ptr.vmem [resolvable:$false] %s9137_s5 }
 0x13a   : > { %s9139_s25 = scalar_lea.vmem %s9138_s5, 256  ;;  %p9140_p8 = scmp.lt.s32.totalorder %s884_s27, %s9138_s5 }
 0x13b   : > { %p9135_p10 = pnand %p9133_p4, %p11055_p3  ;;  %p9141_p7 = scmp.lt.s32.totalorder %s9139_s25, %s9132_s14 }
 0x13d   : > { %p9136_p12 = pneg %p9135_p10  ;;  %p9142_p13 = por %p9141_p7, %p9140_p8 }
 0x13f   : > { %p9143_p9 = pnand %p9142_p13, %p9136_p12 }
 0x141   : > { %9146 = shalt.err (!%p9143_p9)
}
 0x142   : > { %p11060_p11 = scmp.ne.s32.totalorder %s11042_s9, 0  ;;  %p11061_p5 = scmp.ne.s32.totalorder %s11029_s0, 0 }
 0x143   : > { %s9808_s6 = sand.u32 (!%p11061_p5), 1, %s9261_s4   ;;  %p11062_p3 = scmp.ne.s32.totalorder (!%p11061_p5), %s11037_s11, 0 }
 0x144   : > { %8695 = dma.hbm_to_vmem [thread:$0]  (!%p11060_p11), %s9765_s18, 128, %s884_s27, %s873_s13  }
 0x145   : > { %892 = sbr.rel (%p11061_p5) target bundleno = 5495 (0x1577), region = 124  ;;  %s9811_s12 = sshll.u32 (!%p11061_p5), %s9808_s6, 3 }
 0x146   : > { %s895_s26 = scalar_lea.sflag (!%p11061_p5), [#allocation3], %s9808_s6  ;;  %s10988_s22 = scalar_lea.vmem (!%p11061_p5), [#allocation2], %s9811_s12 }
 0x14c   : > { %9220 = dma.done.wait (%p11062_p3), %s895_s26, 128  }
 0x14d   : > { %9222 = vsyncadd (%p11062_p3), %s895_s26, 4294967168  ;;  %s903_s0 = sand.u32 1, %s9459_s28   ;;  %s907_s18 = scalar_lea.vmem [#allocation5], %s9811_s12 }
 0x14e   : > { %s904_s9 = scalar_lea.sflag [#allocation6], %s903_s0 }
 0x14f   : > { %9224 = dma.done.wait (%p11062_p3), %s904_s9, 256  }
 0x150   : > { %9226 = vsyncadd (%p11062_p3), %s904_s9, 4294967040  ;;  %s922_s27 = scalar_lea.sflag [#allocation9], %s903_s0  ;;  %s925_s7 = scalar_lea.vmem [#allocation8], %s9811_s12 }
 0x151   : > { %9228 = dma.done.wait (%p11062_p3), %s922_s27, 128  }
 0x152   : > { %9230 = vsyncadd (%p11062_p3), %s922_s27, 4294967168  ;;  %p11063_p13 = scmp.eq.s32.totalorder %s9459_s28, 0 }
 0x154   : > { %9232 = dma.done.wait (%p11063_p13), [#allocation9], 1024   ;;  %p11064_p6 = pmov %p11063_p13 }
 0x156   : > { %9234 = vsyncadd (%p11064_p6), [#allocation9], 4294966272  ;;  %p11065_p2 = pmov %p11064_p6 }
 0x158   : > { %9236 = dma.done.wait (%p11065_p2), [#allocation12], 2048   ;;  %p11066_p0 = pmov %p11065_p2 }
 0x15a   : > { %9238 = vsyncadd (%p11066_p0), [#allocation12], 4294965248  ;;  %p11067_p1 = pmov %p11066_p0 }
 0x15b   : > { %p11068_p4 = pmov %p11066_p0 }
 0x15c   : > { %9240 = dma.done.wait (%p11067_p1), [#allocation15], 1056  }
 0x15d   : > { %9242 = vsyncadd (%p11068_p4), [#allocation15], 4294966240  ;;  %p11069_p10 = pmov %p11066_p0 }
 0x15e   : > { %p11070_p12 = pmov %p11066_p0 }
 0x15f   : > { %9244 = dma.done.wait (%p11069_p10), [#allocation18], 32  }
 0x160   : > { %9246 = vsyncadd (%p11070_p12), [#allocation18], 4294967264  ;;  %v9285_v0 = vmov 0.0|0.0   ;;  %vm9286_vm0 = vmmov 0   ;;  %v9287_v1 = vmov 0.0   ;;  %s11071_s15 = sld [smem:[#allocation40_spill]]  ;;  %v1309_v33 = vlaneseq }
 0x161   : > { %8520 = vmatprep.subr.bf16.mxu1 %v9285_v0  ;;  %8176 = vmatprep.mubr.msk.f32.mxu1 %vm9286_vm0, %v9287_v1  ;;  %s11072_s25 = sld [smem:[#allocation42_spill]]  ;;  %v9874_v10 = vld [vmem:[%s10988_s22] sm:$0xff]  ;;  %vm1067_vm1 = vcmask 261120   ;;  %s11073_s10 = sld [smem:[#allocation41_spill]]  ;;  %v9291_v31 = vmov 1983009808  }
 0x162   : > { %8532 = vmatprep.subr.bf16.mxu0 %v9285_v0  ;;  %8198 = vmatprep.mubr.msk.f32.mxu0 %vm9286_vm0, %v9287_v1  ;;  %s9288_s1 = smov 120   ;;  %s11074_s23 = sld [smem:[#allocation44_spill]]  ;;  %v1307_v32 = vunpack.c.l.s4 %v9291_v31  ;;  %v9292_v34 = vmov 1934713408   ;;  %v1310_v37 = vshrl.u32 %v1309_v33, 7  ;;  %vm1732_vm2 = vcmask 64512  }
 0x163   : > { %s11075_s27 = sld [smem:[#allocation43_spill]]  ;;  %s9289_s3 = smov 104   ;;  %v1339_v35 = vunpack.c.l.s4 %v9292_v34  ;;  %vm2528_vm4 = vcmask 130048   ;;  %vm2530_vm5 = vcmask 195584   ;;  %vm7239_vm14 = vcmask 523264  }
 0x164   : > { %s9290_s14 = smov 112   ;;  %v1308_v36 = vunpack.c.0.s8 %v1307_v32  ;;  %s11076_s26 = sld [smem:[#allocation45_spill]] }
 0x165   : > { %v1340_v40 = vunpack.c.0.s8 %v1339_v35  ;;  %s9293_s11 = smov 8   ;;  %s9294_s13 = smov 16  }
 0x166   : > { %v1044_v2 = vld [vmem:[%s11071_s15] sm:$0xff]  ;;  %v1045_v3 = vld [vmem:[%s11071_s15 + $0x8] sm:$0xff]  ;;  %v1046_v4 = vld [vmem:[%s11071_s15 + $0x10] sm:$0xff]  ;;  %v9928_v41 = vsub.s32 %v1308_v36, %v1310_v37  ;;  %s10989_s17 = smov 24   ;;  %s11077_s0 = sld [smem:[#allocation46_spill]] }
 0x167   : > { %v8521_v5 = vpack.c.bf16 %v1045_v3, %v1044_v2  ;;  %v1047_v6 = vld [vmem:[%s11071_s15 + $0x18] sm:$0xff]  ;;  %v1049_v8 = vld [vmem:[%s11072_s25] sm:$0xff]  ;;  %v1050_v9 = vld [vmem:[%s11072_s25 + $0x8] sm:$0xff]  ;;  %v9930_v48 = vsub.s32 %v1340_v40, %v1310_v37  ;;  %s11080_s16 = sld [smem:[#allocation49_spill]]  ;;  %s11081_s22 = sld [smem:[#allocation51_spill]] }
 0x168   : > { %v8524_v7 = vpack.c.bf16 %v1047_v6, %v1046_v4  ;;  %v8527_v11 = vpack.c.bf16 %v1050_v9, %v1049_v8  ;;  %v1051_v12 = vld [vmem:[%s11072_s25 + $0x10] sm:$0xff]  ;;  %v1052_v13 = vld [vmem:[%s11072_s25 + $0x18] sm:$0xff]  ;;  %v7854_v15 = vld [vmem:[%s11073_s10] ss:$0 sm:$0xff]  ;;  %s11082_s9 = sld [smem:[#allocation53_spill]]  ;;  %s11083_s29 = scalar_lea.vmem [#allocation2], %s9811_s12 }
 0x169   : > { %8522 = vmatpush3.bf16.msra.mxu1 %v8521_v5  ;;  %v8530_v14 = vpack.c.bf16 %v1052_v13, %v1051_v12  ;;  %v1054_v20 = vld [vmem:[%s11074_s23] sm:$0xff]  ;;  %v1055_v21 = vld [vmem:[%s11074_s23 + $0x8] sm:$0xff]  ;;  %v1056_v27 = vld [vmem:[%s11074_s23 + $0x10] sm:$0xff]  ;;  %s11092_s2 = sld [smem:[#allocation59_spill]] }
 0x16a   : > { %8523 = vmatprep.subr.bf16.mxu1 %v9285_v0  ;;  %v7856_v22 = vld [vmem:[%s11075_s27] ss:$0 sm:$0xff]  ;;  %v8533_v23 = vpack.c.bf16 %v1055_v21, %v1054_v20  ;;  %v1057_v28 = vld [vmem:[%s11074_s23 + $0x18] sm:$0xff] }
 0x16b   : > { %v8536_v29 = vpack.c.bf16 %v1057_v28, %v1056_v27 }
 0x16c   : > { %8534 = vmatpush3.bf16.msra.mxu0 %v8533_v23 }
 0x16d   : > { %8525 = vmatpush3.bf16.msra.mxu1 %v8524_v7  ;;  %8535 = vmatprep.subr.bf16.mxu0 %v9285_v0 }
 0x16e   : > { %8526 = vmatprep.subr.bf16.mxu1 %v9285_v0 }
 0x170   : > { %8177 = vmatmul.mubr.msk.f32.vlgmr.msra.gmra.mrb[0].mxu1 %vm1067_vm1, %v9874_v10  ;;  %8537 = vmatpush3.bf16.msra.mxu0 %v8536_v29 }
 0x171   : > { %8528 = vmatpush3.bf16.msra.mxu1 %v8527_v11  ;;  %8187 = vmatprep.mubr.msk.f32.mxu1 %vm9286_vm0, %v9287_v1 }
 0x172   : > { %8529 = vmatprep.subr.bf16.mxu1 %v9285_v0  ;;  %8211 = vmatprep.subr.mxu0 %v9287_v1 }
 0x173   : > { %8199 = vmatmul.mubr.msk.f32.vlgmr.msra.gmra.mrb[0].mxu0 %vm1067_vm1, %v9874_v10 }
 0x174   : > { %8213 = vmatprep.mubr.msk.f32.mxu0 %vm9286_vm0, %v9287_v1 }
 0x175   : > { %8531 = vmatpush3.bf16.msra.mxu1 %v8530_v14 }
 0x176   : > { %8201 = vmatprep.subr.mxu1 %v9287_v1 }
 0x178   : > { %8188 = vmatmul.mubr.msk.f32.vlgmr.msra.gmra.mrb[2].mxu1 %vm1067_vm1, %v9874_v10 }
 0x179   : > { %8203 = vmatprep.mubr.msk.f32.mxu1 %vm9286_vm0, %v9287_v1 }
 0x243   : > { %v1137_v16 = vpop.f32.mrb[0].mxu1 }
 0x244   : > { %v1138_v17 = vadd.f32 %v7854_v15, %v1137_v16  ;;  %v8178_v18 = vpop.f32.mrb[1].mxu1 }
 0x246   : > { %v9896_v19 = vmul.f32 0.35355338, %v1138_v17 }
 0x248   : > { %1295 = vrot.lane.b32.xlu1 %v9896_v19, %s9288_s1 }
 0x24b   : > { %v1214_v24 = vpop.f32.mrb[2].mxu1 }
 0x24c   : > { %v1215_v25 = vadd.f32 %v7856_v22, %v1214_v24  ;;  %v8189_v26 = vpop.f32.mrb[3].mxu1 }
 0x24e   : > { %1447 = vrot.lane.b32.xlu1 %v1215_v25, %s9289_s3  ;;  %1441 = vrot.lane.b32.xlu0 %v1215_v25, %s9288_s1 }
 0x252   : > { %1301 = vrot.lane.b32.xlu1 %v9896_v19, %s9289_s3  ;;  %1444 = vrot.lane.b32.xlu0 %v1215_v25, %s9290_s14 }
 0x256   : > { %1298 = vrot.lane.b32.xlu0 %v9896_v19, %s9290_s14 }
 0x2ba   : > { %v1296_v30 = vpop.permute.xlu1 %1295 }
 0x2c0   : > { %v1448_v38 = vpop.permute.xlu1 %1447  ;;  %v1442_v39 = vpop.permute.xlu0 %1441 }
 0x2c1   : > { %v1466_v42 = vcombine.low %v1442_v39, %v1448_v38  ;;  %v1467_v43 = vcombine.high %v1442_v39, %v1448_v38 }
 0x2c3   : > { %v1474_v49 = vrot.slane %v1466_v42, %v9928_v41  ;;  %v1481_v50 = vrot.slane %v1467_v43, %v9928_v41 }
 0x2c4   : > { %v1445_v44 = vpop.permute.xlu0 %1444  ;;  %v1302_v45 = vpop.permute.xlu1 %1301 }
 0x2c5   : > { %v1450_v46 = vcombine.low %v1215_v25, %v1445_v44  ;;  %v1451_v47 = vcombine.high %v1215_v25, %v1445_v44  ;;  %v1320_v53 = vcombine.low %v1296_v30, %v1302_v45  ;;  %v1321_v54 = vcombine.high %v1296_v30, %v1302_v45 }
 0x2c7   : > { %v1458_v51 = vrot.slane %v1450_v46, %v9928_v41  ;;  %v1465_v52 = vrot.slane %v1451_v47, %v9928_v41  ;;  %v1328_v4 = vrot.slane %v1320_v53, %v9928_v41  ;;  %v1335_v5 = vrot.slane %v1321_v54, %v9928_v41 }
 0x2c8   : > { %v1299_v55 = vpop.permute.xlu0 %1298 }
 0x2c9   : > { %v1482_v56 = vcombine.low %v1458_v51, %v1474_v49  ;;  %v1483_v57 = vcombine.high %v1458_v51, %v1474_v49  ;;  %v1498_v58 = vcombine.low %v1465_v52, %v1481_v50  ;;  %v1499_v59 = vcombine.high %v1465_v52, %v1481_v50 }
 0x2ca   : > { %v1304_v60 = vcombine.low %v9896_v19, %v1299_v55  ;;  %v1305_v61 = vcombine.high %v9896_v19, %v1299_v55 }
 0x2cb   : > { %v1490_v62 = vrot.slane %v1482_v56, %v9930_v48  ;;  %v1497_v63 = vrot.slane %v1483_v57, %v9930_v48  ;;  %v1506_v2 = vrot.slane %v1498_v58, %v9930_v48  ;;  %v1513_v3 = vrot.slane %v1499_v59, %v9930_v48  ;;  %v1290_v59 = vpop.f32.mrb[0].mxu0 }
 0x2cc   : > { %v1312_v6 = vrot.slane %v1304_v60, %v9928_v41  ;;  %v1319_v7 = vrot.slane %v1305_v61, %v9928_v41  ;;  %v8200_v60 = vpop.f32.mrb[1].mxu0  ;;  %v9988_v61 = vld [vmem:[%s925_s7] sm:$0xff]  ;;  %s11078_s7 = sld [smem:[#allocation47_spill]] }
 0x2cd   : > { %v1518_v8 = vcombine.low %v1490_v62, %v1497_v63  ;;  %v7862_v9 = vcombine.high %v1490_v62, %v1497_v63  ;;  %v1534_v11 = vcombine.low %v1506_v2, %v1513_v3  ;;  %v7863_v12 = vcombine.high %v1506_v2, %v1513_v3 }
 0x2ce   : > { %v1336_v13 = vcombine.low %v1312_v6, %v1328_v4  ;;  %v1337_v14 = vcombine.high %v1312_v6, %v1328_v4  ;;  %v1352_v15 = vcombine.low %v1319_v7, %v1335_v5  ;;  %v1353_v16 = vcombine.high %v1319_v7, %v1335_v5 }
 0x2cf   : > { %v1525_v17 = vrot.slane %v1518_v8, %v9928_v41  ;;  %v1533_v18 = vrot.slane %v7862_v9, %v9928_v41  ;;  %v1541_v19 = vrot.slane %v1534_v11, %v9928_v41  ;;  %v1549_v20 = vrot.slane %v7863_v12, %v9928_v41 }
 0x2d0   : > { %v1344_v21 = vrot.slane %v1336_v13, %v9930_v48  ;;  %v1351_v22 = vrot.slane %v1337_v14, %v9930_v48  ;;  %v1360_v23 = vrot.slane %v1352_v15, %v9930_v48  ;;  %v1367_v24 = vrot.slane %v1353_v16, %v9930_v48 }
 0x2d1   : > { %v1550_v25 = vcombine.low %v1525_v17, %v1533_v18  ;;  %v1551_v26 = vcombine.high %v1525_v17, %v1533_v18  ;;  %v1566_v27 = vcombine.low %v1541_v19, %v1549_v20  ;;  %v1567_v28 = vcombine.high %v1541_v19, %v1549_v20  ;;  %v7858_v17 = vld [vmem:[%s11076_s26] ss:$0 sm:$0xff] }
 0x2d2   : > { %v1372_v29 = vcombine.low %v1344_v21, %v1351_v22  ;;  %v7860_v30 = vcombine.high %v1344_v21, %v1351_v22  ;;  %v1388_v31 = vcombine.low %v1360_v23, %v1367_v24  ;;  %v7861_v32 = vcombine.high %v1360_v23, %v1367_v24  ;;  %s11079_s5 = smov %s11078_s7 }
 0x2d3   : > { %v1558_v33 = vrot.slane %v1550_v25, %v9930_v48  ;;  %v1574_v34 = vrot.slane %v1566_v27, %v9930_v48  ;;  %v1565_v35 = vrot.slane %v1551_v26, %v9930_v48  ;;  %v1581_v36 = vrot.slane %v1567_v28, %v9930_v48 }
 0x2d4   : > { %v1379_v37 = vrot.slane %v1372_v29, %v9928_v41  ;;  %v1387_v38 = vrot.slane %v7860_v30, %v9928_v41  ;;  %v1395_v39 = vrot.slane %v1388_v31, %v9928_v41  ;;  %v1403_v40 = vrot.slane %v7861_v32, %v9928_v41 }
 0x2d5   : > { %v1582_v42 = vcombine.low %v1558_v33, %v1574_v34  ;;  %v1584_v43 = vcombine.low %v1565_v35, %v1581_v36  ;;  %v1583_v55 = vcombine.high %v1558_v33, %v1574_v34  ;;  %v1585_v57 = vcombine.high %v1565_v35, %v1581_v36 }
 0x2d6   : > { %v1404_v44 = vcombine.low %v1379_v37, %v1387_v38  ;;  %v1405_v45 = vcombine.high %v1379_v37, %v1387_v38  ;;  %v1420_v46 = vcombine.low %v1395_v39, %v1403_v40  ;;  %v1421_v47 = vcombine.high %v1395_v39, %v1403_v40 }
 0x2d7   : > { %8202 = vmatpush3.xpose.msk.msra.mxu1 %vm1732_vm2, %v1582_v42  ;;  %8212 = vmatpush3.xpose.msk.msra.mxu0 %vm1732_vm2, %v1584_v43  ;;  %vm1043_vm3 = vcmp.ne.f32.partialorder %v9988_v61, 0.0  ;;  %v1291_v18 = vadd.f32 %v7858_v17, %v1290_v59 }
 0x2d8   : > { %8206 = vmatprep.subr.mxu1 %v9287_v1  ;;  %v1412_v49 = vrot.slane %v1404_v44, %v9930_v48  ;;  %v1428_v50 = vrot.slane %v1420_v46, %v9930_v48  ;;  %v1419_v51 = vrot.slane %v1405_v45, %v9930_v48  ;;  %v1435_v52 = vrot.slane %v1421_v47, %v9930_v48 }
 0x2d9   : > { %8221 = vmatprep.subr.mxu0 %v9287_v1 }
 0x2da   : > { %v1436_v53 = vcombine.low %v1412_v49, %v1428_v50  ;;  %v1438_v54 = vcombine.low %v1419_v51, %v1435_v52  ;;  %v1437_v56 = vcombine.high %v1412_v49, %v1428_v50  ;;  %v1439_v58 = vcombine.high %v1419_v51, %v1435_v52 }
 0x2dc   : > { %8204 = vmatmul.mubr.msk.f32.vlgmr.msra.gmra.mrb[4].mxu1 %vm1732_vm2, %v1436_v53  ;;  %8214 = vmatmul.mubr.msk.f32.vlgmr.msra.gmra.mrb[2].mxu0 %vm1732_vm2, %v1438_v54 }
 0x2dd   : > { %8207 = vmatpush3.xpose.msk.msra.mxu1 %vm1732_vm2, %v1583_v55  ;;  %8208 = vmatprep.mubr.msk.f32.mxu1 %vm9286_vm0, %v9287_v1 }
 0x2de   : > { %8216 = vmatprep.subr.mxu1 %v9287_v1  ;;  %8223 = vmatprep.mubr.msk.f32.mxu0 %vm9286_vm0, %v9287_v1 }
 0x2e0   : > { %8209 = vmatmul.mubr.msk.f32.vlgmr.msra.gmra.mrb[6].mxu1 %vm1732_vm2, %v1437_v56 }
 0x2e1   : > { %8217 = vmatpush3.xpose.msk.msra.mxu1 %vm1732_vm2, %v1585_v57  ;;  %8218 = vmatprep.mubr.msk.f32.mxu1 %vm9286_vm0, %v9287_v1 }
 0x2e2   : > { %8226 = vmatprep.subr.mxu1 %v9287_v1 }
 0x2e4   : > { %8219 = vmatmul.mubr.msk.f32.vlgmr.msra.gmra.mrb[8].mxu1 %vm1732_vm2, %v1439_v58 }
 0x2e5   : > { %8228 = vmatprep.mubr.msk.f32.mxu1 %vm9286_vm0, %v9287_v1 }
 0x3af   : > { %v1805_v62 = vpop.f32.mrb[4].mxu1  ;;  %v1957_v63 = vpop.f32.mrb[2].mxu0 }
 0x3b0   : > { %v2039_v2 = vsel %vm1043_vm3, %v1805_v62, -1e+09  ;;  %v8205_v3 = vpop.f32.mrb[5].mxu1  ;;  %v8215_v4 = vpop.f32.mrb[3].mxu0  ;;  %v2041_v15 = vsel %vm1043_vm3, %v1957_v63, -1e+09 }
 0x3b1   : > { %v2043_v5 = vsel %vm1732_vm2, %v2039_v2, -inf  ;;  %v2049_v16 = vsel %vm1732_vm2, %v2041_v15, -inf }
 0x3b2   : > { %2044 = vmax.xlane.f32.xlu1 %v2043_v5 }
 0x3b3   : > { %v1881_v6 = vpop.f32.mrb[6].mxu1 }
 0x3b4   : > { %v2040_v7 = vsel %vm1043_vm3, %v1881_v6, -1e+09  ;;  %v8210_v8 = vpop.f32.mrb[7].mxu1 }
 0x3b5   : > { %v2046_v9 = vsel %vm1732_vm2, %v2040_v7, -inf }
 0x3b6   : > { %2047 = vmax.xlane.f32.xlu0 %v2046_v9 }
 0x3b7   : > { %v2033_v11 = vpop.f32.mrb[8].mxu1 }
 0x3b8   : > { %v2042_v12 = vsel %vm1043_vm3, %v2033_v11, -1e+09  ;;  %v8220_v13 = vpop.f32.mrb[9].mxu1 }
 0x3b9   : > { %v2052_v14 = vsel %vm1732_vm2, %v2042_v12, -inf }
 0x3ba   : > { %2053 = vmax.xlane.f32.xlu0 %v2052_v14 }
 0x3be   : > { %2050 = vmax.xlane.f32.xlu0 %v2049_v16 }
 0x3c3   : > { %1587 = vrot.lane.b32.xlu1 %v1291_v18, %s9288_s1 }
 0x43f   : > { %v2045_v19 = vpop.xlane.xlu1 %2044 }
 0x440   : > { %v2055_v20 = vsub.f32 %v2039_v2, %v2045_v19 }
 0x442   : > { %v2059_v21 = vmul.f32 1.442695, %v2055_v20 }
 0x443   : > { %v2048_v22 = vpop.xlane.xlu0 %2047  ;;  %v1588_v39 = vpop.permute.xlu1 %1587 }
 0x444   : > { %8770 = vpow2.f32 %v2059_v21  ;;  %v2056_v23 = vsub.f32 %v2040_v7, %v2048_v22 }
 0x446   : > { %v2061_v24 = vmul.f32 1.442695, %v2056_v23 }
 0x447   : > { %v2054_v25 = vpop.xlane.xlu0 %2053 }
 0x448   : > { %8772 = vpow2.f32 %v2061_v24  ;;  %v2058_v26 = vsub.f32 %v2042_v12, %v2054_v25 }
 0x44a   : > { %v2065_v27 = vmul.f32 1.442695, %v2058_v26 }
 0x44b   : > { %v2051_v28 = vpop.xlane.xlu0 %2050 }
 0x44c   : > { %8774 = vpow2.f32 %v2065_v27  ;;  %v2057_v29 = vsub.f32 %v2041_v15, %v2051_v28  ;;  %v7882_v27 = vld [vmem:[%s11071_s15 + $0x20] sm:$0xff]  ;;  %v7883_v28 = vld [vmem:[%s11071_s15 + $0x28] sm:$0xff] }
 0x44e   : > { %v10007_v30 = vpop.eup %8770  ;;  %v2063_v31 = vmul.f32 1.442695, %v2057_v29  ;;  %v7887_v29 = vld [vmem:[%s11072_s25 + $0x20] sm:$0xff] }
 0x44f   : > { %v2067_v32 = vsel %vm1732_vm2, %v10007_v30, 0.0 }
 0x450   : > { %8776 = vpow2.f32 %v2063_v31  ;;  %2068 = vadd.xlane.f32.xlu0 %v2067_v32  ;;  %v7888_v31 = vld [vmem:[%s11072_s25 + $0x28] sm:$0xff] }
 0x452   : > { %v8773_v33 = vpop.eup %8772 }
 0x453   : > { %v2070_v34 = vsel %vm1732_vm2, %v8773_v33, 0.0 }
 0x454   : > { %2071 = vadd.xlane.f32.xlu1 %v2070_v34  ;;  %v8539_v34 = vpack.c.bf16 %v7883_v28, %v7882_v27 }
 0x456   : > { %v10012_v35 = vpop.eup %8774 }
 0x457   : > { %v2076_v36 = vsel %vm1732_vm2, %v10012_v35, 0.0 }
 0x458   : > { %2077 = vadd.xlane.f32.xlu1 %v2076_v36  ;;  %v8545_v36 = vpack.c.bf16 %v7888_v31, %v7887_v29 }
 0x45a   : > { %v10016_v37 = vpop.eup %8776 }
 0x45b   : > { %v2073_v38 = vsel %vm1732_vm2, %v10016_v37, 0.0 }
 0x45c   : > { %2074 = vadd.xlane.f32.xlu0 %v2073_v38  ;;  %v7884_v38 = vld [vmem:[%s11071_s15 + $0x30] sm:$0xff] }
 0x469   : > { %1593 = vrot.lane.b32.xlu1 %v1291_v18, %s9289_s3 }
 0x472   : > { %1590 = vrot.lane.b32.xlu0 %v1291_v18, %s9290_s14 }
 0x4dd   : > { %v2069_v42 = vpop.xlane.xlu0 %2068 }
 0x4de   : > { %8778 = vrcp.f32 %v2069_v42  ;;  %v7885_v42 = vld [vmem:[%s11071_s15 + $0x38] sm:$0xff] }
 0x4e1   : > { %v2072_v40 = vpop.xlane.xlu1 %2071 }
 0x4e2   : > { %8780 = vrcp.f32 %v2072_v40 }
 0x4e5   : > { %v2078_v43 = vpop.xlane.xlu1 %2077 }
 0x4e6   : > { %8782 = vrcp.f32 %v2078_v43  ;;  %v7889_v43 = vld [vmem:[%s11072_s25 + $0x30] sm:$0xff] }
 0x4e8   : > { %v8779_v12 = vpop.eup %8778 }
 0x4e9   : > { %v1594_v44 = vpop.permute.xlu1 %1593  ;;  %v2075_v45 = vpop.xlane.xlu0 %2074  ;;  %v2083_v25 = vmul.f32 %v8779_v12, %v10007_v30  ;;  %v7901_v12 = vld [vmem:[%s11075_s27 + $0x1] ss:$0 sm:$0xff] }
 0x4ea   : > { %v1612_v46 = vcombine.low %v1588_v39, %v1594_v44  ;;  %v1613_v47 = vcombine.high %v1588_v39, %v1594_v44  ;;  %8784 = vrcp.f32 %v2075_v45  ;;  %v10085_v45 = vld [vmem:[%s907_s18] sm:$0xff]  ;;  %s11088_s18 = sld [smem:[#allocation57_spill]] }
 0x4ec   : > { %v1620_v52 = vrot.slane %v1612_v46, %v9928_v41  ;;  %v1627_v53 = vrot.slane %v1613_v47, %v9928_v41  ;;  %v8781_v17 = vpop.eup %8780 }
 0x4ed   : > { %v1591_v49 = vpop.permute.xlu0 %1590  ;;  %v2084_v26 = vmul.f32 %v8781_v17, %v8773_v33 }
 0x4ee   : > { %v1596_v50 = vcombine.low %v1291_v18, %v1591_v49  ;;  %v1597_v51 = vcombine.high %v1291_v18, %v1591_v49 }
 0x4f0   : > { %v1604_v54 = vrot.slane %v1596_v50, %v9928_v41  ;;  %v1611_v55 = vrot.slane %v1597_v51, %v9928_v41  ;;  %v8783_v24 = vpop.eup %8782 }
 0x4f1   : > { %v2086_v39 = vmul.f32 %v8783_v24, %v10012_v35  ;;  %v7890_v35 = vld [vmem:[%s11072_s25 + $0x38] sm:$0xff] }
 0x4f2   : > { %v1628_v56 = vcombine.low %v1604_v54, %v1620_v52  ;;  %v1629_v57 = vcombine.high %v1604_v54, %v1620_v52  ;;  %v1644_v58 = vcombine.low %v1611_v55, %v1627_v53  ;;  %v1645_v59 = vcombine.high %v1611_v55, %v1627_v53 }
 0x4f3   : > { %v8548_v44 = vpack.c.bf16 %v7890_v35, %v7889_v43 }
 0x4f4   : > { %v1636_v60 = vrot.slane %v1628_v56, %v9930_v48  ;;  %v1643_v62 = vrot.slane %v1629_v57, %v9930_v48  ;;  %v1652_v63 = vrot.slane %v1644_v58, %v9930_v48  ;;  %v1659_v2 = vrot.slane %v1645_v59, %v9930_v48  ;;  %v8785_v30 = vpop.eup %8784 }
 0x4f5   : > { %v2085_v40 = vmul.f32 %v8785_v30, %v10016_v37  ;;  %v8542_v37 = vpack.c.bf16 %v7885_v42, %v7884_v38 }
 0x4f6   : > { %v1664_v3 = vcombine.low %v1636_v60, %v1643_v62  ;;  %v7864_v4 = vcombine.high %v1636_v60, %v1643_v62  ;;  %v1680_v5 = vcombine.low %v1652_v63, %v1659_v2  ;;  %v7865_v6 = vcombine.high %v1652_v63, %v1659_v2 }
 0x4f8   : > { %v1671_v7 = vrot.slane %v1664_v3, %v9928_v41  ;;  %v1679_v8 = vrot.slane %v7864_v4, %v9928_v41  ;;  %v1687_v9 = vrot.slane %v1680_v5, %v9928_v41  ;;  %v1695_v11 = vrot.slane %v7865_v6, %v9928_v41 }
 0x4fa   : > { %v1696_v13 = vcombine.low %v1671_v7, %v1679_v8  ;;  %v1712_v14 = vcombine.low %v1687_v9, %v1695_v11  ;;  %v1697_v15 = vcombine.high %v1671_v7, %v1679_v8  ;;  %v1713_v16 = vcombine.high %v1687_v9, %v1695_v11  ;;  %v7899_v11 = vld [vmem:[%s11073_s10 + $0x1] ss:$0 sm:$0xff] }
 0x4fc   : > { %v1704_v18 = vrot.slane %v1696_v13, %v9930_v48  ;;  %v1720_v19 = vrot.slane %v1712_v14, %v9930_v48  ;;  %v1711_v20 = vrot.slane %v1697_v15, %v9930_v48  ;;  %v1727_v21 = vrot.slane %v1713_v16, %v9930_v48  ;;  %v7892_v15 = vld [vmem:[%s11074_s23 + $0x20] sm:$0xff]  ;;  %v7893_v16 = vld [vmem:[%s11074_s23 + $0x28] sm:$0xff] }
 0x4fe   : > { %v1728_v22 = vcombine.low %v1704_v18, %v1720_v19  ;;  %v1729_v23 = vcombine.high %v1704_v18, %v1720_v19  ;;  %v1730_v32 = vcombine.low %v1711_v20, %v1727_v21  ;;  %v1731_v33 = vcombine.high %v1711_v20, %v1727_v21 }
 0x500   : > { %8222 = vmatpush3.msra.mxu0 %v1728_v22  ;;  %8227 = vmatpush3.msra.mxu1 %v1729_v23 }
 0x501   : > { %8224 = vmatmul.mubr.msk.f32.vlgmr.msra.gmra.mrb[4].mxu0 %vm1732_vm2, %v2083_v25  ;;  %8229 = vmatmul.mubr.msk.f32.vlgmr.msra.gmra.mrb[10].mxu1 %vm1732_vm2, %v2084_v26  ;;  %v8551_v25 = vpack.c.bf16 %v7893_v16, %v7892_v15 }
 0x502   : > { %8231 = vmatprep.subr.mxu0 %v9287_v1  ;;  %8236 = vmatprep.subr.mxu1 %v9287_v1 }
 0x503   : > { %8232 = vmatpush3.msra.mxu0 %v1730_v32  ;;  %8237 = vmatpush3.msra.mxu1 %v1731_v33 }
 0x504   : > { %8233 = vmatprep.mubr.msk.f32.mxu0 %vm9286_vm0, %v9287_v1  ;;  %8238 = vmatprep.mubr.msk.f32.mxu1 %vm9286_vm0, %v9287_v1 }
 0x505   : > { %8538 = vmatprep.subr.bf16.mxu0 %v9285_v0  ;;  %8544 = vmatprep.subr.bf16.mxu1 %v9285_v0 }
 0x506   : > { %8234 = vmatmul.mubr.msk.f32.vlgmr.msra.gmra.mrb[6].mxu0 %vm1732_vm2, %v2085_v40  ;;  %8239 = vmatmul.mubr.msk.f32.vlgmr.msra.gmra.mrb[12].mxu1 %vm1732_vm2, %v2086_v39 }
 0x507   : > { %8540 = vmatpush3.bf16.msra.mxu0 %v8539_v34  ;;  %8546 = vmatpush3.bf16.msra.mxu1 %v8545_v36 }
 0x508   : > { %8541 = vmatprep.subr.bf16.mxu0 %v9285_v0  ;;  %8547 = vmatprep.subr.bf16.mxu1 %v9285_v0 }
 0x509   : > { %8249 = vmatprep.mubr.msk.f32.mxu0 %vm9286_vm0, %v9287_v1  ;;  %8260 = vmatprep.mubr.msk.f32.mxu1 %vm9286_vm0, %v9287_v1 }
 0x50b   : > { %8543 = vmatpush3.bf16.msra.mxu0 %v8542_v37  ;;  %8549 = vmatpush3.bf16.msra.mxu1 %v8548_v44  ;;  %v7894_v44 = vld [vmem:[%s11074_s23 + $0x30] sm:$0xff] }
 0x50c   : > { %8550 = vmatprep.subr.bf16.mxu0 %v9285_v0  ;;  %8274 = vmatprep.subr.mxu1 %v9287_v1 }
 0x50e   : > { %8250 = vmatmul.mubr.msk.f32.vlgmr.msra.gmra.mrb[8].mxu0 %vm1067_vm1, %v10085_v45  ;;  %8261 = vmatmul.mubr.msk.f32.vlgmr.msra.gmra.mrb[14].mxu1 %vm1067_vm1, %v10085_v45 }
 0x50f   : > { %8271 = vmatprep.mubr.msk.f32.mxu0 %vm9286_vm0, %v9287_v1  ;;  %8276 = vmatprep.mubr.msk.f32.mxu1 %vm9286_vm0, %v9287_v1 }
 0x510   : > { %8552 = vmatpush3.bf16.msra.mxu0 %v8551_v25 }
 0x511   : > { %8553 = vmatprep.subr.bf16.mxu0 %v9285_v0 }
 0x5d4   : > { %v2156_v46 = vpop.f32.mrb[4].mxu0  ;;  %v2229_v47 = vpop.f32.mrb[10].mxu1 }
 0x5d5   : > { %v8225_v49 = vpop.f32.mrb[5].mxu0  ;;  %v8230_v50 = vpop.f32.mrb[11].mxu1 }
 0x5d9   : > { %v2302_v51 = vpop.f32.mrb[6].mxu0  ;;  %v2375_v52 = vpop.f32.mrb[12].mxu1 }
 0x5da   : > { %v2379_v53 = vcombine.low %v2156_v46, %v2302_v51  ;;  %v2380_v54 = vcombine.high %v2156_v46, %v2302_v51  ;;  %v2395_v55 = vcombine.low %v2229_v47, %v2375_v52  ;;  %v2396_v56 = vcombine.high %v2229_v47, %v2375_v52  ;;  %v8235_v57 = vpop.f32.mrb[7].mxu0  ;;  %v8240_v58 = vpop.f32.mrb[13].mxu1  ;;  %v7895_v46 = vld [vmem:[%s11074_s23 + $0x38] sm:$0xff] }
 0x5db   : > { %v8554_v47 = vpack.c.bf16 %v7895_v46, %v7894_v44 }
 0x5dc   : > { %v2387_v59 = vrot.slane %v2379_v53, %v9928_v41  ;;  %v2394_v60 = vrot.slane %v2380_v54, %v9928_v41  ;;  %v2403_v62 = vrot.slane %v2395_v55, %v9928_v41  ;;  %v2410_v63 = vrot.slane %v2396_v56, %v9928_v41 }
 0x5dd   : > { %8555 = vmatpush3.bf16.msra.mxu0 %v8554_v47 }
 0x5de   : > { %v2411_v2 = vcombine.low %v2387_v59, %v2403_v62  ;;  %v2412_v3 = vcombine.high %v2387_v59, %v2403_v62  ;;  %v2427_v4 = vcombine.low %v2394_v60, %v2410_v63  ;;  %v2428_v5 = vcombine.high %v2394_v60, %v2410_v63  ;;  %8284 = vmatprep.subr.mxu0 %v9287_v1 }
 0x5e0   : > { %v2419_v6 = vrot.slane %v2411_v2, %v9930_v48  ;;  %v2426_v7 = vrot.slane %v2412_v3, %v9930_v48  ;;  %v2435_v8 = vrot.slane %v2427_v4, %v9930_v48  ;;  %v2442_v9 = vrot.slane %v2428_v5, %v9930_v48  ;;  %8272 = vmatmul.mubr.msk.f32.vlgmr.msra.gmra.mrb[10].mxu0 %vm1067_vm1, %v10085_v45 }
 0x5e1   : > { %v2668_v13 = vpop.f32.mrb[8].mxu0  ;;  %v2745_v14 = vpop.f32.mrb[14].mxu1  ;;  %8286 = vmatprep.mubr.msk.f32.mxu0 %vm9286_vm0, %v9287_v1 }
 0x5e2   : > { %v2447_v17 = vcombine.low %v2419_v6, %v2426_v7  ;;  %v7878_v18 = vcombine.high %v2419_v6, %v2426_v7  ;;  %v2463_v19 = vcombine.low %v2435_v8, %v2442_v9  ;;  %v7879_v20 = vcombine.high %v2435_v8, %v2442_v9  ;;  %v8251_v21 = vpop.f32.mrb[9].mxu0  ;;  %v8262_v22 = vpop.f32.mrb[15].mxu1 }
 0x5e3   : > { %v2669_v23 = vadd.f32 %v7899_v11, %v2668_v13  ;;  %v2746_v24 = vadd.f32 %v7901_v12, %v2745_v14 }
 0x5e4   : > { %v2454_v26 = vrot.slane %v2447_v17, %v9928_v41  ;;  %v2462_v27 = vrot.slane %v7878_v18, %v9928_v41  ;;  %v2470_v28 = vrot.slane %v2463_v19, %v9928_v41  ;;  %v2478_v29 = vrot.slane %v7879_v20, %v9928_v41 }
 0x5e5   : > { %v10121_v31 = vmul.f32 0.35355338, %v2669_v23  ;;  %2972 = vrot.lane.b32.xlu1 %v2746_v24, %s9288_s1 }
 0x5e6   : > { %v2479_v30 = vcombine.low %v2454_v26, %v2462_v27  ;;  %v2495_v32 = vcombine.low %v2470_v28, %v2478_v29  ;;  %v2480_v33 = vcombine.high %v2454_v26, %v2462_v27  ;;  %v2496_v34 = vcombine.high %v2470_v28, %v2478_v29 }
 0x5e7   : > { %2826 = vrot.lane.b32.xlu0 %v10121_v31, %s9288_s1 }
 0x5e8   : > { %v2487_v36 = vrot.slane %v2479_v30, %v9930_v48  ;;  %v2503_v38 = vrot.slane %v2495_v32, %v9930_v48  ;;  %v2494_v39 = vrot.slane %v2480_v33, %v9930_v48  ;;  %v2510_v40 = vrot.slane %v2496_v34, %v9930_v48 }
 0x5e9   : > { %2978 = vrot.lane.b32.xlu1 %v2746_v24, %s9289_s3 }
 0x5ea   : > { %v2512_v42 = vcombine.high %v2487_v36, %v2503_v38  ;;  %v2513_v43 = vcombine.low %v2494_v39, %v2510_v40  ;;  %v2514_v35 = vcombine.high %v2494_v39, %v2510_v40  ;;  %v2511_v37 = vcombine.low %v2487_v36, %v2503_v38 }
 0x5eb   : > { %2975 = vrot.lane.b32.xlu0 %v2746_v24, %s9290_s14 }
 0x5ed   : > { %2829 = vrot.lane.b32.xlu1 %v10121_v31, %s9290_s14 }
 0x5ef   : > { %2832 = vrot.lane.b32.xlu0 %v10121_v31, %s9289_s3 }
 0x5f1   : > { %2516 = vrot.lane.b32.xlu1 %v2512_v42, %s9293_s11 }
 0x5f3   : > { %2520 = vrot.lane.b32.xlu0 %v2513_v43, %s9294_s13 }
 0x5f5   : > { %2524 = vrot.lane.b32.xlu1 %v2514_v35, %s10989_s17 }
 0x657   : > { %v2973_v49 = vpop.permute.xlu1 %2972 }
 0x659   : > { %v2827_v50 = vpop.permute.xlu0 %2826 }
 0x65b   : > { %v2979_v51 = vpop.permute.xlu1 %2978 }
 0x65c   : > { %v2997_v52 = vcombine.low %v2973_v49, %v2979_v51  ;;  %v2998_v53 = vcombine.high %v2973_v49, %v2979_v51 }
 0x65d   : > { %v2976_v54 = vpop.permute.xlu0 %2975 }
 0x65e   : > { %v2981_v55 = vcombine.low %v2746_v24, %v2976_v54  ;;  %v2982_v56 = vcombine.high %v2746_v24, %v2976_v54  ;;  %v3005_v57 = vrot.slane %v2997_v52, %v9928_v41  ;;  %v3012_v59 = vrot.slane %v2998_v53, %v9928_v41 }
 0x65f   : > { %v2830_v58 = vpop.permute.xlu1 %2829 }
 0x660   : > { %v2989_v60 = vrot.slane %v2981_v55, %v9928_v41  ;;  %v2996_v62 = vrot.slane %v2982_v56, %v9928_v41  ;;  %v2835_v63 = vcombine.low %v10121_v31, %v2830_v58  ;;  %v2836_v2 = vcombine.high %v10121_v31, %v2830_v58 }
 0x661   : > { %v2833_v3 = vpop.permute.xlu0 %2832 }
 0x662   : > { %v3013_v4 = vcombine.low %v2989_v60, %v3005_v57  ;;  %v3014_v5 = vcombine.high %v2989_v60, %v3005_v57  ;;  %v3029_v6 = vcombine.low %v2996_v62, %v3012_v59  ;;  %v3030_v7 = vcombine.high %v2996_v62, %v3012_v59 }
 0x663   : > { %v2843_v8 = vrot.slane %v2835_v63, %v9928_v41  ;;  %v2851_v9 = vcombine.low %v2827_v50, %v2833_v3  ;;  %v2852_v11 = vcombine.high %v2827_v50, %v2833_v3  ;;  %v2517_v12 = vpop.permute.xlu1 %2516  ;;  %v2850_v17 = vrot.slane %v2836_v2, %v9928_v41 }
 0x664   : > { %v3021_v13 = vrot.slane %v3013_v4, %v9930_v48  ;;  %v3028_v14 = vrot.slane %v3014_v5, %v9930_v48  ;;  %v3037_v15 = vrot.slane %v3029_v6, %v9930_v48  ;;  %v3044_v16 = vrot.slane %v3030_v7, %v9930_v48 }
 0x665   : > { %v2859_v18 = vrot.slane %v2851_v9, %v9928_v41  ;;  %v2866_v19 = vrot.slane %v2852_v11, %v9928_v41  ;;  %v2527_v20 = vsel %vm1732_vm2, %v2511_v37, %v2517_v12  ;;  %v2521_v39 = vpop.permute.xlu0 %2520 }
 0x666   : > { %v3049_v21 = vcombine.low %v3021_v13, %v3028_v14  ;;  %v7907_v22 = vcombine.high %v3021_v13, %v3028_v14  ;;  %v3065_v23 = vcombine.low %v3037_v15, %v3044_v16  ;;  %v7908_v24 = vcombine.high %v3037_v15, %v3044_v16 }
 0x667   : > { %v2867_v25 = vcombine.low %v2843_v8, %v2859_v18  ;;  %v2868_v26 = vcombine.high %v2843_v8, %v2859_v18  ;;  %v2883_v27 = vcombine.low %v2850_v17, %v2866_v19  ;;  %v2884_v28 = vcombine.high %v2850_v17, %v2866_v19  ;;  %v2525_v49 = vpop.permute.xlu1 %2524 }
 0x668   : > { %v3056_v29 = vrot.slane %v3049_v21, %v9928_v41  ;;  %v3064_v31 = vrot.slane %v7907_v22, %v9928_v41  ;;  %v3072_v30 = vrot.slane %v3065_v23, %v9928_v41  ;;  %v3080_v32 = vrot.slane %v7908_v24, %v9928_v41 }
 0x669   : > { %v2875_v33 = vrot.slane %v2867_v25, %v9930_v48  ;;  %v2882_v34 = vrot.slane %v2868_v26, %v9930_v48  ;;  %v2891_v36 = vrot.slane %v2883_v27, %v9930_v48  ;;  %v2898_v38 = vrot.slane %v2884_v28, %v9930_v48 }
 0x66a   : > { %v3081_v40 = vcombine.low %v3056_v29, %v3064_v31  ;;  %v3082_v42 = vcombine.high %v3056_v29, %v3064_v31  ;;  %v3097_v43 = vcombine.low %v3072_v30, %v3080_v32  ;;  %v3098_v35 = vcombine.high %v3072_v30, %v3080_v32 }
 0x66b   : > { %v2903_v37 = vcombine.low %v2875_v33, %v2882_v34  ;;  %v7905_v44 = vcombine.high %v2875_v33, %v2882_v34  ;;  %v2919_v46 = vcombine.low %v2891_v36, %v2898_v38  ;;  %v7906_v47 = vcombine.high %v2891_v36, %v2898_v38 }
 0x66c   : > { %v2529_v50 = vsel %vm2528_vm4, %v2527_v20, %v2521_v39  ;;  %v3089_v51 = vrot.slane %v3081_v40, %v9930_v48  ;;  %v3105_v52 = vrot.slane %v3097_v43, %v9930_v48  ;;  %v3096_v53 = vrot.slane %v3082_v42, %v9930_v48  ;;  %v7903_v43 = vld [vmem:[%s11076_s26 + $0x1] ss:$0 sm:$0xff] }
 0x66d   : > { %v2910_v54 = vrot.slane %v2903_v37, %v9928_v41  ;;  %v2918_v55 = vrot.slane %v7905_v44, %v9928_v41  ;;  %v2926_v56 = vrot.slane %v2919_v46, %v9928_v41  ;;  %v2934_v57 = vrot.slane %v7906_v47, %v9928_v41 }
 0x66e   : > { %v2531_v58 = vsel %vm2530_vm5, %v2529_v50, %v2525_v49  ;;  %v3113_v59 = vcombine.low %v3089_v51, %v3105_v52  ;;  %v3112_v60 = vrot.slane %v3098_v35, %v9930_v48  ;;  %v3114_v13 = vcombine.high %v3089_v51, %v3105_v52 }
 0x66f   : > { %v2935_v62 = vcombine.low %v2910_v54, %v2918_v55  ;;  %v2936_v63 = vcombine.high %v2910_v54, %v2918_v55  ;;  %v2951_v2 = vcombine.low %v2926_v56, %v2934_v57  ;;  %v2952_v3 = vcombine.high %v2926_v56, %v2934_v57 }
 0x670   : > { %v2532_v4 = vadd.f32 %v2531_v58, %v9874_v10  ;;  %8275 = vmatpush3.xpose.msk.msra.mxu1 %vm1732_vm2, %v3113_v59  ;;  %v3115_v5 = vcombine.low %v3096_v53, %v3112_v60  ;;  %v3116_v15 = vcombine.high %v3096_v53, %v3112_v60 }
 0x671   : > { %8279 = vmatprep.subr.mxu1 %v9287_v1  ;;  %v2943_v6 = vrot.slane %v2935_v62, %v9930_v48  ;;  %v2959_v7 = vrot.slane %v2951_v2, %v9930_v48  ;;  %v2950_v8 = vrot.slane %v2936_v63, %v9930_v48  ;;  %v2966_v9 = vrot.slane %v2952_v3, %v9930_v48 }
 0x672   : > { %v2533_v11 = vsel %vm1067_vm1, %v2532_v4, 0.0  ;;  %8285 = vmatpush3.xpose.msk.msra.mxu0 %vm1732_vm2, %v3115_v5 }
 0x673   : > { %2534 = vadd.xlane.f32.xlu0 %v2533_v11  ;;  %v2967_v12 = vcombine.low %v2943_v6, %v2959_v7  ;;  %v2969_v10 = vcombine.low %v2950_v8, %v2966_v9  ;;  %8294 = vmatprep.subr.mxu0 %v9287_v1  ;;  %v2968_v14 = vcombine.high %v2943_v6, %v2959_v7 }
 0x674   : > { %v2970_v16 = vcombine.high %v2950_v8, %v2966_v9 }
 0x675   : > { %8277 = vmatmul.mubr.msk.f32.vlgmr.msra.gmra.mrb[16].mxu1 %vm1732_vm2, %v2967_v12  ;;  %8287 = vmatmul.mubr.msk.f32.vlgmr.msra.gmra.mrb[12].mxu0 %vm1732_vm2, %v2969_v10 }
 0x676   : > { %8280 = vmatpush3.xpose.msk.msra.mxu1 %vm1732_vm2, %v3114_v13  ;;  %8281 = vmatprep.mubr.msk.f32.mxu1 %vm9286_vm0, %v9287_v1 }
 0x677   : > { %8289 = vmatprep.subr.mxu1 %v9287_v1  ;;  %8296 = vmatprep.mubr.msk.f32.mxu0 %vm9286_vm0, %v9287_v1 }
 0x679   : > { %8282 = vmatmul.mubr.msk.f32.vlgmr.msra.gmra.mrb[18].mxu1 %vm1732_vm2, %v2968_v14 }
 0x67a   : > { %8290 = vmatpush3.xpose.msk.msra.mxu1 %vm1732_vm2, %v3116_v15  ;;  %8291 = vmatprep.mubr.msk.f32.mxu1 %vm9286_vm0, %v9287_v1 }
 0x67b   : > { %8299 = vmatprep.subr.mxu1 %v9287_v1 }
 0x67d   : > { %8292 = vmatmul.mubr.msk.f32.vlgmr.msra.gmra.mrb[20].mxu1 %vm1732_vm2, %v2970_v16 }
 0x67e   : > { %8301 = vmatprep.mubr.msk.f32.mxu1 %vm9286_vm0, %v9287_v1 }
 0x6b3   : > { %v2821_v17 = vpop.f32.mrb[10].mxu0 }
 0x6b4   : > { %v8273_v18 = vpop.f32.mrb[11].mxu0  ;;  %v2822_v35 = vadd.f32 %v7903_v43, %v2821_v17 }
 0x700   : > { %v2535_v19 = vpop.xlane.xlu0 %2534 }
 0x701   : > { %v2537_v25 = vmul.f32 0.03125, %v2535_v19 }
 0x703   : > { %v10215_v31 = vsub.f32 %v2532_v4, %v2537_v25 }
 0x705   : > { %v2539_v40 = vmul.f32 %v10215_v31, %v10215_v31 }
 0x707   : > { %v2540_v42 = vsel %vm1067_vm1, %v2539_v40, 0.0 }
 0x748   : > { %v3335_v20 = vpop.f32.mrb[16].mxu1  ;;  %v3487_v21 = vpop.f32.mrb[12].mxu0 }
 0x749   : > { %v3567_v22 = vsel %vm1043_vm3, %v3335_v20, -1e+09  ;;  %v8278_v23 = vpop.f32.mrb[17].mxu1  ;;  %v8288_v24 = vpop.f32.mrb[13].mxu0  ;;  %v3569_v32 = vsel %vm1043_vm3, %v3487_v21, -1e+09 }
 0x74a   : > { %v3571_v26 = vsel %vm1732_vm2, %v3567_v22, -inf  ;;  %v3577_v38 = vsel %vm1732_vm2, %v3569_v32, -inf }
 0x74b   : > { %3572 = vmax.xlane.f32.xlu0 %v3571_v26 }
 0x74c   : > { %v3411_v27 = vpop.f32.mrb[18].mxu1 }
 0x74d   : > { %v3568_v28 = vsel %vm1043_vm3, %v3411_v27, -1e+09  ;;  %v8283_v29 = vpop.f32.mrb[19].mxu1 }
 0x74e   : > { %v3574_v30 = vsel %vm1732_vm2, %v3568_v28, -inf }
 0x74f   : > { %3575 = vmax.xlane.f32.xlu1 %v3574_v30 }
 0x750   : > { %v3563_v33 = vpop.f32.mrb[20].mxu1 }
 0x751   : > { %v3570_v34 = vsel %vm1043_vm3, %v3563_v33, -1e+09  ;;  %v8293_v36 = vpop.f32.mrb[21].mxu1 }
 0x752   : > { %v3580_v39 = vsel %vm1732_vm2, %v3570_v34, -inf }
 0x753   : > { %3578 = vmax.xlane.f32.xlu1 %v3577_v38  ;;  %3581 = vmax.xlane.f32.xlu0 %v3580_v39 }
 0x757   : > { %2541 = vadd.xlane.f32.xlu0 %v2540_v42 }
 0x764   : > { %3118 = vrot.lane.b32.xlu1 %v2822_v35, %s9288_s1 }
 0x7d8   : > { %v3573_v37 = vpop.xlane.xlu0 %3572 }
 0x7d9   : > { %v3583_v44 = vsub.f32 %v3567_v22, %v3573_v37 }
 0x7db   : > { %v3587_v46 = vmul.f32 1.442695, %v3583_v44 }
 0x7dc   : > { %v3576_v47 = vpop.xlane.xlu1 %3575 }
 0x7dd   : > { %8786 = vpow2.f32 %v3587_v46  ;;  %v3584_v49 = vsub.f32 %v3568_v28, %v3576_v47 }
 0x7df   : > { %v3589_v50 = vmul.f32 1.442695, %v3584_v49 }
 0x7e0   : > { %v3579_v51 = vpop.xlane.xlu1 %3578  ;;  %v3582_v52 = vpop.xlane.xlu0 %3581 }
 0x7e1   : > { %8788 = vpow2.f32 %v3589_v50  ;;  %v3585_v53 = vsub.f32 %v3569_v32, %v3579_v51  ;;  %v3586_v54 = vsub.f32 %v3570_v34, %v3582_v52 }
 0x7e3   : > { %v3591_v55 = vmul.f32 1.442695, %v3585_v53  ;;  %v3593_v56 = vmul.f32 1.442695, %v3586_v54 }
 0x7e4   : > { %v2542_v4 = vpop.xlane.xlu0 %2541  ;;  %v3119_v6 = vpop.permute.xlu1 %3118 }
 0x7e5   : > { %8790 = vpow2.f32 %v3591_v55  ;;  %v2543_v5 = vmul.f32 0.032258064, %v2542_v4 }
 0x7e6   : > { %8792 = vpow2.f32 %v3593_v56 }
 0x7e7   : > { %v10231_v57 = vpop.eup %8786  ;;  %8794 = vrsqrt.f32 %v2543_v5  ;;  %vm2546_vm6 = vcmp.eq.f32.partialorder %v2543_v5, inf  ;;  %v2549_v14 = vand.u32 2147483648, %v2543_v5  ;;  %vm2548_vm7 = vcmp.eq.f32.partialorder %v2543_v5, 0.0 }
 0x7e8   : > { %v3595_v58 = vsel %vm1732_vm2, %v10231_v57, 0.0 }
 0x7e9   : > { %3596 = vadd.xlane.f32.xlu0 %v3595_v58 }
 0x7eb   : > { %v10235_v59 = vpop.eup %8788 }
 0x7ec   : > { %v3598_v60 = vsel %vm1732_vm2, %v10235_v59, 0.0 }
 0x7ed   : > { %3599 = vadd.xlane.f32.xlu1 %v3598_v60 }
 0x7ef   : > { %v10239_v62 = vpop.eup %8790 }
 0x7f0   : > { %v10241_v63 = vpop.eup %8792  ;;  %v3601_v2 = vsel %vm1732_vm2, %v10239_v62, 0.0 }
 0x7f1   : > { %3602 = vadd.xlane.f32.xlu0 %v3601_v2  ;;  %v3604_v3 = vsel %vm1732_vm2, %v10241_v63, 0.0  ;;  %v8795_v7 = vpop.eup %8794 }
 0x7f2   : > { %3605 = vadd.xlane.f32.xlu1 %v3604_v3  ;;  %v2545_v11 = vmul.f32 %v8795_v7, %v2543_v5  ;;  %v4094_v7 = vld [vmem:[#allocation10 + $0x8] sm:$0xff] }
 0x7f4   : > { %v2547_v13 = vsel %vm2546_vm6, %v2543_v5, %v2545_v11  ;;  %v4093_v5 = vld [vmem:[#allocation10] sm:$0xff] }
 0x7f5   : > { %v2550_v19 = vsel %vm2548_vm7, %v2549_v14, %v2547_v13  ;;  %v4095_v13 = vld [vmem:[#allocation10 + $0x10] sm:$0xff] }
 0x7f6   : > { %v2551_v26 = vadd.f32 1e-06, %v2550_v19 }
 0x803   : > { %3124 = vrot.lane.b32.xlu1 %v2822_v35, %s9289_s3 }
 0x807   : > { %3121 = vrot.lane.b32.xlu0 %v2822_v35, %s9290_s14 }
 0x876   : > { %v3597_v8 = vpop.xlane.xlu0 %3596 }
 0x877   : > { %8796 = vrcp.f32 %v3597_v8  ;;  %v4098_v8 = vld [vmem:[#allocation11] sm:$0xff] }
 0x87a   : > { %v3600_v9 = vpop.xlane.xlu1 %3599 }
 0x87b   : > { %8798 = vrcp.f32 %v3600_v9  ;;  %v4099_v9 = vld [vmem:[#allocation11 + $0x8] sm:$0xff] }
 0x87c   : > { %8800 = vrcp.f32 %v2551_v26 }
 0x87e   : > { %v3603_v12 = vpop.xlane.xlu0 %3602 }
 0x87f   : > { %v3606_v10 = vpop.xlane.xlu1 %3605  ;;  %8802 = vrcp.f32 %v3603_v12 }
 0x880   : > { %8804 = vrcp.f32 %v3606_v10 }
 0x881   : > { %v8797_v49 = vpop.eup %8796 }
 0x882   : > { %v3122_v15 = vpop.permute.xlu0 %3121  ;;  %v3611_v3 = vmul.f32 %v8797_v49, %v10231_v57  ;;  %v8557_v57 = vpack.c.bf16 %v4094_v7, %v4093_v5 }
 0x883   : > { %v3125_v16 = vpop.permute.xlu1 %3124  ;;  %v3127_v17 = vcombine.low %v2822_v35, %v3122_v15  ;;  %v3128_v18 = vcombine.high %v2822_v35, %v3122_v15 }
 0x884   : > { %v3143_v20 = vcombine.low %v3119_v6, %v3125_v16  ;;  %v3144_v21 = vcombine.high %v3119_v6, %v3125_v16  ;;  %v4096_v16 = vld [vmem:[#allocation10 + $0x18] sm:$0xff] }
 0x885   : > { %v3135_v22 = vrot.slane %v3127_v17, %v9928_v41  ;;  %v3142_v23 = vrot.slane %v3128_v18, %v9928_v41  ;;  %v8799_v53 = vpop.eup %8798  ;;  %v4100_v17 = vld [vmem:[#allocation11 + $0x10] sm:$0xff]  ;;  %v4101_v18 = vld [vmem:[#allocation11 + $0x18] sm:$0xff] }
 0x886   : > { %v3151_v24 = vrot.slane %v3143_v20, %v9928_v41  ;;  %v3158_v25 = vrot.slane %v3144_v21, %v9928_v41  ;;  %v8801_v2 = vpop.eup %8800  ;;  %v3612_v4 = vmul.f32 %v8799_v53, %v10235_v59  ;;  %v8563_v59 = vpack.c.bf16 %v4099_v9, %v4098_v8  ;;  %v7881_v21 = vld [vmem:[%s11078_s7] ss:$0 sm:$0xff]  ;;  %s11090_s7 = sld [smem:[#allocation58_spill]] }
 0x887   : > { %v2553_v19 = vmul.f32 %v8801_v2, %v10215_v31  ;;  %v8566_v20 = vpack.c.bf16 %v4101_v18, %v4100_v17 }
 0x888   : > { %v3159_v27 = vcombine.low %v3135_v22, %v3151_v24  ;;  %v3160_v28 = vcombine.high %v3135_v22, %v3151_v24  ;;  %v3175_v29 = vcombine.low %v3142_v23, %v3158_v25  ;;  %v3176_v30 = vcombine.high %v3142_v23, %v3158_v25 }
 0x889   : > { %v8803_v6 = vpop.eup %8802 }
 0x88a   : > { %v3167_v32 = vrot.slane %v3159_v27, %v9930_v48  ;;  %v3174_v33 = vrot.slane %v3160_v28, %v9930_v48  ;;  %v3183_v34 = vrot.slane %v3175_v29, %v9930_v48  ;;  %v3190_v36 = vrot.slane %v3176_v30, %v9930_v48  ;;  %v8805_v11 = vpop.eup %8804 }
 0x88b   : > { %v3614_v14 = vmul.f32 %v8805_v11, %v10241_v63  ;;  %v3613_v15 = vmul.f32 %v8803_v6, %v10239_v62  ;;  %v7880_v63 = vld [vmem:[%s11077_s0] ss:$0 sm:$0xff]  ;;  %v8560_v62 = vpack.c.bf16 %v4096_v16, %v4095_v13 }
 0x88c   : > { %v3195_v38 = vcombine.low %v3167_v32, %v3174_v33  ;;  %v7909_v39 = vcombine.high %v3167_v32, %v3174_v33  ;;  %v3211_v40 = vcombine.low %v3183_v34, %v3190_v36  ;;  %v7910_v42 = vcombine.high %v3183_v34, %v3190_v36 }
 0x88d   : > { %v2560_v31 = vmul.f32 %v7880_v63, %v2553_v19 }
 0x88e   : > { %v3202_v43 = vrot.slane %v3195_v38, %v9928_v41  ;;  %v3210_v35 = vrot.slane %v7909_v39, %v9928_v41  ;;  %v3218_v37 = vrot.slane %v3211_v40, %v9928_v41  ;;  %v3226_v44 = vrot.slane %v7910_v42, %v9928_v41 }
 0x88f   : > { %v10294_v22 = vadd.f32 %v7881_v21, %v2560_v31  ;;  %v4105_v21 = vld [vmem:[#allocation13 + $0x10] sm:$0xff] }
 0x890   : > { %v3227_v46 = vcombine.low %v3202_v43, %v3210_v35  ;;  %v3228_v47 = vcombine.high %v3202_v43, %v3210_v35  ;;  %v3243_v50 = vcombine.low %v3218_v37, %v3226_v44  ;;  %v3244_v51 = vcombine.high %v3218_v37, %v3226_v44 }
 0x892   : > { %v3235_v52 = vrot.slane %v3227_v46, %v9930_v48  ;;  %v3251_v54 = vrot.slane %v3243_v50, %v9930_v48  ;;  %v3242_v55 = vrot.slane %v3228_v47, %v9930_v48  ;;  %v3258_v56 = vrot.slane %v3244_v51, %v9930_v48  ;;  %v7927_v51 = vld [vmem:[%s11080_s16] ss:$0 sm:$0xff] }
 0x894   : > { %v3259_v58 = vcombine.low %v3235_v52, %v3251_v54  ;;  %v3260_v60 = vcombine.high %v3235_v52, %v3251_v54  ;;  %v3261_v12 = vcombine.low %v3242_v55, %v3258_v56  ;;  %v3262_v10 = vcombine.high %v3242_v55, %v3258_v56  ;;  %v7929_v52 = vld [vmem:[%s11081_s22] ss:$0 sm:$0xff]  ;;  %v4104_v56 = vld [vmem:[#allocation13 + $0x8] sm:$0xff] }
 0x895   : > { %v4103_v55 = vld [vmem:[#allocation13] sm:$0xff] }
 0x896   : > { %8295 = vmatpush3.msra.mxu0 %v3259_v58  ;;  %8300 = vmatpush3.msra.mxu1 %v3260_v60  ;;  %v8569_v8 = vpack.c.bf16 %v4104_v56, %v4103_v55 }
 0x897   : > { %8297 = vmatmul.mubr.msk.f32.vlgmr.msra.gmra.mrb[14].mxu0 %vm1732_vm2, %v3611_v3  ;;  %8302 = vmatmul.mubr.msk.f32.vlgmr.msra.gmra.mrb[22].mxu1 %vm1732_vm2, %v3612_v4 }
 0x898   : > { %8304 = vmatprep.subr.mxu0 %v9287_v1  ;;  %8309 = vmatprep.subr.mxu1 %v9287_v1 }
 0x899   : > { %8305 = vmatpush3.msra.mxu0 %v3261_v12  ;;  %8310 = vmatpush3.msra.mxu1 %v3262_v10 }
 0x89a   : > { %8306 = vmatprep.mubr.msk.f32.mxu0 %vm9286_vm0, %v9287_v1  ;;  %8311 = vmatprep.mubr.msk.f32.mxu1 %vm9286_vm0, %v9287_v1 }
 0x89b   : > { %8556 = vmatprep.subr.bf16.mxu0 %v9285_v0  ;;  %8562 = vmatprep.subr.bf16.mxu1 %v9285_v0 }
 0x89c   : > { %8307 = vmatmul.mubr.msk.f32.vlgmr.msra.gmra.mrb[16].mxu0 %vm1732_vm2, %v3613_v15  ;;  %8312 = vmatmul.mubr.msk.f32.vlgmr.msra.gmra.mrb[24].mxu1 %vm1732_vm2, %v3614_v14 }
 0x89d   : > { %8558 = vmatpush3.bf16.msra.mxu0 %v8557_v57  ;;  %8564 = vmatpush3.bf16.msra.mxu1 %v8563_v59 }
 0x89e   : > { %8559 = vmatprep.subr.bf16.mxu0 %v9285_v0  ;;  %8565 = vmatprep.subr.bf16.mxu1 %v9285_v0 }
 0x89f   : > { %8322 = vmatprep.mubr.msk.f32.mxu0 %vm9286_vm0, %v9287_v1  ;;  %8333 = vmatprep.mubr.msk.f32.mxu1 %vm9286_vm0, %v9287_v1 }
 0x8a1   : > { %8561 = vmatpush3.bf16.msra.mxu0 %v8560_v62  ;;  %8567 = vmatpush3.bf16.msra.mxu1 %v8566_v20 }
 0x8a2   : > { %8568 = vmatprep.subr.bf16.mxu0 %v9285_v0  ;;  %8347 = vmatprep.subr.mxu1 %v9287_v1 }
 0x8a4   : > { %8323 = vmatmul.mubr.msk.f32.vlgmr.msra.gmra.mrb[18].mxu0 %vm1067_vm1, %v10294_v22  ;;  %8334 = vmatmul.mubr.msk.f32.vlgmr.msra.gmra.mrb[26].mxu1 %vm1067_vm1, %v10085_v45 }
 0x8a5   : > { %8344 = vmatprep.mubr.msk.f32.mxu0 %vm9286_vm0, %v9287_v1  ;;  %8349 = vmatprep.mubr.msk.f32.mxu1 %vm9286_vm0, %v9287_v1 }
 0x8a6   : > { %8570 = vmatpush3.bf16.msra.mxu0 %v8569_v8 }
 0x8a7   : > { %8571 = vmatprep.subr.bf16.mxu0 %v9285_v0 }
 0x96a   : > { %v3684_v23 = vpop.f32.mrb[14].mxu0  ;;  %v3757_v24 = vpop.f32.mrb[22].mxu1 }
 0x96b   : > { %v8298_v25 = vpop.f32.mrb[15].mxu0  ;;  %v8303_v26 = vpop.f32.mrb[23].mxu1 }
 0x96f   : > { %v3830_v27 = vpop.f32.mrb[16].mxu0  ;;  %v3903_v28 = vpop.f32.mrb[24].mxu1 }
 0x970   : > { %v3907_v29 = vcombine.low %v3684_v23, %v3830_v27  ;;  %v3908_v30 = vcombine.high %v3684_v23, %v3830_v27  ;;  %v3923_v32 = vcombine.low %v3757_v24, %v3903_v28  ;;  %v3924_v33 = vcombine.high %v3757_v24, %v3903_v28  ;;  %v8308_v34 = vpop.f32.mrb[17].mxu0  ;;  %v8313_v36 = vpop.f32.mrb[25].mxu1  ;;  %v4106_v23 = vld [vmem:[#allocation13 + $0x18] sm:$0xff] }
 0x971   : > { %v8572_v24 = vpack.c.bf16 %v4106_v23, %v4105_v21 }
 0x972   : > { %v3915_v38 = vrot.slane %v3907_v29, %v9928_v41  ;;  %v3922_v39 = vrot.slane %v3908_v30, %v9928_v41  ;;  %v3931_v40 = vrot.slane %v3923_v32, %v9928_v41  ;;  %v3938_v42 = vrot.slane %v3924_v33, %v9928_v41 }
 0x973   : > { %8573 = vmatpush3.bf16.msra.mxu0 %v8572_v24 }
 0x974   : > { %v3939_v43 = vcombine.low %v3915_v38, %v3931_v40  ;;  %v3940_v35 = vcombine.high %v3915_v38, %v3931_v40  ;;  %v3955_v37 = vcombine.low %v3922_v39, %v3938_v42  ;;  %v3956_v44 = vcombine.high %v3922_v39, %v3938_v42  ;;  %8357 = vmatprep.subr.mxu0 %v9287_v1 }
 0x976   : > { %v3947_v46 = vrot.slane %v3939_v43, %v9930_v48  ;;  %v3954_v47 = vrot.slane %v3940_v35, %v9930_v48  ;;  %v3963_v49 = vrot.slane %v3955_v37, %v9930_v48  ;;  %v3970_v50 = vrot.slane %v3956_v44, %v9930_v48  ;;  %8345 = vmatmul.mubr.msk.f32.vlgmr.msra.gmra.mrb[20].mxu0 %vm1067_vm1, %v10085_v45 }
 0x977   : > { %v4185_v53 = vpop.f32.mrb[18].mxu0  ;;  %v4262_v54 = vpop.f32.mrb[26].mxu1  ;;  %8359 = vmatprep.mubr.msk.f32.mxu0 %vm9286_vm0, %v9287_v1 }
 0x978   : > { %v3975_v58 = vcombine.low %v3947_v46, %v3954_v47  ;;  %v7923_v60 = vcombine.high %v3947_v46, %v3954_v47  ;;  %v3991_v2 = vcombine.low %v3963_v49, %v3970_v50  ;;  %v7924_v3 = vcombine.high %v3963_v49, %v3970_v50  ;;  %v8324_v4 = vpop.f32.mrb[19].mxu0  ;;  %v8335_v5 = vpop.f32.mrb[27].mxu1 }
 0x979   : > { %v4186_v6 = vadd.f32 %v7927_v51, %v4185_v53  ;;  %v4263_v7 = vadd.f32 %v7929_v52, %v4262_v54 }
 0x97a   : > { %v3982_v9 = vrot.slane %v3975_v58, %v9928_v41  ;;  %v3990_v11 = vrot.slane %v7923_v60, %v9928_v41  ;;  %v3998_v12 = vrot.slane %v3991_v2, %v9928_v41  ;;  %v4006_v10 = vrot.slane %v7924_v3, %v9928_v41 }
 0x97b   : > { %v4189_v57 = vmul.f32 0.35355338, %v4186_v6  ;;  %4489 = vrot.lane.b32.xlu1 %v4263_v7, %s9288_s1 }
 0x97c   : > { %v4007_v59 = vcombine.low %v3982_v9, %v3990_v11  ;;  %v4023_v13 = vcombine.low %v3998_v12, %v4006_v10  ;;  %v4008_v14 = vcombine.high %v3982_v9, %v3990_v11  ;;  %v4024_v15 = vcombine.high %v3998_v12, %v4006_v10 }
 0x97d   : > { %4343 = vrot.lane.b32.xlu0 %v4189_v57, %s9288_s1 }
 0x97e   : > { %v4015_v16 = vrot.slane %v4007_v59, %v9930_v48  ;;  %v4031_v17 = vrot.slane %v4023_v13, %v9930_v48  ;;  %v4022_v18 = vrot.slane %v4008_v14, %v9930_v48  ;;  %v4038_v19 = vrot.slane %v4024_v15, %v9930_v48 }
 0x97f   : > { %4495 = vrot.lane.b32.xlu1 %v4263_v7, %s9289_s3 }
 0x980   : > { %v4040_v63 = vcombine.high %v4015_v16, %v4031_v17  ;;  %v4041_v62 = vcombine.low %v4022_v18, %v4038_v19  ;;  %v4042_v20 = vcombine.high %v4022_v18, %v4038_v19  ;;  %v4039_v31 = vcombine.low %v4015_v16, %v4031_v17 }
 0x981   : > { %4492 = vrot.lane.b32.xlu0 %v4263_v7, %s9290_s14 }
 0x983   : > { %4346 = vrot.lane.b32.xlu1 %v4189_v57, %s9290_s14 }
 0x985   : > { %4349 = vrot.lane.b32.xlu0 %v4189_v57, %s9289_s3 }
 0x987   : > { %4044 = vrot.lane.b32.xlu1 %v4040_v63, %s9293_s11 }
 0x989   : > { %4048 = vrot.lane.b32.xlu0 %v4041_v62, %s9294_s13 }
 0x98b   : > { %4052 = vrot.lane.b32.xlu1 %v4042_v20, %s10989_s17  ;;  %s11087_s17 = scalar_lea.vmem [#allocation7], %s9811_s12 }
 0x9ed   : > { %v4490_v25 = vpop.permute.xlu1 %4489 }
 0x9ef   : > { %v4344_v26 = vpop.permute.xlu0 %4343 }
 0x9f1   : > { %v4496_v27 = vpop.permute.xlu1 %4495 }
 0x9f2   : > { %v4514_v28 = vcombine.low %v4490_v25, %v4496_v27  ;;  %v4515_v29 = vcombine.high %v4490_v25, %v4496_v27 }
 0x9f3   : > { %v4493_v30 = vpop.permute.xlu0 %4492 }
 0x9f4   : > { %v4498_v32 = vcombine.low %v4263_v7, %v4493_v30  ;;  %v4499_v33 = vcombine.high %v4263_v7, %v4493_v30  ;;  %v4522_v34 = vrot.slane %v4514_v28, %v9928_v41  ;;  %v4529_v38 = vrot.slane %v4515_v29, %v9928_v41 }
 0x9f5   : > { %v4347_v36 = vpop.permute.xlu1 %4346 }
 0x9f6   : > { %v4506_v39 = vrot.slane %v4498_v32, %v9928_v41  ;;  %v4513_v40 = vrot.slane %v4499_v33, %v9928_v41  ;;  %v4352_v42 = vcombine.low %v4189_v57, %v4347_v36  ;;  %v4353_v43 = vcombine.high %v4189_v57, %v4347_v36 }
 0x9f7   : > { %v4350_v35 = vpop.permute.xlu0 %4349 }
 0x9f8   : > { %v4530_v37 = vcombine.low %v4506_v39, %v4522_v34  ;;  %v4531_v44 = vcombine.high %v4506_v39, %v4522_v34  ;;  %v4546_v46 = vcombine.low %v4513_v40, %v4529_v38  ;;  %v4547_v47 = vcombine.high %v4513_v40, %v4529_v38 }
 0x9f9   : > { %v4360_v49 = vrot.slane %v4352_v42, %v9928_v41  ;;  %v4368_v50 = vcombine.low %v4344_v26, %v4350_v35  ;;  %v4369_v51 = vcombine.high %v4344_v26, %v4350_v35  ;;  %v4045_v52 = vpop.permute.xlu1 %4044  ;;  %v4367_v58 = vrot.slane %v4353_v43, %v9928_v41 }
 0x9fa   : > { %v4538_v53 = vrot.slane %v4530_v37, %v9930_v48  ;;  %v4545_v54 = vrot.slane %v4531_v44, %v9930_v48  ;;  %v4554_v55 = vrot.slane %v4546_v46, %v9930_v48  ;;  %v4561_v56 = vrot.slane %v4547_v47, %v9930_v48 }
 0x9fb   : > { %v4376_v60 = vrot.slane %v4368_v50, %v9928_v41  ;;  %v4383_v2 = vrot.slane %v4369_v51, %v9928_v41  ;;  %v4055_v3 = vsel %vm1732_vm2, %v4039_v31, %v4045_v52  ;;  %v4049_v18 = vpop.permute.xlu0 %4048 }
 0x9fc   : > { %v4566_v4 = vcombine.low %v4538_v53, %v4545_v54  ;;  %v7935_v5 = vcombine.high %v4538_v53, %v4545_v54  ;;  %v4582_v6 = vcombine.low %v4554_v55, %v4561_v56  ;;  %v7936_v7 = vcombine.high %v4554_v55, %v4561_v56 }
 0x9fd   : > { %v4384_v8 = vcombine.low %v4360_v49, %v4376_v60  ;;  %v4385_v9 = vcombine.high %v4360_v49, %v4376_v60  ;;  %v4400_v11 = vcombine.low %v4367_v58, %v4383_v2  ;;  %v4401_v12 = vcombine.high %v4367_v58, %v4383_v2  ;;  %v4053_v25 = vpop.permute.xlu1 %4052 }
 0x9fe   : > { %v4573_v10 = vrot.slane %v4566_v4, %v9928_v41  ;;  %v4581_v57 = vrot.slane %v7935_v5, %v9928_v41  ;;  %v4589_v59 = vrot.slane %v4582_v6, %v9928_v41  ;;  %v4597_v13 = vrot.slane %v7936_v7, %v9928_v41 }
 0x9ff   : > { %v4392_v14 = vrot.slane %v4384_v8, %v9930_v48  ;;  %v4399_v15 = vrot.slane %v4385_v9, %v9930_v48  ;;  %v4408_v16 = vrot.slane %v4400_v11, %v9930_v48  ;;  %v4415_v17 = vrot.slane %v4401_v12, %v9930_v48 }
 0xa00   : > { %v4598_v19 = vcombine.low %v4573_v10, %v4581_v57  ;;  %v4599_v63 = vcombine.high %v4573_v10, %v4581_v57  ;;  %v4614_v62 = vcombine.low %v4589_v59, %v4597_v13  ;;  %v4615_v20 = vcombine.high %v4589_v59, %v4597_v13 }
 0xa01   : > { %v4420_v31 = vcombine.low %v4392_v14, %v4399_v15  ;;  %v7933_v21 = vcombine.high %v4392_v14, %v4399_v15  ;;  %v4436_v23 = vcombine.low %v4408_v16, %v4415_v17  ;;  %v7934_v24 = vcombine.high %v4408_v16, %v4415_v17 }
 0xa02   : > { %v4056_v26 = vsel %vm2528_vm4, %v4055_v3, %v4049_v18  ;;  %v4606_v27 = vrot.slane %v4598_v19, %v9930_v48  ;;  %v4622_v28 = vrot.slane %v4614_v62, %v9930_v48  ;;  %v4613_v29 = vrot.slane %v4599_v63, %v9930_v48  ;;  %v7931_v62 = vld [vmem:[%s11082_s9] ss:$0 sm:$0xff] }
 0xa03   : > { %v4427_v30 = vrot.slane %v4420_v31, %v9928_v41  ;;  %v4435_v32 = vrot.slane %v7933_v21, %v9928_v41  ;;  %v4443_v33 = vrot.slane %v4436_v23, %v9928_v41  ;;  %v4451_v34 = vrot.slane %v7934_v24, %v9928_v41 }
 0xa04   : > { %v4057_v36 = vsel %vm2530_vm5, %v4056_v26, %v4053_v25  ;;  %v4630_v38 = vcombine.low %v4606_v27, %v4622_v28  ;;  %v4629_v39 = vrot.slane %v4615_v20, %v9930_v48  ;;  %v4631_v53 = vcombine.high %v4606_v27, %v4622_v28 }
 0xa05   : > { %v4452_v40 = vcombine.low %v4427_v30, %v4435_v32  ;;  %v4453_v42 = vcombine.high %v4427_v30, %v4435_v32  ;;  %v4468_v43 = vcombine.low %v4443_v33, %v4451_v34  ;;  %v4469_v35 = vcombine.high %v4443_v33, %v4451_v34 }
 0xa06   : > { %v4058_v37 = vadd.f32 %v4057_v36, %v10085_v45  ;;  %8348 = vmatpush3.xpose.msk.msra.mxu1 %vm1732_vm2, %v4630_v38  ;;  %v4632_v44 = vcombine.low %v4613_v29, %v4629_v39  ;;  %v4633_v55 = vcombine.high %v4613_v29, %v4629_v39 }
 0xa07   : > { %8352 = vmatprep.subr.mxu1 %v9287_v1  ;;  %v4460_v46 = vrot.slane %v4452_v40, %v9930_v48  ;;  %v4476_v47 = vrot.slane %v4468_v43, %v9930_v48  ;;  %v4467_v49 = vrot.slane %v4453_v42, %v9930_v48  ;;  %v4483_v50 = vrot.slane %v4469_v35, %v9930_v48 }
 0xa08   : > { %v4059_v51 = vsel %vm1067_vm1, %v4058_v37, 0.0  ;;  %8358 = vmatpush3.xpose.msk.msra.mxu0 %vm1732_vm2, %v4632_v44 }
 0xa09   : > { %4060 = vadd.xlane.f32.xlu0 %v4059_v51  ;;  %v4484_v52 = vcombine.low %v4460_v46, %v4476_v47  ;;  %v4486_v45 = vcombine.low %v4467_v49, %v4483_v50  ;;  %8367 = vmatprep.subr.mxu0 %v9287_v1  ;;  %v4485_v54 = vcombine.high %v4460_v46, %v4476_v47 }
 0xa0a   : > { %v4487_v56 = vcombine.high %v4467_v49, %v4483_v50 }
 0xa0b   : > { %8350 = vmatmul.mubr.msk.f32.vlgmr.msra.gmra.mrb[28].mxu1 %vm1732_vm2, %v4484_v52  ;;  %8360 = vmatmul.mubr.msk.f32.vlgmr.msra.gmra.mrb[22].mxu0 %vm1732_vm2, %v4486_v45 }
 0xa0c   : > { %8353 = vmatpush3.xpose.msk.msra.mxu1 %vm1732_vm2, %v4631_v53  ;;  %8354 = vmatprep.mubr.msk.f32.mxu1 %vm9286_vm0, %v9287_v1 }
 0xa0d   : > { %8362 = vmatprep.subr.mxu1 %v9287_v1  ;;  %8369 = vmatprep.mubr.msk.f32.mxu0 %vm9286_vm0, %v9287_v1 }
 0xa0f   : > { %8355 = vmatmul.mubr.msk.f32.vlgmr.msra.gmra.mrb[30].mxu1 %vm1732_vm2, %v4485_v54 }
 0xa10   : > { %8363 = vmatpush3.xpose.msk.msra.mxu1 %vm1732_vm2, %v4633_v55  ;;  %8364 = vmatprep.mubr.msk.f32.mxu1 %vm9286_vm0, %v9287_v1 }
 0xa11   : > { %8372 = vmatprep.subr.mxu1 %v9287_v1 }
 0xa13   : > { %8365 = vmatmul.mubr.msk.f32.vlgmr.msra.gmra.mrb[32].mxu1 %vm1732_vm2, %v4487_v56 }
 0xa14   : > { %8374 = vmatprep.mubr.msk.f32.mxu1 %vm9286_vm0, %v9287_v1 }
 0xa49   : > { %v4338_v58 = vpop.f32.mrb[20].mxu0 }
 0xa4a   : > { %v8346_v60 = vpop.f32.mrb[21].mxu0  ;;  %v4339_v20 = vadd.f32 %v7931_v62, %v4338_v58 }
 0xa96   : > { %v4061_v2 = vpop.xlane.xlu0 %4060 }
 0xa97   : > { %v4062_v8 = vmul.f32 0.03125, %v4061_v2 }
 0xa99   : > { %v10405_v57 = vsub.f32 %v4058_v37, %v4062_v8 }
 0xa9b   : > { %v4064_v19 = vmul.f32 %v10405_v57, %v10405_v57 }
 0xa9d   : > { %v4065_v63 = vsel %vm1067_vm1, %v4064_v19, 0.0 }
 0xade   : > { %v4852_v3 = vpop.f32.mrb[28].mxu1  ;;  %v5004_v4 = vpop.f32.mrb[22].mxu0 }
 0xadf   : > { %v5084_v5 = vsel %vm1043_vm3, %v4852_v3, -1e+09  ;;  %v8351_v6 = vpop.f32.mrb[29].mxu1  ;;  %v8361_v7 = vpop.f32.mrb[23].mxu0  ;;  %v5086_v13 = vsel %vm1043_vm3, %v5004_v4, -1e+09 }
 0xae0   : > { %v5088_v9 = vsel %vm1732_vm2, %v5084_v5, -inf  ;;  %v5094_v17 = vsel %vm1732_vm2, %v5086_v13, -inf }
 0xae1   : > { %5089 = vmax.xlane.f32.xlu0 %v5088_v9 }
 0xae2   : > { %v4928_v11 = vpop.f32.mrb[30].mxu1 }
 0xae3   : > { %v5085_v12 = vsel %vm1043_vm3, %v4928_v11, -1e+09  ;;  %v8356_v10 = vpop.f32.mrb[31].mxu1 }
 0xae4   : > { %v5091_v59 = vsel %vm1732_vm2, %v5085_v12, -inf }
 0xae5   : > { %5092 = vmax.xlane.f32.xlu1 %v5091_v59 }
 0xae6   : > { %v5080_v14 = vpop.f32.mrb[32].mxu1 }
 0xae7   : > { %v5087_v15 = vsel %vm1043_vm3, %v5080_v14, -1e+09  ;;  %v8366_v16 = vpop.f32.mrb[33].mxu1 }
 0xae8   : > { %v5097_v18 = vsel %vm1732_vm2, %v5087_v15, -inf }
 0xae9   : > { %5095 = vmax.xlane.f32.xlu1 %v5094_v17  ;;  %5098 = vmax.xlane.f32.xlu0 %v5097_v18 }
 0xaed   : > { %4066 = vadd.xlane.f32.xlu0 %v4065_v63 }
 0xafa   : > { %4635 = vrot.lane.b32.xlu1 %v4339_v20, %s9288_s1 }
 0xb6e   : > { %v5090_v31 = vpop.xlane.xlu0 %5089 }
 0xb6f   : > { %v5100_v21 = vsub.f32 %v5084_v5, %v5090_v31 }
 0xb71   : > { %v5104_v23 = vmul.f32 1.442695, %v5100_v21 }
 0xb72   : > { %v5093_v24 = vpop.xlane.xlu1 %5092 }
 0xb73   : > { %8806 = vpow2.f32 %v5104_v23  ;;  %v5101_v25 = vsub.f32 %v5085_v12, %v5093_v24 }
 0xb75   : > { %v5106_v26 = vmul.f32 1.442695, %v5101_v25 }
 0xb76   : > { %v5096_v27 = vpop.xlane.xlu1 %5095  ;;  %v5099_v28 = vpop.xlane.xlu0 %5098 }
 0xb77   : > { %8808 = vpow2.f32 %v5106_v26  ;;  %v5102_v29 = vsub.f32 %v5086_v13, %v5096_v27  ;;  %v5103_v30 = vsub.f32 %v5087_v15, %v5099_v28 }
 0xb79   : > { %v5108_v32 = vmul.f32 1.442695, %v5102_v29  ;;  %v5110_v33 = vmul.f32 1.442695, %v5103_v30 }
 0xb7a   : > { %v4067_v37 = vpop.xlane.xlu0 %4066  ;;  %v4636_v46 = vpop.permute.xlu1 %4635 }
 0xb7b   : > { %8810 = vpow2.f32 %v5108_v32  ;;  %v4068_v44 = vmul.f32 0.032258064, %v4067_v37 }
 0xb7c   : > { %8812 = vpow2.f32 %v5110_v33 }
 0xb7d   : > { %v10421_v34 = vpop.eup %8806  ;;  %8814 = vrsqrt.f32 %v4068_v44  ;;  %vm4071_vm8 = vcmp.eq.f32.partialorder %v4068_v44, inf  ;;  %v4074_v54 = vand.u32 2147483648, %v4068_v44  ;;  %vm4073_vm9 = vcmp.eq.f32.partialorder %v4068_v44, 0.0 }
 0xb7e   : > { %v5112_v36 = vsel %vm1732_vm2, %v10421_v34, 0.0 }
 0xb7f   : > { %5113 = vadd.xlane.f32.xlu0 %v5112_v36 }
 0xb81   : > { %v10425_v38 = vpop.eup %8808 }
 0xb82   : > { %v5115_v39 = vsel %vm1732_vm2, %v10425_v38, 0.0 }
 0xb83   : > { %5116 = vadd.xlane.f32.xlu1 %v5115_v39 }
 0xb85   : > { %v10429_v40 = vpop.eup %8810 }
 0xb86   : > { %v10431_v42 = vpop.eup %8812  ;;  %v5118_v43 = vsel %vm1732_vm2, %v10429_v40, 0.0 }
 0xb87   : > { %5119 = vadd.xlane.f32.xlu0 %v5118_v43  ;;  %v5121_v35 = vsel %vm1732_vm2, %v10431_v42, 0.0  ;;  %v8815_v47 = vpop.eup %8814 }
 0xb88   : > { %5122 = vadd.xlane.f32.xlu1 %v5121_v35  ;;  %v4070_v51 = vmul.f32 %v8815_v47, %v4068_v44  ;;  %v5612_v47 = vld [vmem:[#allocation10 + $0x28] sm:$0xff] }
 0xb8a   : > { %v4072_v53 = vsel %vm4071_vm8, %v4068_v44, %v4070_v51  ;;  %v5611_v44 = vld [vmem:[#allocation10 + $0x20] sm:$0xff] }
 0xb8b   : > { %v4075_v2 = vsel %vm4073_vm9, %v4074_v54, %v4072_v53  ;;  %v5613_v53 = vld [vmem:[#allocation10 + $0x30] sm:$0xff] }
 0xb8c   : > { %v4076_v9 = vadd.f32 1e-06, %v4075_v2 }
 0xb99   : > { %4641 = vrot.lane.b32.xlu1 %v4339_v20, %s9289_s3 }
 0xb9d   : > { %4638 = vrot.lane.b32.xlu0 %v4339_v20, %s9290_s14 }
 0xc0c   : > { %v5114_v49 = vpop.xlane.xlu0 %5113 }
 0xc0d   : > { %8816 = vrcp.f32 %v5114_v49  ;;  %v5618_v49 = vld [vmem:[#allocation11 + $0x20] sm:$0xff] }
 0xc10   : > { %v5117_v50 = vpop.xlane.xlu1 %5116 }
 0xc11   : > { %8818 = vrcp.f32 %v5117_v50  ;;  %v5619_v50 = vld [vmem:[#allocation11 + $0x28] sm:$0xff] }
 0xc12   : > { %8820 = vrcp.f32 %v4076_v9 }
 0xc14   : > { %v5120_v52 = vpop.xlane.xlu0 %5119 }
 0xc15   : > { %v5123_v45 = vpop.xlane.xlu1 %5122  ;;  %8822 = vrcp.f32 %v5120_v52 }
 0xc16   : > { %8824 = vrcp.f32 %v5123_v45 }
 0xc17   : > { %v8817_v25 = vpop.eup %8816 }
 0xc18   : > { %v4639_v55 = vpop.permute.xlu0 %4638  ;;  %v5128_v35 = vmul.f32 %v8817_v25, %v10421_v34  ;;  %v8575_v34 = vpack.c.bf16 %v5612_v47, %v5611_v44 }
 0xc19   : > { %v4642_v56 = vpop.permute.xlu1 %4641  ;;  %v4644_v58 = vcombine.low %v4339_v20, %v4639_v55  ;;  %v4645_v60 = vcombine.high %v4339_v20, %v4639_v55 }
 0xc1a   : > { %v4660_v3 = vcombine.low %v4636_v46, %v4642_v56  ;;  %v4661_v4 = vcombine.high %v4636_v46, %v4642_v56  ;;  %v5614_v56 = vld [vmem:[#allocation10 + $0x38] sm:$0xff] }
 0xc1b   : > { %v4652_v5 = vrot.slane %v4644_v58, %v9928_v41  ;;  %v4659_v6 = vrot.slane %v4645_v60, %v9928_v41  ;;  %v8819_v29 = vpop.eup %8818  ;;  %v5620_v58 = vld [vmem:[#allocation11 + $0x30] sm:$0xff]  ;;  %v5621_v60 = vld [vmem:[#allocation11 + $0x38] sm:$0xff] }
 0xc1c   : > { %v4668_v7 = vrot.slane %v4660_v3, %v9928_v41  ;;  %v4675_v8 = vrot.slane %v4661_v4, %v9928_v41  ;;  %v8821_v43 = vpop.eup %8820  ;;  %v5129_v37 = vmul.f32 %v8819_v29, %v10425_v38  ;;  %v8581_v38 = vpack.c.bf16 %v5619_v50, %v5618_v49  ;;  %v7926_v4 = vld [vmem:[%s11079_s5 + $0x1] ss:$0 sm:$0xff]  ;;  %s11000_s5 = sshll.u32 %s9459_s28, 7 }
 0xc1d   : > { %v4078_v2 = vmul.f32 %v8821_v43, %v10405_v57  ;;  %v8584_v3 = vpack.c.bf16 %v5621_v60, %v5620_v58  ;;  %v7961_v29 = vld [vmem:[%s11081_s22 + $0x1] ss:$0 sm:$0xff] }
 0xc1e   : > { %v4676_v11 = vcombine.low %v4652_v5, %v4668_v7  ;;  %v4677_v12 = vcombine.high %v4652_v5, %v4668_v7  ;;  %v4692_v10 = vcombine.low %v4659_v6, %v4675_v8  ;;  %v4693_v59 = vcombine.high %v4659_v6, %v4675_v8  ;;  %v10492_v6 = vld [vmem:[%s11083_s29] sm:$0xff]  ;;  %s11086_s29 = sld [smem:[#allocation54_spill]] }
 0xc1f   : > { %v8823_v46 = vpop.eup %8822 }
 0xc20   : > { %v4684_v13 = vrot.slane %v4676_v11, %v9930_v48  ;;  %v4691_v14 = vrot.slane %v4677_v12, %v9930_v48  ;;  %v4700_v15 = vrot.slane %v4692_v10, %v9930_v48  ;;  %v4707_v16 = vrot.slane %v4693_v59, %v9930_v48  ;;  %v8825_v51 = vpop.eup %8824 }
 0xc21   : > { %v5131_v54 = vmul.f32 %v8825_v51, %v10431_v42  ;;  %v5130_v55 = vmul.f32 %v8823_v46, %v10429_v40  ;;  %v7925_v42 = vld [vmem:[%s11077_s0 + $0x1] ss:$0 sm:$0xff]  ;;  %v8578_v40 = vpack.c.bf16 %v5614_v56, %v5613_v53  ;;  %v5627_v53 = vld [vmem:[#allocation13 + $0x30] sm:$0xff] }
 0xc22   : > { %v4712_v17 = vcombine.low %v4684_v13, %v4691_v14  ;;  %v7937_v18 = vcombine.high %v4684_v13, %v4691_v14  ;;  %v4728_v19 = vcombine.low %v4700_v15, %v4707_v16  ;;  %v7938_v63 = vcombine.high %v4700_v15, %v4707_v16 }
 0xc23   : > { %v4085_v57 = vmul.f32 %v7925_v42, %v4078_v2 }
 0xc24   : > { %v4719_v62 = vrot.slane %v4712_v17, %v9928_v41  ;;  %v4727_v20 = vrot.slane %v7937_v18, %v9928_v41  ;;  %v4735_v31 = vrot.slane %v4728_v19, %v9928_v41  ;;  %v4743_v21 = vrot.slane %v7938_v63, %v9928_v41 }
 0xc25   : > { %v10484_v5 = vadd.f32 %v7926_v4, %v4085_v57 }
 0xc26   : > { %v4744_v23 = vcombine.low %v4719_v62, %v4727_v20  ;;  %v4745_v24 = vcombine.high %v4719_v62, %v4727_v20  ;;  %v4760_v26 = vcombine.low %v4735_v31, %v4743_v21  ;;  %v4761_v27 = vcombine.high %v4735_v31, %v4743_v21 }
 0xc28   : > { %v4752_v28 = vrot.slane %v4744_v23, %v9930_v48  ;;  %v4768_v30 = vrot.slane %v4760_v26, %v9930_v48  ;;  %v4759_v32 = vrot.slane %v4745_v24, %v9930_v48  ;;  %v4775_v33 = vrot.slane %v4761_v27, %v9930_v48 }
 0xc2a   : > { %v4776_v36 = vcombine.low %v4752_v28, %v4768_v30  ;;  %v4777_v39 = vcombine.high %v4752_v28, %v4768_v30  ;;  %v4778_v52 = vcombine.low %v4759_v32, %v4775_v33  ;;  %v4779_v45 = vcombine.high %v4759_v32, %v4775_v33  ;;  %v7959_v28 = vld [vmem:[%s11080_s16 + $0x1] ss:$0 sm:$0xff]  ;;  %s11093_s16 = sld [smem:[#allocation60_spill]] }
 0xc2b   : > { %v5625_v33 = vld [vmem:[#allocation13 + $0x20] sm:$0xff] }
 0xc2c   : > { %8368 = vmatpush3.msra.mxu0 %v4776_v36  ;;  %8373 = vmatpush3.msra.mxu1 %v4777_v39  ;;  %v5626_v36 = vld [vmem:[#allocation13 + $0x28] sm:$0xff] }
 0xc2d   : > { %8370 = vmatmul.mubr.msk.f32.vlgmr.msra.gmra.mrb[24].mxu0 %vm1732_vm2, %v5128_v35  ;;  %8375 = vmatmul.mubr.msk.f32.vlgmr.msra.gmra.mrb[34].mxu1 %vm1732_vm2, %v5129_v37  ;;  %v8587_v50 = vpack.c.bf16 %v5626_v36, %v5625_v33 }
 0xc2e   : > { %8377 = vmatprep.subr.mxu0 %v9287_v1  ;;  %8382 = vmatprep.subr.mxu1 %v9287_v1 }
 0xc2f   : > { %8378 = vmatpush3.msra.mxu0 %v4778_v52  ;;  %8383 = vmatpush3.msra.mxu1 %v4779_v45 }
 0xc30   : > { %8379 = vmatprep.mubr.msk.f32.mxu0 %vm9286_vm0, %v9287_v1  ;;  %8384 = vmatprep.mubr.msk.f32.mxu1 %vm9286_vm0, %v9287_v1 }
 0xc31   : > { %8574 = vmatprep.subr.bf16.mxu0 %v9285_v0  ;;  %8580 = vmatprep.subr.bf16.mxu1 %v9285_v0 }
 0xc32   : > { %8380 = vmatmul.mubr.msk.f32.vlgmr.msra.gmra.mrb[26].mxu0 %vm1732_vm2, %v5130_v55  ;;  %8385 = vmatmul.mubr.msk.f32.vlgmr.msra.gmra.mrb[36].mxu1 %vm1732_vm2, %v5131_v54  ;;  %v5628_v54 = vld [vmem:[#allocation13 + $0x38] sm:$0xff] }
 0xc33   : > { %8576 = vmatpush3.bf16.msra.mxu0 %v8575_v34  ;;  %8582 = vmatpush3.bf16.msra.mxu1 %v8581_v38  ;;  %v8590_v55 = vpack.c.bf16 %v5628_v54, %v5627_v53 }
 0xc34   : > { %8577 = vmatprep.subr.bf16.mxu0 %v9285_v0  ;;  %8583 = vmatprep.subr.bf16.mxu1 %v9285_v0 }
 0xc35   : > { %8395 = vmatprep.mubr.msk.f32.mxu0 %vm9286_vm0, %v9287_v1  ;;  %8406 = vmatprep.mubr.msk.f32.mxu1 %vm9286_vm0, %v9287_v1 }
 0xc37   : > { %8579 = vmatpush3.bf16.msra.mxu0 %v8578_v40  ;;  %8585 = vmatpush3.bf16.msra.mxu1 %v8584_v3 }
 0xc38   : > { %8586 = vmatprep.subr.bf16.mxu0 %v9285_v0  ;;  %8420 = vmatprep.subr.mxu1 %v9287_v1 }
 0xc3a   : > { %8396 = vmatmul.mubr.msk.f32.vlgmr.msra.gmra.mrb[28].mxu0 %vm1067_vm1, %v10484_v5  ;;  %8407 = vmatmul.mubr.msk.f32.vlgmr.msra.gmra.mrb[38].mxu1 %vm1067_vm1, %v10492_v6 }
 0xc3b   : > { %8417 = vmatprep.mubr.msk.f32.mxu0 %vm9286_vm0, %v9287_v1  ;;  %8422 = vmatprep.mubr.msk.f32.mxu1 %vm9286_vm0, %v9287_v1 }
 0xc3c   : > { %8588 = vmatpush3.bf16.msra.mxu0 %v8587_v50 }
 0xc3d   : > { %8589 = vmatprep.subr.bf16.mxu0 %v9285_v0 }
 0xc40   : > { %8591 = vmatpush3.bf16.msra.mxu0 %v8590_v55 }
 0xc41   : > { %8430 = vmatprep.subr.mxu0 %v9287_v1 }
 0xc43   : > { %8418 = vmatmul.mubr.msk.f32.vlgmr.msra.gmra.mrb[30].mxu0 %vm1067_vm1, %v10492_v6 }
 0xc44   : > { %8432 = vmatprep.mubr.msk.f32.mxu0 %vm9286_vm0, %v9287_v1 }
 0xd00   : > { %v5201_v7 = vpop.f32.mrb[24].mxu0  ;;  %v5274_v8 = vpop.f32.mrb[34].mxu1 }
 0xd01   : > { %v8371_v9 = vpop.f32.mrb[25].mxu0  ;;  %v8376_v11 = vpop.f32.mrb[35].mxu1 }
 0xd05   : > { %v5347_v12 = vpop.f32.mrb[26].mxu0  ;;  %v5420_v10 = vpop.f32.mrb[36].mxu1 }
 0xd06   : > { %v5424_v59 = vcombine.low %v5201_v7, %v5347_v12  ;;  %v5425_v13 = vcombine.high %v5201_v7, %v5347_v12  ;;  %v5440_v14 = vcombine.low %v5274_v8, %v5420_v10  ;;  %v5441_v15 = vcombine.high %v5274_v8, %v5420_v10  ;;  %v8381_v16 = vpop.f32.mrb[27].mxu0  ;;  %v8386_v17 = vpop.f32.mrb[37].mxu1 }
 0xd08   : > { %v5432_v18 = vrot.slane %v5424_v59, %v9928_v41  ;;  %v5439_v19 = vrot.slane %v5425_v13, %v9928_v41  ;;  %v5448_v63 = vrot.slane %v5440_v14, %v9928_v41  ;;  %v5455_v62 = vrot.slane %v5441_v15, %v9928_v41 }
 0xd0a   : > { %v5456_v20 = vcombine.low %v5432_v18, %v5448_v63  ;;  %v5457_v31 = vcombine.high %v5432_v18, %v5448_v63  ;;  %v5472_v21 = vcombine.low %v5439_v19, %v5455_v62  ;;  %v5473_v23 = vcombine.high %v5439_v19, %v5455_v62 }
 0xd0c   : > { %v5464_v24 = vrot.slane %v5456_v20, %v9930_v48  ;;  %v5471_v25 = vrot.slane %v5457_v31, %v9930_v48  ;;  %v5480_v26 = vrot.slane %v5472_v21, %v9930_v48  ;;  %v5487_v27 = vrot.slane %v5473_v23, %v9930_v48 }
 0xd0d   : > { %v5710_v30 = vpop.f32.mrb[28].mxu0  ;;  %v5787_v32 = vpop.f32.mrb[38].mxu1 }
 0xd0e   : > { %v5492_v39 = vcombine.low %v5464_v24, %v5471_v25  ;;  %v7951_v43 = vcombine.high %v5464_v24, %v5471_v25  ;;  %v5508_v35 = vcombine.low %v5480_v26, %v5487_v27  ;;  %v7952_v37 = vcombine.high %v5480_v26, %v5487_v27  ;;  %v8397_v44 = vpop.f32.mrb[29].mxu0  ;;  %v8408_v46 = vpop.f32.mrb[39].mxu1 }
 0xd0f   : > { %v5711_v47 = vadd.f32 %v7959_v28, %v5710_v30  ;;  %v5788_v49 = vadd.f32 %v7961_v29, %v5787_v32 }
 0xd10   : > { %v5499_v51 = vrot.slane %v5492_v39, %v9928_v41  ;;  %v5507_v52 = vrot.slane %v7951_v43, %v9928_v41  ;;  %v5515_v45 = vrot.slane %v5508_v35, %v9928_v41  ;;  %v5523_v34 = vrot.slane %v7952_v37, %v9928_v41 }
 0xd11   : > { %v5714_v38 = vmul.f32 0.35355338, %v5711_v47  ;;  %6014 = vrot.lane.b32.xlu1 %v5788_v49, %s9288_s1 }
 0xd12   : > { %v5525_v56 = vcombine.high %v5499_v51, %v5507_v52  ;;  %v5541_v58 = vcombine.high %v5515_v45, %v5523_v34  ;;  %v5524_v60 = vcombine.low %v5499_v51, %v5507_v52  ;;  %v5540_v2 = vcombine.low %v5515_v45, %v5523_v34 }
 0xd13   : > { %5868 = vrot.lane.b32.xlu0 %v5714_v38, %s9288_s1 }
 0xd14   : > { %v10522_v42 = vrot.slane %v5525_v56, %v9930_v48  ;;  %v10525_v40 = vrot.slane %v5541_v58, %v9930_v48  ;;  %v10528_v3 = vrot.slane %v5524_v60, %v9930_v48  ;;  %v10532_v57 = vrot.slane %v5540_v2, %v9930_v48 }
 0xd15   : > { %6020 = vrot.lane.b32.xlu1 %v5788_v49, %s9289_s3 }
 0xd16   : > { %v5558_v4 = vcombine.low %v10522_v42, %v10525_v40  ;;  %v5559_v7 = vcombine.high %v10522_v42, %v10525_v40  ;;  %v5557_v8 = vcombine.high %v10528_v3, %v10532_v57  ;;  %v5556_v9 = vcombine.low %v10528_v3, %v10532_v57 }
 0xd17   : > { %6017 = vrot.lane.b32.xlu0 %v5788_v49, %s9290_s14 }
 0xd19   : > { %5871 = vrot.lane.b32.xlu1 %v5714_v38, %s9290_s14 }
 0xd1b   : > { %5874 = vrot.lane.b32.xlu0 %v5714_v38, %s9289_s3 }
 0xd83   : > { %v6015_v11 = vpop.permute.xlu1 %6014 }
 0xd85   : > { %v5869_v12 = vpop.permute.xlu0 %5868 }
 0xd87   : > { %v6021_v10 = vpop.permute.xlu1 %6020 }
 0xd88   : > { %v6039_v59 = vcombine.low %v6015_v11, %v6021_v10  ;;  %v6040_v13 = vcombine.high %v6015_v11, %v6021_v10 }
 0xd89   : > { %v6018_v14 = vpop.permute.xlu0 %6017 }
 0xd8a   : > { %v6023_v15 = vcombine.low %v5788_v49, %v6018_v14  ;;  %v6024_v16 = vcombine.high %v5788_v49, %v6018_v14  ;;  %v6047_v18 = vrot.slane %v6039_v59, %v9928_v41  ;;  %v6054_v6 = vrot.slane %v6040_v13, %v9928_v41 }
 0xd8b   : > { %v5872_v17 = vpop.permute.xlu1 %5871 }
 0xd8c   : > { %v6031_v19 = vrot.slane %v6023_v15, %v9928_v41  ;;  %v6038_v63 = vrot.slane %v6024_v16, %v9928_v41  ;;  %v5877_v62 = vcombine.low %v5714_v38, %v5872_v17  ;;  %v5878_v20 = vcombine.high %v5714_v38, %v5872_v17 }
 0xd8d   : > { %v5875_v31 = vpop.permute.xlu0 %5874 }
 0xd8e   : > { %v6055_v21 = vcombine.low %v6031_v19, %v6047_v18  ;;  %v6056_v23 = vcombine.high %v6031_v19, %v6047_v18  ;;  %v6071_v24 = vcombine.low %v6038_v63, %v6054_v6  ;;  %v6072_v25 = vcombine.high %v6038_v63, %v6054_v6 }
 0xd8f   : > { %v5893_v26 = vcombine.low %v5869_v12, %v5875_v31  ;;  %v5894_v27 = vcombine.high %v5869_v12, %v5875_v31  ;;  %v5885_v33 = vrot.slane %v5877_v62, %v9928_v41  ;;  %v5892_v36 = vrot.slane %v5878_v20, %v9928_v41 }
 0xd90   : > { %v6063_v28 = vrot.slane %v6055_v21, %v9930_v48  ;;  %v6070_v29 = vrot.slane %v6056_v23, %v9930_v48  ;;  %v6079_v30 = vrot.slane %v6071_v24, %v9930_v48  ;;  %v6086_v32 = vrot.slane %v6072_v25, %v9930_v48 }
 0xd91   : > { %v5901_v39 = vrot.slane %v5893_v26, %v9928_v41  ;;  %v5908_v43 = vrot.slane %v5894_v27, %v9928_v41 }
 0xd92   : > { %v6091_v35 = vcombine.low %v6063_v28, %v6070_v29  ;;  %v7967_v37 = vcombine.high %v6063_v28, %v6070_v29  ;;  %v6107_v44 = vcombine.low %v6079_v30, %v6086_v32  ;;  %v7968_v46 = vcombine.high %v6079_v30, %v6086_v32 }
 0xd93   : > { %v5909_v47 = vcombine.low %v5885_v33, %v5901_v39  ;;  %v5910_v49 = vcombine.high %v5885_v33, %v5901_v39  ;;  %v5925_v50 = vcombine.low %v5892_v36, %v5908_v43  ;;  %v5926_v51 = vcombine.high %v5892_v36, %v5908_v43  ;;  %v5863_v43 = vpop.f32.mrb[30].mxu0 }
 0xd94   : > { %v6098_v52 = vrot.slane %v6091_v35, %v9928_v41  ;;  %v6106_v45 = vrot.slane %v7967_v37, %v9928_v41  ;;  %v6114_v34 = vrot.slane %v6107_v44, %v9928_v41  ;;  %v6122_v38 = vrot.slane %v7968_v46, %v9928_v41  ;;  %v8419_v35 = vpop.f32.mrb[31].mxu0 }
 0xd95   : > { %v5917_v53 = vrot.slane %v5909_v47, %v9930_v48  ;;  %v5924_v54 = vrot.slane %v5910_v49, %v9930_v48  ;;  %v5933_v55 = vrot.slane %v5925_v50, %v9930_v48  ;;  %v5940_v56 = vrot.slane %v5926_v51, %v9930_v48 }
 0xd96   : > { %v6123_v58 = vcombine.low %v6098_v52, %v6106_v45  ;;  %v6124_v60 = vcombine.high %v6098_v52, %v6106_v45  ;;  %v6139_v2 = vcombine.low %v6114_v34, %v6122_v38  ;;  %v6140_v11 = vcombine.high %v6114_v34, %v6122_v38 }
 0xd97   : > { %v5945_v12 = vcombine.low %v5917_v53, %v5924_v54  ;;  %v7965_v10 = vcombine.high %v5917_v53, %v5924_v54  ;;  %v5961_v59 = vcombine.low %v5933_v55, %v5940_v56  ;;  %v7966_v13 = vcombine.high %v5933_v55, %v5940_v56 }
 0xd98   : > { %v6131_v14 = vrot.slane %v6123_v58, %v9930_v48  ;;  %v6147_v15 = vrot.slane %v6139_v2, %v9930_v48  ;;  %v6138_v16 = vrot.slane %v6124_v60, %v9930_v48  ;;  %v6154_v17 = vrot.slane %v6140_v11, %v9930_v48  ;;  %v7963_v60 = vld [vmem:[%s11082_s9 + $0x1] ss:$0 sm:$0xff]  ;;  %s1032_s9 = scalar_lea.vmem [#allocation19], %s9811_s12 }
 0xd99   : > { %v5952_v18 = vrot.slane %v5945_v12, %v9928_v41  ;;  %v5960_v6 = vrot.slane %v7965_v10, %v9928_v41  ;;  %v5968_v19 = vrot.slane %v5961_v59, %v9928_v41  ;;  %v5976_v63 = vrot.slane %v7966_v13, %v9928_v41  ;;  %s7586_s10 = sshll.u32 %s1032_s9, 4  ;;  %s10828_s10 = int_to_ptr.vmem [resolvable:$true] %s7586_s10 }
 0xd9a   : > { %v6155_v62 = vcombine.low %v6131_v14, %v6147_v15  ;;  %v6157_v20 = vcombine.low %v6138_v16, %v6154_v17  ;;  %v6156_v32 = vcombine.high %v6131_v14, %v6147_v15  ;;  %v6158_v36 = vcombine.high %v6138_v16, %v6154_v17  ;;  %s9147_s0 = scalar_lea.vmem %s10828_s10, 128 }
 0xd9b   : > { %v5977_v31 = vcombine.low %v5952_v18, %v5960_v6  ;;  %v5978_v21 = vcombine.high %v5952_v18, %v5960_v6  ;;  %v5993_v23 = vcombine.low %v5968_v19, %v5976_v63  ;;  %v5994_v24 = vcombine.high %v5968_v19, %v5976_v63  ;;  %p9148_p8 = scmp.ne.s32.totalorder %s10828_s10, %s9147_s0 }
 0xd9c   : > { %8421 = vmatpush3.xpose.msk.msra.mxu1 %vm1732_vm2, %v6155_v62  ;;  %8431 = vmatpush3.xpose.msk.msra.mxu0 %vm1732_vm2, %v6157_v20  ;;  %v5864_v2 = vadd.f32 %v7963_v60, %v5863_v43 }
 0xd9d   : > { %8425 = vmatprep.subr.mxu1 %v9287_v1  ;;  %v5985_v25 = vrot.slane %v5977_v31, %v9930_v48  ;;  %v6001_v26 = vrot.slane %v5993_v23, %v9930_v48  ;;  %v5992_v27 = vrot.slane %v5978_v21, %v9930_v48  ;;  %v6008_v28 = vrot.slane %v5994_v24, %v9930_v48 }
 0xd9e   : > { %8440 = vmatprep.subr.mxu0 %v9287_v1 }
 0xd9f   : > { %v6009_v29 = vcombine.low %v5985_v25, %v6001_v26  ;;  %v6011_v30 = vcombine.low %v5992_v27, %v6008_v28  ;;  %v6010_v33 = vcombine.high %v5985_v25, %v6001_v26  ;;  %v6012_v39 = vcombine.high %v5992_v27, %v6008_v28 }
 0xda1   : > { %8423 = vmatmul.mubr.msk.f32.vlgmr.msra.gmra.mrb[40].mxu1 %vm1732_vm2, %v6009_v29  ;;  %8433 = vmatmul.mubr.msk.f32.vlgmr.msra.gmra.mrb[32].mxu0 %vm1732_vm2, %v6011_v30 }
 0xda2   : > { %8426 = vmatpush3.xpose.msk.msra.mxu1 %vm1732_vm2, %v6156_v32  ;;  %8427 = vmatprep.mubr.msk.f32.mxu1 %vm9286_vm0, %v9287_v1 }
 0xda3   : > { %8435 = vmatprep.subr.mxu1 %v9287_v1  ;;  %8442 = vmatprep.mubr.msk.f32.mxu0 %vm9286_vm0, %v9287_v1 }
 0xda5   : > { %8428 = vmatmul.mubr.msk.f32.vlgmr.msra.gmra.mrb[42].mxu1 %vm1732_vm2, %v6010_v33 }
 0xda6   : > { %8436 = vmatpush3.xpose.msk.msra.mxu1 %vm1732_vm2, %v6158_v36  ;;  %8437 = vmatprep.mubr.msk.f32.mxu1 %vm9286_vm0, %v9287_v1 }
 0xda7   : > { %8445 = vmatprep.subr.mxu1 %v9287_v1 }
 0xda9   : > { %8438 = vmatmul.mubr.msk.f32.vlgmr.msra.gmra.mrb[44].mxu1 %vm1732_vm2, %v6012_v39 }
 0xdaa   : > { %8447 = vmatprep.mubr.msk.f32.mxu1 %vm9286_vm0, %v9287_v1 }
 0xe74   : > { %v6377_v37 = vpop.f32.mrb[40].mxu1  ;;  %v6529_v44 = vpop.f32.mrb[32].mxu0 }
 0xe75   : > { %v6609_v46 = vsel %vm1043_vm3, %v6377_v37, -1e+09  ;;  %v8424_v47 = vpop.f32.mrb[41].mxu1  ;;  %v8434_v49 = vpop.f32.mrb[33].mxu0  ;;  %v6611_v38 = vsel %vm1043_vm3, %v6529_v44, -1e+09 }
 0xe76   : > { %v6613_v50 = vsel %vm1732_vm2, %v6609_v46, -inf  ;;  %v6619_v56 = vsel %vm1732_vm2, %v6611_v38, -inf }
 0xe77   : > { %6614 = vmax.xlane.f32.xlu1 %v6613_v50 }
 0xe78   : > { %v6453_v51 = vpop.f32.mrb[42].mxu1 }
 0xe79   : > { %v6610_v52 = vsel %vm1043_vm3, %v6453_v51, -1e+09  ;;  %v8429_v45 = vpop.f32.mrb[43].mxu1 }
 0xe7a   : > { %v6616_v34 = vsel %vm1732_vm2, %v6610_v52, -inf }
 0xe7b   : > { %6617 = vmax.xlane.f32.xlu0 %v6616_v34 }
 0xe7c   : > { %v6605_v53 = vpop.f32.mrb[44].mxu1 }
 0xe7d   : > { %v6612_v54 = vsel %vm1043_vm3, %v6605_v53, -1e+09  ;;  %v8439_v55 = vpop.f32.mrb[45].mxu1 }
 0xe7e   : > { %v6622_v58 = vsel %vm1732_vm2, %v6612_v54, -inf }
 0xe7f   : > { %6620 = vmax.xlane.f32.xlu0 %v6619_v56  ;;  %6623 = vmax.xlane.f32.xlu1 %v6622_v58 }
 0xe90   : > { %6163 = vrot.lane.b32.xlu1 %v5864_v2, %s9290_s14  ;;  %s11084_s14 = smov 24  }
 0xf04   : > { %v6615_v11 = vpop.xlane.xlu1 %6614 }
 0xf05   : > { %v6625_v12 = vsub.f32 %v6609_v46, %v6615_v11 }
 0xf07   : > { %v6629_v10 = vmul.f32 1.442695, %v6625_v12 }
 0xf08   : > { %v6618_v59 = vpop.xlane.xlu0 %6617 }
 0xf09   : > { %8826 = vpow2.f32 %v6629_v10  ;;  %v6626_v61 = vsub.f32 %v6610_v52, %v6618_v59 }
 0xf0b   : > { %v6631_v13 = vmul.f32 1.442695, %v6626_v61 }
 0xf0c   : > { %v6621_v14 = vpop.xlane.xlu0 %6620  ;;  %v6624_v15 = vpop.xlane.xlu1 %6623 }
 0xf0d   : > { %8828 = vpow2.f32 %v6631_v13  ;;  %v6627_v16 = vsub.f32 %v6611_v38, %v6621_v14  ;;  %v6628_v17 = vsub.f32 %v6612_v54, %v6624_v15 }
 0xf0f   : > { %v6633_v18 = vmul.f32 1.442695, %v6627_v16  ;;  %v6635_v6 = vmul.f32 1.442695, %v6628_v17 }
 0xf10   : > { %v6164_v25 = vpop.permute.xlu1 %6163 }
 0xf11   : > { %8830 = vpow2.f32 %v6633_v18  ;;  %v6169_v30 = vcombine.low %v5864_v2, %v6164_v25  ;;  %v6170_v32 = vcombine.high %v5864_v2, %v6164_v25 }
 0xf12   : > { %8832 = vpow2.f32 %v6635_v6 }
 0xf13   : > { %v10618_v19 = vpop.eup %8826  ;;  %v6177_v43 = vrot.slane %v6169_v30, %v9928_v41 }
 0xf14   : > { %v6637_v63 = vsel %vm1732_vm2, %v10618_v19, 0.0 }
 0xf15   : > { %6638 = vadd.xlane.f32.xlu0 %v6637_v63 }
 0xf17   : > { %v10622_v62 = vpop.eup %8828 }
 0xf18   : > { %v6640_v20 = vsel %vm1732_vm2, %v10622_v62, 0.0 }
 0xf19   : > { %6641 = vadd.xlane.f32.xlu1 %v6640_v20 }
 0xf1b   : > { %v10626_v31 = vpop.eup %8830 }
 0xf1c   : > { %v10628_v21 = vpop.eup %8832  ;;  %v6643_v23 = vsel %vm1732_vm2, %v10626_v31, 0.0 }
 0xf1d   : > { %6644 = vadd.xlane.f32.xlu0 %v6643_v23  ;;  %v6646_v24 = vsel %vm1732_vm2, %v10628_v21, 0.0 }
 0xf1e   : > { %6647 = vadd.xlane.f32.xlu1 %v6646_v24 }
 0xf2f   : > { %6166 = vrot.lane.b32.xlu1 %v5864_v2, %s9289_s3  ;;  %s11089_s3 = sld [smem:[#allocation34_spill]] }
 0xf33   : > { %5565 = vrot.lane.b32.xlu1 %v5558_v4, %s9294_s13  ;;  %6160 = vrot.lane.b32.xlu0 %v5864_v2, %s9288_s1 }
 0xf35   : > { %p11094_p7 = scmp.ne.s32.totalorder %s11089_s3, 0 }
 0xf37   : > { %5561 = vrot.lane.b32.xlu0 %v5557_v8, %s9293_s11  ;;  %v6184_v8 = vrot.slane %v6170_v32, %v9928_v41  ;;  %p9149_p9 = pnand %p9148_p8, %p11094_p7 }
 0xf39   : > { %p9150_p11 = pneg %p9149_p9 }
 0xf3b   : > { %5569 = vrot.lane.b32.xlu0 %v5559_v7, %s11084_s14 }
 0xfa2   : > { %v6639_v26 = vpop.xlane.xlu0 %6638 }
 0xfa3   : > { %8834 = vrcp.f32 %v6639_v26 }
 0xfa6   : > { %v6642_v27 = vpop.xlane.xlu1 %6641 }
 0xfa7   : > { %8836 = vrcp.f32 %v6642_v27 }
 0xfaa   : > { %v6645_v28 = vpop.xlane.xlu0 %6644 }
 0xfab   : > { %v6648_v29 = vpop.xlane.xlu1 %6647  ;;  %8838 = vrcp.f32 %v6645_v28 }
 0xfac   : > { %8840 = vrcp.f32 %v6648_v29 }
 0xfad   : > { %v8835_v60 = vpop.eup %8834 }
 0xfae   : > { %v6161_v4 = vpop.permute.xlu0 %6160  ;;  %v6653_v17 = vmul.f32 %v8835_v60, %v10618_v19 }
 0xfaf   : > { %v6167_v33 = vpop.permute.xlu1 %6166 }
 0xfb0   : > { %v6185_v36 = vcombine.low %v6161_v4, %v6167_v33  ;;  %v6186_v39 = vcombine.high %v6161_v4, %v6167_v33 }
 0xfb1   : > { %v8837_v10 = vpop.eup %8836 }
 0xfb2   : > { %v6193_v35 = vrot.slane %v6185_v36, %v9928_v41  ;;  %v6200_v42 = vrot.slane %v6186_v39, %v9928_v41  ;;  %v6654_v18 = vmul.f32 %v8837_v10, %v10622_v62 }
 0xfb4   : > { %v6201_v40 = vcombine.low %v6177_v43, %v6193_v35  ;;  %v6202_v7 = vcombine.high %v6177_v43, %v6193_v35  ;;  %v6217_v37 = vcombine.low %v6184_v8, %v6200_v42  ;;  %v6218_v44 = vcombine.high %v6184_v8, %v6200_v42 }
 0xfb5   : > { %v8839_v16 = vpop.eup %8838 }
 0xfb6   : > { %v6209_v46 = vrot.slane %v6201_v40, %v9930_v48  ;;  %v6216_v47 = vrot.slane %v6202_v7, %v9930_v48  ;;  %v6225_v49 = vrot.slane %v6217_v37, %v9930_v48  ;;  %v6232_v50 = vrot.slane %v6218_v44, %v9930_v48  ;;  %v8841_v6 = vpop.eup %8840 }
 0xfb7   : > { %v6655_v23 = vmul.f32 %v8839_v16, %v10626_v31  ;;  %v6656_v24 = vmul.f32 %v8841_v6, %v10628_v21 }
 0xfb8   : > { %v6237_v51 = vcombine.low %v6209_v46, %v6216_v47  ;;  %v7969_v52 = vcombine.high %v6209_v46, %v6216_v47  ;;  %v6253_v45 = vcombine.low %v6225_v49, %v6232_v50  ;;  %v7970_v34 = vcombine.high %v6225_v49, %v6232_v50 }
 0xfba   : > { %v6244_v38 = vrot.slane %v6237_v51, %v9928_v41  ;;  %v6252_v53 = vrot.slane %v7969_v52, %v9928_v41  ;;  %v6260_v54 = vrot.slane %v6253_v45, %v9928_v41  ;;  %v6268_v55 = vrot.slane %v7970_v34, %v9928_v41 }
 0xfbc   : > { %v6269_v56 = vcombine.low %v6244_v38, %v6252_v53  ;;  %v6270_v58 = vcombine.high %v6244_v38, %v6252_v53  ;;  %v6285_v2 = vcombine.low %v6260_v54, %v6268_v55  ;;  %v6286_v11 = vcombine.high %v6260_v54, %v6268_v55 }
 0xfbe   : > { %v6277_v12 = vrot.slane %v6269_v56, %v9930_v48  ;;  %v6293_v59 = vrot.slane %v6285_v2, %v9930_v48  ;;  %v6284_v61 = vrot.slane %v6270_v58, %v9930_v48  ;;  %v6300_v13 = vrot.slane %v6286_v11, %v9930_v48 }
 0xfc0   : > { %v6301_v14 = vcombine.low %v6277_v12, %v6293_v59  ;;  %v6302_v15 = vcombine.high %v6277_v12, %v6293_v59  ;;  %v6303_v63 = vcombine.low %v6284_v61, %v6300_v13  ;;  %v6304_v20 = vcombine.high %v6284_v61, %v6300_v13 }
 0xfc2   : > { %8441 = vmatpush3.msra.mxu0 %v6301_v14  ;;  %8446 = vmatpush3.msra.mxu1 %v6302_v15  ;;  %v5566_v14 = vpop.permute.xlu1 %5565 }
 0xfc3   : > { %8443 = vmatmul.mubr.msk.f32.vlgmr.msra.gmra.mrb[34].mxu0 %vm1732_vm2, %v6653_v17  ;;  %8448 = vmatmul.mubr.msk.f32.vlgmr.msra.gmra.mrb[46].mxu1 %vm1732_vm2, %v6654_v18 }
 0xfc4   : > { %8450 = vmatprep.subr.mxu0 %v9287_v1  ;;  %8455 = vmatprep.subr.mxu1 %v9287_v1 }
 0xfc5   : > { %8451 = vmatpush3.msra.mxu0 %v6303_v63  ;;  %8456 = vmatpush3.msra.mxu1 %v6304_v20 }
 0xfc6   : > { %8452 = vmatprep.mubr.msk.f32.mxu0 %vm9286_vm0, %v9287_v1  ;;  %8457 = vmatprep.mubr.msk.f32.mxu1 %vm9286_vm0, %v9287_v1 }
 0xfc7   : > { %8453 = vmatmul.mubr.msk.f32.vlgmr.msra.gmra.mrb[36].mxu0 %vm1732_vm2, %v6655_v23  ;;  %8458 = vmatmul.mubr.msk.f32.vlgmr.msra.gmra.mrb[48].mxu1 %vm1732_vm2, %v6656_v24 }
 0xfc8   : > { %8592 = vmatprep.subr.bf16.mxu0 %v9285_v0  ;;  %8468 = vmatprep.mubr.msk.f32.mxu0 %vm9286_vm0, %v9287_v1 }
 0xfc9   : > { %8598 = vmatprep.subr.bf16.mxu1 %v9285_v0  ;;  %8487 = vmatprep.mubr.msk.f32.mxu1 %vm9286_vm0, %v9287_v1 }
0x1096   : > { %v6726_v19 = vpop.f32.mrb[34].mxu0  ;;  %v6799_v62 = vpop.f32.mrb[46].mxu1 }
0x1097   : > { %v8444_v31 = vpop.f32.mrb[35].mxu0  ;;  %v8449_v21 = vpop.f32.mrb[47].mxu1 }
0x109a   : > { %v6872_v25 = vpop.f32.mrb[36].mxu0  ;;  %v6945_v26 = vpop.f32.mrb[48].mxu1 }
0x109b   : > { %v6949_v27 = vcombine.low %v6726_v19, %v6872_v25  ;;  %v6950_v28 = vcombine.high %v6726_v19, %v6872_v25  ;;  %v6965_v29 = vcombine.low %v6799_v62, %v6945_v26  ;;  %v6966_v30 = vcombine.high %v6799_v62, %v6945_v26  ;;  %v8454_v32 = vpop.f32.mrb[37].mxu0  ;;  %v8459_v4 = vpop.f32.mrb[49].mxu1  ;;  %v7137_v25 = vld [vmem:[#allocation16] sm:$0xff]  ;;  %v7138_v26 = vld [vmem:[#allocation16 + $0x8] sm:$0xff] }
0x109d   : > { %v6957_v33 = vrot.slane %v6949_v27, %v9928_v41  ;;  %v6964_v36 = vrot.slane %v6950_v28, %v9928_v41  ;;  %v6973_v39 = vrot.slane %v6965_v29, %v9928_v41  ;;  %v6980_v43 = vrot.slane %v6966_v30, %v9928_v41  ;;  %v7139_v27 = vld [vmem:[#allocation16 + $0x10] sm:$0xff]  ;;  %v7140_v29 = vld [vmem:[#allocation16 + $0x18] sm:$0xff] }
0x109e   : > { %v8593_v28 = vpack.c.bf16 %v7138_v26, %v7137_v25  ;;  %v8596_v30 = vpack.c.bf16 %v7140_v29, %v7139_v27 }
0x109f   : > { %v6981_v8 = vcombine.low %v6957_v33, %v6973_v39  ;;  %v6982_v35 = vcombine.high %v6957_v33, %v6973_v39  ;;  %v6997_v42 = vcombine.low %v6964_v36, %v6980_v43  ;;  %v6998_v40 = vcombine.high %v6964_v36, %v6980_v43 }
0x10a0   : > { %8594 = vmatpush3.bf16.msra.mxu0 %v8593_v28 }
0x10a1   : > { %v6989_v7 = vrot.slane %v6981_v8, %v9930_v48  ;;  %v6996_v37 = vrot.slane %v6982_v35, %v9930_v48  ;;  %v7005_v44 = vrot.slane %v6997_v42, %v9930_v48  ;;  %v7012_v46 = vrot.slane %v6998_v40, %v9930_v48  ;;  %8595 = vmatprep.subr.bf16.mxu0 %v9285_v0 }
0x10a3   : > { %v7017_v47 = vcombine.low %v6989_v7, %v6996_v37  ;;  %v7983_v49 = vcombine.high %v6989_v7, %v6996_v37  ;;  %v7033_v50 = vcombine.low %v7005_v44, %v7012_v46  ;;  %v7984_v51 = vcombine.high %v7005_v44, %v7012_v46 }
0x10a4   : > { %8597 = vmatpush3.bf16.msra.mxu0 %v8596_v30 }
0x10a5   : > { %v7024_v52 = vrot.slane %v7017_v47, %v9928_v41  ;;  %v7032_v45 = vrot.slane %v7983_v49, %v9928_v41  ;;  %v7040_v34 = vrot.slane %v7033_v50, %v9928_v41  ;;  %v7048_v38 = vrot.slane %v7984_v51, %v9928_v41  ;;  %v5562_v41 = vpop.permute.xlu0 %5561  ;;  %8610 = vmatprep.subr.bf16.mxu0 %v9285_v0 }
0x10a6   : > { %v5572_v13 = vsel %vm1732_vm2, %v5556_v9, %v5562_v41 }
0x10a7   : > { %v7050_v53 = vcombine.high %v7024_v52, %v7032_v45  ;;  %v7066_v54 = vcombine.high %v7040_v34, %v7048_v38  ;;  %v7049_v55 = vcombine.low %v7024_v52, %v7032_v45  ;;  %v7065_v56 = vcombine.low %v7040_v34, %v7048_v38 }
0x10a9   : > { %v7064_v58 = vrot.slane %v7050_v53, %v9930_v48  ;;  %v7080_v60 = vrot.slane %v7066_v54, %v9930_v48  ;;  %v7057_v2 = vrot.slane %v7049_v55, %v9930_v48  ;;  %v7073_v11 = vrot.slane %v7065_v56, %v9930_v48  ;;  %v5570_v15 = vpop.permute.xlu0 %5569  ;;  %v7953_v53 = vld [vmem:[%s11086_s29] ss:$0 sm:$0xff] }
0x10aa   : > { %v5573_v48 = vsel %vm2528_vm4, %v5572_v13, %v5566_v14  ;;  %v7954_v55 = vld [vmem:[#allocation14] ss:$0 sm:$0xff] }
0x10ab   : > { %v7083_v12 = vcombine.low %v7064_v58, %v7080_v60  ;;  %v7082_v10 = vcombine.high %v7057_v2, %v7073_v11  ;;  %v7084_v59 = vcombine.high %v7064_v58, %v7080_v60  ;;  %v7081_v61 = vcombine.low %v7057_v2, %v7073_v11  ;;  %v7351_v58 = vld [vmem:[#allocation16 + $0x20] sm:$0xff]  ;;  %v7352_v60 = vld [vmem:[#allocation16 + $0x28] sm:$0xff] }
0x10ac   : > { %v5574_v16 = vsel %vm2530_vm5, %v5573_v48, %v5570_v15  ;;  %v7135_v2 = vld [vmem:[%s11087_s17] sm:$0xff]  ;;  %s11091_s17 = smov %s11090_s7 }
0x10ad   : > { %7090 = vrot.lane.b32.xlu0 %v7083_v12, %s9294_s13  ;;  %7086 = vrot.lane.b32.xlu1 %v7082_v10, %s9293_s11  ;;  %v5575_v17 = vadd.f32 %v5574_v16, %v10294_v22  ;;  %s11085_s11 = sld [smem:[#allocation56_spill]]  ;;  %v8611_v12 = vpack.c.bf16 %v7352_v60, %v7351_v58  ;;  %s7568_s13 = scalar_lea.sflag [#allocation4], %s9808_s6 }
0x10af   : > { %v5576_v18 = vsel %vm1067_vm1, %v5575_v17, 0.0 }
0x10b1   : > { %7094 = vrot.lane.b32.xlu1 %v7084_v59, %s11084_s14  ;;  %v7353_v59 = vld [vmem:[#allocation16 + $0x30] sm:$0xff] }
0x10b3   : > { %v7142_v8 = vld [vmem:[%s11085_s11] sm:$0xff]  ;;  %v7143_v35 = vld [vmem:[%s11085_s11 + $0x8] sm:$0xff]  ;;  %v7144_v42 = vld [vmem:[%s11085_s11 + $0x10] sm:$0xff] }
0x10b4   : > { %v8599_v40 = vpack.c.bf16 %v7143_v35, %v7142_v8  ;;  %v7145_v7 = vld [vmem:[%s11085_s11 + $0x18] sm:$0xff]  ;;  %v7146_v44 = vld [vmem:[%s11085_s11 + $0x20] sm:$0xff]  ;;  %v7147_v46 = vld [vmem:[%s11085_s11 + $0x28] sm:$0xff] }
0x10b5   : > { %v8602_v37 = vpack.c.bf16 %v7145_v7, %v7144_v42  ;;  %v8605_v47 = vpack.c.bf16 %v7147_v46, %v7146_v44  ;;  %v7995_v26 = vld [vmem:[%s11085_s11 + $0x50] sm:$0xff]  ;;  %v7996_v27 = vld [vmem:[%s11085_s11 + $0x58] sm:$0xff]  ;;  %v7997_v29 = vld [vmem:[%s11085_s11 + $0x60] sm:$0xff] }
0x10b6   : > { %8600 = vmatpush3.bf16.msra.mxu1 %v8599_v40  ;;  %v8620_v28 = vpack.c.bf16 %v7996_v27, %v7995_v26  ;;  %v7998_v30 = vld [vmem:[%s11085_s11 + $0x68] sm:$0xff]  ;;  %v8004_v35 = vld [vmem:[#allocation17 + $0x1] ss:$0 sm:$0xff] }
0x10b7   : > { %8601 = vmatprep.subr.bf16.mxu1 %v9285_v0 }
0x10ba   : > { %8603 = vmatpush3.bf16.msra.mxu1 %v8602_v37  ;;  %v7989_v37 = vld [vmem:[%s11088_s18] ss:$0 sm:$0xff] }
0x10bb   : > { %8604 = vmatprep.subr.bf16.mxu1 %v9285_v0 }
0x10be   : > { %8606 = vmatpush3.bf16.msra.mxu1 %v8605_v47 }
0x10bf   : > { %8607 = vmatprep.subr.bf16.mxu1 %v9285_v0 }
0x10cc   : > { %5577 = vadd.xlane.f32.xlu0 %v5576_v18 }
0x111f   : > { %v7087_v6 = vpop.permute.xlu1 %7086  ;;  %v7091_v63 = vpop.permute.xlu0 %7090 }
0x1120   : > { %v7097_v20 = vsel %vm1732_vm2, %v7081_v61, %v7087_v6  ;;  %v7354_v61 = vld [vmem:[#allocation16 + $0x38] sm:$0xff] }
0x1121   : > { %v7098_v3 = vsel %vm2528_vm4, %v7097_v20, %v7091_v63  ;;  %v8614_v41 = vpack.c.bf16 %v7354_v61, %v7353_v59  ;;  %v7985_v20 = vld [vmem:[%s11086_s29 + $0x1] ss:$0 sm:$0xff] }
0x1123   : > { %v7095_v23 = vpop.permute.xlu1 %7094 }
0x1124   : > { %v7099_v57 = vsel %vm2530_vm5, %v7098_v3, %v7095_v23  ;;  %v7148_v23 = vld [vmem:[%s11085_s11 + $0x30] sm:$0xff]  ;;  %v7149_v3 = vld [vmem:[%s11085_s11 + $0x38] sm:$0xff] }
0x1125   : > { %v7100_v9 = vadd.f32 %v7099_v57, %v10484_v5 }
0x1127   : > { %v7101_v24 = vsel %vm1067_vm1, %v7100_v9, 0.0 }
0x1128   : > { %7102 = vadd.xlane.f32.xlu1 %v7101_v24  ;;  %v7986_v24 = vld [vmem:[#allocation14 + $0x1] ss:$0 sm:$0xff] }
0x1159   : > { %v5578_v19 = vpop.xlane.xlu0 %5577 }
0x115a   : > { %v5579_v62 = vmul.f32 0.03125, %v5578_v19 }
0x115c   : > { %v5580_v22 = vsub.f32 %v5575_v17, %v5579_v62 }
0x115e   : > { %v5581_v31 = vmul.f32 %v5580_v22, %v5580_v22 }
0x1160   : > { %v5582_v21 = vsel %vm1067_vm1, %v5581_v31, 0.0  ;;  %v7994_v31 = vld [vmem:[%s11085_s11 + $0x48] sm:$0xff] }
0x1161   : > { %5583 = vadd.xlane.f32.xlu0 %v5582_v21 }
0x11b5   : > { %v7103_v5 = vpop.xlane.xlu1 %7102 }
0x11b6   : > { %v7104_v32 = vmul.f32 0.03125, %v7103_v5  ;;  %v8623_v5 = vpack.c.bf16 %v7998_v30, %v7997_v29 }
0x11b8   : > { %v10719_v4 = vsub.f32 %v7100_v9, %v7104_v32  ;;  %v8608_v9 = vpack.c.bf16 %v7149_v3, %v7148_v23  ;;  %v8000_v32 = vld [vmem:[%s11085_s11 + $0x78] sm:$0xff] }
0x11ba   : > { %v7106_v33 = vmul.f32 %v10719_v4, %v10719_v4  ;;  %8609 = vmatpush3.bf16.msra.mxu1 %v8608_v9 }
0x11bc   : > { %v7107_v36 = vsel %vm1067_vm1, %v7106_v33, 0.0  ;;  %v7987_v33 = vld [vmem:[#allocation17] ss:$0 sm:$0xff] }
0x11bd   : > { %7108 = vadd.xlane.f32.xlu0 %v7107_v36 }
0x11ee   : > { %v5584_v39 = vpop.xlane.xlu0 %5583 }
0x11ef   : > { %v5585_v43 = vmul.f32 0.032258064, %v5584_v39 }
0x11f1   : > { %8842 = vrsqrt.f32 %v5585_v43  ;;  %vm5588_vm10 = vcmp.eq.f32.partialorder %v5585_v43, inf  ;;  %v5591_v51 = vand.u32 2147483648, %v5585_v43  ;;  %vm5590_vm11 = vcmp.eq.f32.partialorder %v5585_v43, 0.0 }
0x11fb   : > { %v8843_v49 = vpop.eup %8842 }
0x11fc   : > { %v5587_v50 = vmul.f32 %v8843_v49, %v5585_v43 }
0x11fe   : > { %v5589_v52 = vsel %vm5588_vm10, %v5585_v43, %v5587_v50 }
0x11ff   : > { %v5592_v45 = vsel %vm5590_vm11, %v5591_v51, %v5589_v52  ;;  %v8006_v51 = vld [vmem:[%s11088_s18 + $0x1] ss:$0 sm:$0xff]  ;;  %s10826_s18 = scalar_lea.hbm %s11093_s16, %s11000_s5 }
0x1200   : > { %v5593_v34 = vadd.f32 1e-06, %v5592_v45 }
0x1202   : > { %8844 = vrcp.f32 %v5593_v34 }
0x120c   : > { %v8845_v38 = vpop.eup %8844 }
0x120d   : > { %v5595_v54 = vmul.f32 %v8845_v38, %v5580_v22  ;;  %v7993_v22 = vld [vmem:[%s11085_s11 + $0x40] sm:$0xff] }
0x120e   : > { %v8617_v21 = vpack.c.bf16 %v7994_v31, %v7993_v22 }
0x120f   : > { %v5602_v56 = vmul.f32 %v7953_v53, %v5595_v54 }
0x1211   : > { %v5609_v11 = vadd.f32 %v7954_v55, %v5602_v56 }
0x1213   : > { %v10750_v10 = vadd.f32 %v7135_v2, %v5609_v11 }
0x1215   : > { %8469 = vmatmul.mubr.msk.f32.vlgmr.msra.gmra.mrb[38].mxu0 %vm1067_vm1, %v10750_v10 }
0x1216   : > { %8612 = vmatpush3.bf16.msra.mxu0 %v8611_v12  ;;  %8498 = vmatprep.mubr.msk.f32.mxu0 %vm9286_vm0, %v9287_v1 }
0x1217   : > { %8613 = vmatprep.subr.bf16.mxu0 %v9285_v0 }
0x121a   : > { %8615 = vmatpush3.bf16.msra.mxu0 %v8614_v41 }
0x121b   : > { %8616 = vmatprep.subr.bf16.mxu0 %v9285_v0 }
0x124a   : > { %v7109_v13 = vpop.xlane.xlu0 %7108 }
0x124b   : > { %v7110_v14 = vmul.f32 0.032258064, %v7109_v13 }
0x124d   : > { %8846 = vrsqrt.f32 %v7110_v14  ;;  %vm7113_vm12 = vcmp.eq.f32.partialorder %v7110_v14, inf  ;;  %v7116_v16 = vand.u32 2147483648, %v7110_v14  ;;  %vm7115_vm13 = vcmp.eq.f32.partialorder %v7110_v14, 0.0 }
0x1257   : > { %v8847_v15 = vpop.eup %8846 }
0x1258   : > { %v7112_v48 = vmul.f32 %v8847_v15, %v7110_v14 }
0x125a   : > { %v7114_v17 = vsel %vm7113_vm12, %v7110_v14, %v7112_v48 }
0x125b   : > { %v7117_v18 = vsel %vm7115_vm13, %v7116_v16, %v7114_v17 }
0x125c   : > { %v7118_v6 = vadd.f32 1e-06, %v7117_v18 }
0x125e   : > { %8848 = vrcp.f32 %v7118_v6  ;;  %v7991_v6 = vld [vmem:[%s11090_s7] ss:$0 sm:$0xff]  ;;  %s9296_s7 = smov [#allocation19]  }
0x125f   : > { %s9151_s14 = sshll.u32 %s9296_s7, 4  ;;  %s9152_s14 = int_to_ptr.vmem [resolvable:$false] %s9151_s14 }
0x1260   : > { %s9153_s1 = scalar_lea.vmem %s9152_s14, 256  ;;  %p9154_p5 = scmp.lt.s32.totalorder %s10828_s10, %s9152_s14 }
0x1261   : > { %p9155_p3 = scmp.lt.s32.totalorder %s9153_s1, %s9147_s0 }
0x1263   : > { %p9156_p13 = por %p9155_p3, %p9154_p5 }
0x1265   : > { %p9157_p6 = pnand %p9156_p13, %p9150_p11 }
0x1268   : > { %v8849_v63 = vpop.eup %8848 }
0x1269   : > { %v7120_v57 = vmul.f32 %v8849_v63, %v10719_v4 }
0x126b   : > { %v7127_v19 = vmul.f32 %v7985_v20, %v7120_v57  ;;  %v7992_v20 = vld [vmem:[%s11092_s2] ss:$0 sm:$0xff] }
0x126d   : > { %v7134_v62 = vadd.f32 %v7986_v24, %v7127_v19 }
0x126f   : > { %v7349_v25 = vadd.f32 %v7135_v2, %v7134_v62 }
0x1271   : > { %8499 = vmatmul.mubr.msk.f32.vlgmr.msra.gmra.mrb[40].mxu0 %vm1067_vm1, %v7349_v25 }
0x1272   : > { %8618 = vmatpush3.bf16.msra.mxu0 %v8617_v21  ;;  %8517 = vmatprep.mubr.msk.f32.mxu0 %vm9286_vm0, %v9287_v1  ;;  %v7999_v1 = vld [vmem:[%s11085_s11 + $0x70] sm:$0xff] }
0x1273   : > { %8619 = vmatprep.subr.bf16.mxu0 %v9285_v0  ;;  %v8626_v4 = vpack.c.bf16 %v8000_v32, %v7999_v1 }
0x1276   : > { %8621 = vmatpush3.bf16.msra.mxu0 %v8620_v28 }
0x1277   : > { %8622 = vmatprep.subr.bf16.mxu0 %v9285_v0 }
0x127a   : > { %8624 = vmatpush3.bf16.msra.mxu0 %v8623_v5 }
0x127b   : > { %8625 = vmatprep.subr.bf16.mxu0 %v9285_v0 }
0x127e   : > { %8627 = vmatpush3.bf16.msra.mxu0 %v8626_v4 }
0x12e8   : > { %v7228_v36 = vpop.f32.mrb[38].mxu0 }
0x12e9   : > { %v7229_v39 = vadd.f32 %v7987_v33, %v7228_v36  ;;  %v8470_v43 = vpop.f32.mrb[39].mxu0 }
0x12eb   : > { %v7232_v8 = vmax.f32 %v7229_v39, 0.0 }
0x12ed   : > { %8488 = vmatmul.mubr.msk.f32.vlgmr.msra.gmra.mrb[50].mxu1 %vm7239_vm14, %v7232_v8 }
0x1344   : > { %v7447_v42 = vpop.f32.mrb[40].mxu0 }
0x1345   : > { %v7448_v0 = vadd.f32 %v8004_v35, %v7447_v42  ;;  %v8500_v40 = vpop.f32.mrb[41].mxu0 }
0x1347   : > { %v7451_v7 = vmax.f32 %v7448_v0, 0.0 }
0x1349   : > { %8518 = vmatmul.mubr.msk.f32.vlgmr.msra.gmra.mrb[42].mxu0 %vm7239_vm14, %v7451_v7 }
0x13c0   : > { %v7309_v44 = vpop.f32.mrb[50].mxu1 }
0x13c1   : > { %v7310_v46 = vadd.f32 %v7989_v37, %v7309_v44  ;;  %v8489_v47 = vpop.f32.mrb[51].mxu1 }
0x13c3   : > { %v7313_v49 = vadd.f32 %v7310_v46, %v10750_v10 }
0x13c5   : > { %v7314_v50 = vsel %vm1067_vm1, %v7313_v49, 0.0 }
0x13c6   : > { %7315 = vadd.xlane.f32.xlu1 %v7314_v50 }
0x141c   : > { %v7527_v52 = vpop.f32.mrb[42].mxu0 }
0x141d   : > { %v7528_v45 = vadd.f32 %v8006_v51, %v7527_v52  ;;  %v8519_v34 = vpop.f32.mrb[43].mxu0 }
0x141f   : > { %v7531_v38 = vadd.f32 %v7528_v45, %v7349_v25 }
0x1421   : > { %v7532_v53 = vsel %vm1067_vm1, %v7531_v38, 0.0 }
0x1422   : > { %7533 = vadd.xlane.f32.xlu0 %v7532_v53 }
0x1453   : > { %v7316_v54 = vpop.xlane.xlu1 %7315 }
0x1454   : > { %v7317_v55 = vmul.f32 0.03125, %v7316_v54 }
0x1456   : > { %v7318_v56 = vsub.f32 %v7313_v49, %v7317_v55 }
0x1458   : > { %v7319_v58 = vmul.f32 %v7318_v56, %v7318_v56 }
0x145a   : > { %v7320_v60 = vsel %vm1067_vm1, %v7319_v58, 0.0 }
0x145b   : > { %7321 = vadd.xlane.f32.xlu1 %v7320_v60 }
0x14af   : > { %v7534_v2 = vpop.xlane.xlu0 %7533 }
0x14b0   : > { %v7535_v11 = vmul.f32 0.03125, %v7534_v2 }
0x14b2   : > { %v10808_v12 = vsub.f32 %v7531_v38, %v7535_v11 }
0x14b4   : > { %v7537_v10 = vmul.f32 %v10808_v12, %v10808_v12 }
0x14b6   : > { %v7538_v59 = vsel %vm1067_vm1, %v7537_v10, 0.0 }
0x14b7   : > { %7539 = vadd.xlane.f32.xlu0 %v7538_v59 }
0x14e8   : > { %v7322_v61 = vpop.xlane.xlu1 %7321 }
0x14e9   : > { %v7323_v41 = vmul.f32 0.032258064, %v7322_v61 }
0x14eb   : > { %8850 = vrsqrt.f32 %v7323_v41  ;;  %vm7326_vm15 = vcmp.eq.f32.partialorder %v7323_v41, inf  ;;  %v7329_v15 = vand.u32 2147483648, %v7323_v41  ;;  %vm7328_vm0 = vcmp.eq.f32.partialorder %v7323_v41, 0.0 }
0x14f5   : > { %v8851_v13 = vpop.eup %8850 }
0x14f6   : > { %v7325_v14 = vmul.f32 %v8851_v13, %v7323_v41 }
0x14f8   : > { %v7327_v48 = vsel %vm7326_vm15, %v7323_v41, %v7325_v14 }
0x14f9   : > { %v7330_v16 = vsel %vm7328_vm0, %v7329_v15, %v7327_v48 }
0x14fa   : > { %v7331_v17 = vadd.f32 1e-06, %v7330_v16 }
0x14fc   : > { %8852 = vrcp.f32 %v7331_v17 }
0x1506   : > { %v8853_v18 = vpop.eup %8852 }
0x1507   : > { %v7333_v63 = vmul.f32 %v8853_v18, %v7318_v56 }
0x1509   : > { %v7340_v23 = vmul.f32 %v7991_v6, %v7333_v63 }
0x150b   : > { %v7347_v3 = vadd.f32 %v7992_v20, %v7340_v23 }
0x150d   : > { %7348 = vst.msk [vmem:[%s1032_s9] sm:$0xff] %vm1067_vm1, %v7347_v3 }
0x150e   : > { %9160 = shalt.err (!%p9157_p6)
}
0x150f   : > { %s9161_s15 = scalar_lea.hbm %s10826_s18, 128  ;;  %s9165_s7 = scalar_lea.hbm %s11093_s16, 256 }
0x1510   : > { %p9162_p2 = scmp.ne.s32.totalorder %s10826_s18, %s9161_s15  ;;  %p9166_p4 = scmp.lt.u32.totalorder %s10826_s18, %s11093_s16 }
0x1511   : > { %p9167_p10 = scmp.lt.u32.totalorder %s9165_s7, %s9161_s15  ;;  %p9169_p8 = scmp.lt.u32.totalorder %s9161_s15, %s10826_s18 }
0x1512   : > { %p9163_p0 = pnand %p9162_p2, %p11094_p7 }
0x1513   : > { %p9168_p12 = por %p9167_p10, %p9166_p4 }
0x1514   : > { %p9164_p1 = pneg %p9163_p0 }
0x1515   : > { %p9170_p9 = por %p9169_p8, %p9168_p12 }
0x1517   : > { %p9171_p11 = pnand %p9170_p9, %p9164_p1 }
0x1519   : > { %9174 = shalt.err (!%p9171_p11)
}
0x151a   : > { %8660 = dma.vmem_to_hbm [thread:$0]  (%p11094_p7), %s10828_s10, 128, %s10826_s18, %s7568_s13   ;;  %v8008_v26 = vld [vmem:[%s11091_s17 + $0x1] ss:$0 sm:$0xff] }
0x151b   : > { %v8009_v28 = vld [vmem:[%s11092_s2 + $0x1] ss:$0 sm:$0xff]  ;;  %s1039_s13 = scalar_lea.vmem [#allocation20], %s9811_s12  ;;  %s11095_s15 = sshll.u32 %s9459_s28, 7 }
0x151c   : > { %s7599_s1 = sshll.u32 %s1039_s13, 4  ;;  %s11096_s7 = sld [smem:[#allocation61_spill]]  ;;  %s10868_s1 = int_to_ptr.vmem [resolvable:$true] %s7599_s1 }
0x151d   : > { %s7573_s5 = scalar_lea.sflag [#allocation21], %s9808_s6  ;;  %s9175_s0 = scalar_lea.vmem %s10868_s1, 128 }
0x151e   : > { %p9176_p5 = scmp.ne.s32.totalorder %s10868_s1, %s9175_s0  ;;  %s9297_s12 = smov [#allocation20]  }
0x151f   : > { %s9179_s28 = sshll.u32 %s9297_s12, 4  ;;  %s9180_s28 = int_to_ptr.vmem [resolvable:$false] %s9179_s28 }
0x1520   : > { %p9177_p3 = pnand %p9176_p5, %p11094_p7  ;;  %s9181_s10 = scalar_lea.vmem %s9180_s28, 256 }
0x1521   : > { %p9182_p6 = scmp.lt.s32.totalorder %s10868_s1, %s9180_s28  ;;  %p9183_p2 = scmp.lt.s32.totalorder %s9181_s10, %s9175_s0 }
0x1522   : > { %s11097_s14 = smov %s11096_s7  ;;  %s10866_s16 = scalar_lea.hbm %s11096_s7, %s11095_s15 }
0x1523   : > { %p9178_p13 = pneg %p9177_p3  ;;  %p9184_p0 = por %p9183_p2, %p9182_p6 }
0x1525   : > { %p9185_p1 = pnand %p9184_p0, %p9178_p13 }
0x1544   : > { %v7540_v57 = vpop.xlane.xlu0 %7539 }
0x1545   : > { %v7541_v9 = vmul.f32 0.032258064, %v7540_v57 }
0x1547   : > { %8854 = vrsqrt.f32 %v7541_v9  ;;  %vm7544_vm2 = vcmp.eq.f32.partialorder %v7541_v9, inf  ;;  %v7547_v62 = vand.u32 2147483648, %v7541_v9  ;;  %vm7546_vm3 = vcmp.eq.f32.partialorder %v7541_v9, 0.0 }
0x1551   : > { %v8855_v24 = vpop.eup %8854 }
0x1552   : > { %v7543_v19 = vmul.f32 %v8855_v24, %v7541_v9 }
0x1554   : > { %v7545_v22 = vsel %vm7544_vm2, %v7541_v9, %v7543_v19 }
0x1555   : > { %v7548_v31 = vsel %vm7546_vm3, %v7547_v62, %v7545_v22 }
0x1556   : > { %v7549_v21 = vadd.f32 1e-06, %v7548_v31 }
0x1558   : > { %8856 = vrcp.f32 %v7549_v21 }
0x1562   : > { %v8857_v25 = vpop.eup %8856 }
0x1563   : > { %v7551_v27 = vmul.f32 %v8857_v25, %v10808_v12 }
0x1565   : > { %v7558_v29 = vmul.f32 %v8008_v26, %v7551_v27 }
0x1567   : > { %v7565_v30 = vadd.f32 %v8009_v28, %v7558_v29 }
0x1569   : > { %7566 = vst.msk [vmem:[%s1039_s13] sm:$0xff] %vm1067_vm1, %v7565_v30 }
0x156a   : > { %9188 = shalt.err (!%p9185_p1)
}
0x156b   : > { %s9189_s6 = scalar_lea.hbm %s10866_s16, 128  ;;  %s9193_s15 = scalar_lea.hbm %s11097_s14, 256 }
0x156c   : > { %p9190_p4 = scmp.ne.s32.totalorder %s10866_s16, %s9189_s6  ;;  %p9194_p8 = scmp.lt.u32.totalorder %s10866_s16, %s11097_s14 }
0x156d   : > { %p9195_p9 = scmp.lt.u32.totalorder %s9193_s15, %s9189_s6  ;;  %p9197_p5 = scmp.lt.u32.totalorder %s9189_s6, %s10866_s16 }
0x156e   : > { %p9191_p10 = pnand %p9190_p4, %p11094_p7 }
0x156f   : > { %p9196_p11 = por %p9195_p9, %p9194_p8 }
0x1570   : > { %p9192_p12 = pneg %p9191_p10 }
0x1571   : > { %p9198_p3 = por %p9197_p5, %p9196_p11 }
0x1573   : > { %p9199_p13 = pnand %p9198_p3, %p9192_p12 }
0x1575   : > { %9202 = shalt.err (!%p9199_p13)
}
0x1576   : > { %8661 = dma.vmem_to_hbm [thread:$0]  (%p11094_p7), %s10868_s1, 128, %s10866_s16, %s7573_s5  }
0x1577 PF: > { %s11098_s7 = sld [smem:[#allocation31_spill]]  ;;  %s11099_s0 = sld [smem:[#allocation35_spill]] }
0x1578   : > { %p11101_p2 = scmp.ge.s32.totalorder %s9269_s30, 2 }
0x157d   : > { %s7611_s12 = sand.u32 1, %s11098_s7   ;;  %p11100_p6 = scmp.ne.s32.totalorder %s11099_s0, 0 }
0x157e   : > { %s7612_s28 = scalar_lea.sflag [#allocation4], %s7611_s12 }
0x157f   : > { %p8697_p0 = pnand %p11101_p2, %p11100_p6 }
0x1581   : > { %9248 = dma.done.wait (!%p8697_p0), %s7612_s28, 128  }
0x1582   : > { %9250 = vsyncadd (!%p8697_p0), %s7612_s28, 4294967168  ;;  %s7621_s10 = scalar_lea.sflag [#allocation21], %s7611_s12 }
0x1583   : > { %9252 = dma.done.wait (!%p8697_p0), %s7621_s10, 128  }
0x1584   : > { %9254 = vsyncadd (!%p8697_p0), %s7621_s10, 4294967168  ;;  %s11102_s30 = sld [smem:[#allocation32_spill]]  ;;  %s11103_s3 = sld [smem:[#allocation33_spill]] }
0x1585   : > { %s11104_s7 = smov %s9261_s4  ;;  %s11105_s4 = smov %s9265_s8 }
0x158a   : > { %p53_p7 = scmp.ge.s32.totalorder %s11102_s30, 4   ;;  %s11106_s8 = smov %s11103_s3 }
0x158c   :  { %55 = sbr.rel (!%p53_p7) target bundleno = 41 (0x29), region = 269 }
0x1593   :  { %7626 = vsyncpa [#allocation3], 1 }
0x1594   :  { %7628 = vsyncpa [#allocation3 + $0x1], 1 }
0x1595   :  { %7629 = vsyncpa [#allocation6], 1 }
0x1596   :  { %7631 = vsyncpa [#allocation6 + $0x1], 1 }
0x1597   :  { %7632 = vsyncpa [#allocation9], 1 }
0x1598   :  { %7634 = vsyncpa [#allocation9 + $0x1], 1 }
0x1599   :  { %7635 = vsyncpa [#allocation12], 1 }
0x159a   :  { %7636 = vsyncpa [#allocation15], 1 }
0x159b   :  { %7637 = vsyncpa [#allocation18], 1 }
0x159c   :  { %7638 = vsyncpa [#allocation4], 1 }
0x159d   :  { %7640 = vsyncpa [#allocation4 + $0x1], 1 }
0x159e   :  { %7641 = vsyncpa [#allocation21], 1 }
0x159f   :  { %7643 = vsyncpa [#allocation21 + $0x1], 1 }

</bundles_post_ra>
